<compile_context>
chip_gen: v7x
topology: tpu7x:2x2x1
jax: 0.10.0
libtpu: 0.0.40
codegen_flags: <defaults>
</compile_context>

<pallas_src>
import functools

import numpy as np
import jax
import jax.numpy as jnp
from jax.experimental import pallas as pl
from jax.experimental.pallas import tpu as pltpu

CHANNEL_N = 16        # fixed by groups=16 in CAModel.perceive
HIDDEN = 32
FIRE_RATE = 0.5
STEP_SIZE = 1.0
ALPHA_CH = 3
ALPHA_THRESH = 0.1

# 3x3 perception filters from CAModel.__init__ (cross-correlation, matching
# F.conv2d semantics -- no kernel flip).
_ID = np.outer([0.0, 1.0, 0.0], [0.0, 1.0, 0.0])
_DX = np.outer([1.0, 2.0, 1.0], [-1.0, 0.0, 1.0]) / 8.0
_DY = _DX.T


def _ca_kernel(x_ref, rand_ref, w0_ref, w1_ref, sh_ref, sc_ref, p_ref, r_ref,
               out_ref, *, fire_rate):
    """One grid step == one batch block, fully folded lane-dense layout.

    x_ref    : (M2, W*C)        cell rows, M2 = bblk * H
    rand_ref : (M2, W)          uniform [0,1) randoms for the fire mask
    w0_ref   : (3, W*C, W*hid)  perceive+fc0 folded: one banded matrix per row offset
    w1_ref   : (W*hid, W*C)     fc1 as block-diagonal (step_size folded in)
    sh_ref   : (2, M2, M2)      0/1 row gathers: [0] = row above, [1] = row below
    sc_ref   : (2, W*C, W*C)    0/1 col gathers: [0] = pixel left, [1] = pixel right
    p_ref    : (W*C, W*C)       0/1: pick alpha lane of each pixel, broadcast over its C lanes
    r_ref    : (W, W*C)         0/1: broadcast per-pixel fire mask over its C lanes
    out_ref  : (M2, W*C)
    """
    f32 = jnp.float32
    x = x_ref[...]                                                # (M2, W*C)

    # Row-neighbour gathers (zero fill at image boundaries is baked into sh).
    # They are reused both as conv operands and as life-mask operands.
    x_up = jnp.dot(sh_ref[0], x, preferred_element_type=f32)
    x_dn = jnp.dot(sh_ref[1], x, preferred_element_type=f32)

    # perceive() + fc0 folded into three banded MXU matmuls, then ReLU.
    h = jnp.dot(x_up, w0_ref[0], preferred_element_type=f32)
    h = h + jnp.dot(x, w0_ref[1], preferred_element_type=f32)
    h = h + jnp.dot(x_dn, w0_ref[2], preferred_element_type=f32)
    h = jnp.maximum(h, 0.0)                                       # (M2, W*hid)

    # fc1 (block-diagonal) -> dx, already in the folded (W*C) layout.
    d = jnp.dot(h, w1_ref[...], preferred_element_type=f32)       # (M2, W*C)

    # Stochastic fire mask: per-pixel 0/1, broadcast across the pixel's C
    # lanes with an exact 0/1 matmul.
    upd = (rand_ref[...] <= fire_rate).astype(f32)                # (M2, W)
    upd_b = jnp.dot(upd, r_ref[...], preferred_element_type=f32)  # (M2, W*C)

    x_new = x + d * upd_b

    sc_l, sc_r = sc_ref[0], sc_ref[1]
    p_sel = p_ref[...]

    def life_mask(v, v_up, v_dn):
        # 3x3 max-pool of every channel on full-width vregs (cheap), threshold,
        # then pick each pixel's alpha lane and broadcast it over the pixel's
        # C lanes via an exact 0/1 matmul.  Zero fill at borders is equivalent
        # to max_pool's -inf padding because ALPHA_THRESH > 0.
        vm = jnp.maximum(jnp.maximum(v_up, v_dn), v)
        hm = jnp.maximum(vm, jnp.maximum(
            jnp.dot(vm, sc_l, preferred_element_type=f32),
            jnp.dot(vm, sc_r, preferred_element_type=f32)))
        alive = (hm > ALPHA_THRESH).astype(f32)
        return jnp.dot(alive, p_sel, preferred_element_type=f32)

    pre_life = life_mask(x, x_up, x_dn)                           # on x (before update)
    post_life = life_mask(
        x_new,
        jnp.dot(sh_ref[0], x_new, preferred_element_type=f32),
        jnp.dot(sh_ref[1], x_new, preferred_element_type=f32))    # on updated grid

    out_ref[...] = x_new * pre_life * post_life


def _pick_batch_block(batch, max_bblk=16):
    """Largest divisor of `batch` <= max_bblk that still leaves >= 2 grid steps
    (keeps both v7x TensorCores busy via the "parallel" grid axis)."""
    best = 1
    for cand in range(1, min(batch, max_bblk) + 1):
        if batch % cand == 0 and (batch // cand >= 2 or batch == 1):
            best = cand
    return best


def ca_forward(x, rand_u, w0, w1, fire_rate=FIRE_RATE, step_size=STEP_SIZE):
    """CAModel.forward.

    x      : (B, H, W, C) float32 cell grid (NHWC, the module's external layout)
    rand_u : (B, H, W, 1) (or (B, H, W)) uniform [0,1) randoms standing in for
             the module's torch.rand draw (kept external for reproducibility)
    w0     : (hidden, 3C) fc0 weight in PyTorch layout (columns interleaved id/dx/dy)
    w1     : (C, hidden)  fc1 weight
    """
    B, H, W, C = x.shape
    hidden = w0.shape[0]
    WC, WH = W * C, W * hidden

    bblk = _pick_batch_block(B)
    m2 = bblk * H
    grid = (B // bblk,)

    # ---- lane-dense folded views (free reshapes; no HBM zero-pad) ----
    x2 = x.astype(jnp.float32).reshape(B * H, WC)
    rand2 = rand_u.astype(jnp.float32).reshape(B * H, W)

    # ---- fold perceive() into fc0 ----
    # perceive() interleaves channels as (id_c, dx_c, dy_c); pull the three
    # (C, hidden) column groups out of fc0's (hidden, 3C) weight.
    w0 = w0.astype(jnp.float32)
    w0_id = w0[:, 0::3].T          # (C, hidden)
    w0_dx = w0[:, 1::3].T
    w0_dy = w0[:, 2::3].T

    def band(j):
        # (W, W) 0/1: output pixel w reads input pixel w + (j - 1); out-of-range
        # taps are simply absent == zero padding of F.conv2d(padding=1).
        m = np.zeros((W, W), np.float32)
        for w in range(W):
            wp = w + (j - 1)
            if 0 <= wp < W:
                m[wp, w] = 1.0
        return m

    w0_big = []
    for i in range(3):             # i = row offset (0: above, 1: same, 2: below)
        acc = jnp.zeros((WC, WH), jnp.float32)
        for j in range(3):         # j = column offset
            tap = (float(_ID[i, j]) * w0_id + float(_DX[i, j]) * w0_dx
                   + float(_DY[i, j]) * w0_dy)                    # (C, hidden)
            acc = acc + jnp.kron(jnp.asarray(band(j)), tap)
        w0_big.append(acc)
    w0_big = jnp.stack(w0_big)                                    # (3, WC, W*hidden)

    # fc1 as a block-diagonal matmul landing directly in the folded layout.
    w1_big = jnp.kron(jnp.eye(W, dtype=jnp.float32),
                      w1.astype(jnp.float32).T * step_size)       # (W*hidden, WC)

    # ---- 0/1 gather / broadcast matrices (exact in any matmul precision) ----
    # Row gathers with zero fill at per-image boundaries.
    sh_up = np.eye(m2, k=-1, dtype=np.float32)
    sh_dn = np.eye(m2, k=1, dtype=np.float32)
    for m in range(m2):
        if m % H == 0:
            sh_up[m, :] = 0.0
        if m % H == H - 1:
            sh_dn[m, :] = 0.0
    sh = jnp.asarray(np.stack([sh_up, sh_dn]))                    # (2, m2, m2)

    # Column (pixel) gathers with zero fill at image width boundaries:
    # (v @ sc[0]) reads pixel w-1, (v @ sc[1]) reads pixel w+1.
    sc_left = np.eye(WC, k=C, dtype=np.float32)
    sc_right = np.eye(WC, k=-C, dtype=np.float32)
    sc = jnp.asarray(np.stack([sc_left, sc_right]))               # (2, WC, WC)

    # Pick each pixel's alpha lane and broadcast it over the pixel's C lanes.
    sel = np.zeros((C, C), np.float32)
    sel[ALPHA_CH, :] = 1.0
    p_sel = jnp.asarray(np.kron(np.eye(W, dtype=np.float32), sel))          # (WC, WC)
    # Broadcast a per-pixel scalar (fire mask) over the pixel's C lanes.
    r_bcast = jnp.asarray(np.kron(np.eye(W, dtype=np.float32),
                                  np.ones((1, C), np.float32)))             # (W, WC)

    kernel = functools.partial(_ca_kernel, fire_rate=float(fire_rate))

    out2 = pl.pallas_call(
        kernel,
        out_shape=jax.ShapeDtypeStruct((B * H, WC), jnp.float32),
        grid_spec=pltpu.PrefetchScalarGridSpec(
            num_scalar_prefetch=0,
            grid=grid,
            in_specs=[
                pl.BlockSpec((m2, WC), lambda b: (b, 0)),        # cells
                pl.BlockSpec((m2, W), lambda b: (b, 0)),         # fire randoms
                pl.BlockSpec((3, WC, WH), lambda b: (0, 0, 0)),  # perceive+fc0 (banded)
                pl.BlockSpec((WH, WC), lambda b: (0, 0)),        # fc1 (block-diag)
                pl.BlockSpec((2, m2, m2), lambda b: (0, 0, 0)),  # row gathers
                pl.BlockSpec((2, WC, WC), lambda b: (0, 0, 0)),  # col gathers
                pl.BlockSpec((WC, WC), lambda b: (0, 0)),        # alpha selector
                pl.BlockSpec((W, WC), lambda b: (0, 0)),         # fire-mask bcast
            ],
            out_specs=pl.BlockSpec((m2, WC), lambda b: (b, 0)),
        ),
        compiler_params=pltpu.CompilerParams(
            dimension_semantics=("parallel",),
            vmem_limit_bytes=32 * 1024 * 1024),
    )(x2, rand2, w0_big, w1_big, sh, sc, p_sel, r_bcast)

    return out2.reshape(B, H, W, C)


# ---------------- pure-JAX reference (for correctness check) ----------------
def ca_forward_ref(x, rand_u, w0, w1):
    B, H, W, C = x.shape
    xp = jnp.pad(x, ((0, 0), (1, 1), (1, 1), (0, 0)))

    def dwconv(k):
        out = jnp.zeros_like(x)
        for i in range(3):
            for j in range(3):
                out = out + float(k[i, j]) * xp[:, i:i + H, j:j + W, :]
        return out

    y_id, y_dx, y_dy = dwconv(_ID), dwconv(_DX), dwconv(_DY)
    # interleave to PyTorch's (id_c, dx_c, dy_c) ordering
    y = jnp.stack([y_id, y_dx, y_dy], axis=-1).reshape(B, H, W, 3 * C)

    def living(z):
        a = jnp.pad(z[..., ALPHA_CH], ((0, 0), (1, 1), (1, 1)),
                    constant_values=-jnp.inf)
        m = jnp.full((B, H, W), -jnp.inf, jnp.float32)
        for i in range(3):
            for j in range(3):
                m = jnp.maximum(m, a[:, i:i + H, j:j + W])
        return m > ALPHA_THRESH

    pre = living(x)
    h = jnp.maximum(y @ w0.T, 0.0)
    d = (h @ w1.T) * STEP_SIZE
    upd = (rand_u <= FIRE_RATE).astype(jnp.float32)
    x_new = x + d * upd
    post = living(x_new)
    life = jnp.logical_and(pre, post)[..., None].astype(jnp.float32)
    return x_new * life


if __name__ == "__main__":
    B, H, W, C, HID = 2, 16, 16, CHANNEL_N, HIDDEN

    key = jax.random.PRNGKey(0)
    kx, kr, k0, k1 = jax.random.split(key, 4)
    x = jax.random.uniform(kx, (B, H, W, C), jnp.float32)
    # torch.rand(*x[:, :, :, :1].shape) replaced by a deterministic JAX draw.
    rand_u = jax.random.uniform(kr, (B, H, W, 1), jnp.float32)

    # fc0: Linear(3C -> hidden, bias=False); fc1: Linear(hidden -> C, bias=False).
    # NOTE: CAModel.__init__ zeroes fc1.weight; here we use small deterministic
    # random weights so the fc1 path does nontrivial work.
    w0 = jax.random.normal(k0, (HID, 3 * C), jnp.float32) * 0.1
    w1 = jax.random.normal(k1, (C, HID), jnp.float32) * 0.1

    out = jax.block_until_ready(ca_forward(x, rand_u, w0, w1))

    ref = ca_forward_ref(x, rand_u, w0, w1)
    # Tolerance: module is f64, kernel/reference are f32 with different matmul
    # groupings at the TPU default matmul precision.
    np.testing.assert_allclose(np.asarray(out), np.asarray(ref),
                               rtol=1e-2, atol=1e-2)
    print("KERNEL_OK")
</pallas_src>

<mosaic_0001>
module attributes {stable_mosaic.version = 11 : i64} {
  func.func @_ca_kernel(%arg0: i32, %arg1: memref<16x256xf32, #tpu.memory_space<vmem>>, %arg2: memref<16x16xf32, #tpu.memory_space<vmem>>, %arg3: memref<3x256x512xf32, #tpu.memory_space<vmem>>, %arg4: memref<512x256xf32, #tpu.memory_space<vmem>>, %arg5: memref<2x16x16xf32, #tpu.memory_space<vmem>>, %arg6: memref<2x256x256xf32, #tpu.memory_space<vmem>>, %arg7: memref<256x256xf32, #tpu.memory_space<vmem>>, %arg8: memref<16x256xf32, #tpu.memory_space<vmem>>, %arg9: memref<16x256xf32, #tpu.memory_space<vmem>>) attributes {dimension_semantics = [#tpu.dimension_semantics<parallel>], iteration_bounds = array<i64: 2>, scalar_prefetch = 0 : i64, scratch_operands = 0 : i64, tpu.core_type = #tpu.core_type<tc>, window_params = [{transform_indices = @transform_0, window_bounds = array<i64: 16, 256>}, {transform_indices = @transform_1, window_bounds = array<i64: 16, 16>}, {pipeline_mode = #tpu.pipeline_mode<synchronous>, transform_indices = @transform_2, window_bounds = array<i64: 3, 256, 512>}, {pipeline_mode = #tpu.pipeline_mode<synchronous>, transform_indices = @transform_3, window_bounds = array<i64: 512, 256>}, {pipeline_mode = #tpu.pipeline_mode<synchronous>, transform_indices = @transform_4, window_bounds = array<i64: 2, 16, 16>}, {pipeline_mode = #tpu.pipeline_mode<synchronous>, transform_indices = @transform_5, window_bounds = array<i64: 2, 256, 256>}, {pipeline_mode = #tpu.pipeline_mode<synchronous>, transform_indices = @transform_6, window_bounds = array<i64: 256, 256>}, {pipeline_mode = #tpu.pipeline_mode<synchronous>, transform_indices = @transform_7, window_bounds = array<i64: 16, 256>}, {transform_indices = @transform_8, window_bounds = array<i64: 16, 256>}]} {
    %c0 = arith.constant 0 : index
    %c0_0 = arith.constant 0 : index
    %0 = vector.load %arg1[%c0, %c0_0] : memref<16x256xf32, #tpu.memory_space<vmem>>, vector<16x256xf32>
    %c0_1 = arith.constant 0 : index
    %c0_2 = arith.constant 0 : index
    %c0_3 = arith.constant 0 : index
    %1 = vector.load %arg5[%c0_1, %c0_2, %c0_3] : memref<2x16x16xf32, #tpu.memory_space<vmem>>, vector<1x16x16xf32>
    %2 = vector.shape_cast %1 : vector<1x16x16xf32> to vector<16x16xf32>
    %cst = arith.constant dense<0.000000e+00> : vector<16x256xf32>
    %3 = tpu.matmul %2, %0, %cst {dimension_numbers = #tpu.dot_dimension_numbers<[1], [0], [0], [1], [0, 0, 1, 1], [], []>} : vector<16x16xf32>, vector<16x256xf32>, vector<16x256xf32> -> vector<16x256xf32>
    %c1 = arith.constant 1 : index
    %c0_4 = arith.constant 0 : index
    %c0_5 = arith.constant 0 : index
    %4 = vector.load %arg5[%c1, %c0_4, %c0_5] : memref<2x16x16xf32, #tpu.memory_space<vmem>>, vector<1x16x16xf32>
    %5 = vector.shape_cast %4 : vector<1x16x16xf32> to vector<16x16xf32>
    %cst_6 = arith.constant dense<0.000000e+00> : vector<16x256xf32>
    %6 = tpu.matmul %5, %0, %cst_6 {dimension_numbers = #tpu.dot_dimension_numbers<[1], [0], [0], [1], [0, 0, 1, 1], [], []>} : vector<16x16xf32>, vector<16x256xf32>, vector<16x256xf32> -> vector<16x256xf32>
    %c0_7 = arith.constant 0 : index
    %c0_8 = arith.constant 0 : index
    %c0_9 = arith.constant 0 : index
    %7 = vector.load %arg3[%c0_7, %c0_8, %c0_9] : memref<3x256x512xf32, #tpu.memory_space<vmem>>, vector<1x256x512xf32>
    %8 = vector.shape_cast %7 : vector<1x256x512xf32> to vector<256x512xf32>
    %cst_10 = arith.constant dense<0.000000e+00> : vector<16x512xf32>
    %9 = tpu.matmul %3, %8, %cst_10 {dimension_numbers = #tpu.dot_dimension_numbers<[1], [0], [0], [1], [0, 0, 1, 1], [], []>} : vector<16x256xf32>, vector<256x512xf32>, vector<16x512xf32> -> vector<16x512xf32>
    %c1_11 = arith.constant 1 : index
    %c0_12 = arith.constant 0 : index
    %c0_13 = arith.constant 0 : index
    %10 = vector.load %arg3[%c1_11, %c0_12, %c0_13] : memref<3x256x512xf32, #tpu.memory_space<vmem>>, vector<1x256x512xf32>
    %11 = vector.shape_cast %10 : vector<1x256x512xf32> to vector<256x512xf32>
    %cst_14 = arith.constant dense<0.000000e+00> : vector<16x512xf32>
    %12 = tpu.matmul %0, %11, %cst_14 {dimension_numbers = #tpu.dot_dimension_numbers<[1], [0], [0], [1], [0, 0, 1, 1], [], []>} : vector<16x256xf32>, vector<256x512xf32>, vector<16x512xf32> -> vector<16x512xf32>
    %13 = arith.addf %9, %12 : vector<16x512xf32>
    %c2 = arith.constant 2 : index
    %c0_15 = arith.constant 0 : index
    %c0_16 = arith.constant 0 : index
    %14 = vector.load %arg3[%c2, %c0_15, %c0_16] : memref<3x256x512xf32, #tpu.memory_space<vmem>>, vector<1x256x512xf32>
    %15 = vector.shape_cast %14 : vector<1x256x512xf32> to vector<256x512xf32>
    %cst_17 = arith.constant dense<0.000000e+00> : vector<16x512xf32>
    %16 = tpu.matmul %6, %15, %cst_17 {dimension_numbers = #tpu.dot_dimension_numbers<[1], [0], [0], [1], [0, 0, 1, 1], [], []>} : vector<16x256xf32>, vector<256x512xf32>, vector<16x512xf32> -> vector<16x512xf32>
    %17 = arith.addf %13, %16 : vector<16x512xf32>
    %cst_18 = arith.constant 0.000000e+00 : f32
    %18 = vector.broadcast %cst_18 : f32 to vector<16x512xf32>
    %19 = arith.maximumf %17, %18 : vector<16x512xf32>
    %c0_19 = arith.constant 0 : index
    %c0_20 = arith.constant 0 : index
    %20 = vector.load %arg4[%c0_19, %c0_20] : memref<512x256xf32, #tpu.memory_space<vmem>>, vector<512x256xf32>
    %cst_21 = arith.constant dense<0.000000e+00> : vector<16x256xf32>
    %21 = tpu.matmul %19, %20, %cst_21 {dimension_numbers = #tpu.dot_dimension_numbers<[1], [0], [0], [1], [0, 0, 1, 1], [], []>} : vector<16x512xf32>, vector<512x256xf32>, vector<16x256xf32> -> vector<16x256xf32>
    %c0_22 = arith.constant 0 : index
    %c0_23 = arith.constant 0 : index
    %22 = vector.load %arg2[%c0_22, %c0_23] : memref<16x16xf32, #tpu.memory_space<vmem>>, vector<16x16xf32>
    %cst_24 = arith.constant 5.000000e-01 : f32
    %23 = vector.broadcast %cst_24 : f32 to vector<16x16xf32>
    %24 = arith.cmpf ole, %22, %23 : vector<16x16xf32>
    %25 = arith.extui %24 : vector<16x16xi1> to vector<16x16xi32>
    %26 = arith.sitofp %25 : vector<16x16xi32> to vector<16x16xf32>
    %c0_25 = arith.constant 0 : index
    %c0_26 = arith.constant 0 : index
    %27 = vector.load %arg8[%c0_25, %c0_26] : memref<16x256xf32, #tpu.memory_space<vmem>>, vector<16x256xf32>
    %cst_27 = arith.constant dense<0.000000e+00> : vector<16x256xf32>
    %28 = tpu.matmul %26, %27, %cst_27 {dimension_numbers = #tpu.dot_dimension_numbers<[1], [0], [0], [1], [0, 0, 1, 1], [], []>} : vector<16x16xf32>, vector<16x256xf32>, vector<16x256xf32> -> vector<16x256xf32>
    %29 = arith.mulf %21, %28 : vector<16x256xf32>
    %30 = arith.addf %0, %29 : vector<16x256xf32>
    %c0_28 = arith.constant 0 : index
    %c0_29 = arith.constant 0 : index
    %c0_30 = arith.constant 0 : index
    %31 = vector.load %arg6[%c0_28, %c0_29, %c0_30] : memref<2x256x256xf32, #tpu.memory_space<vmem>>, vector<1x256x256xf32>
    %32 = vector.shape_cast %31 : vector<1x256x256xf32> to vector<256x256xf32>
    %c1_31 = arith.constant 1 : index
    %c0_32 = arith.constant 0 : index
    %c0_33 = arith.constant 0 : index
    %33 = vector.load %arg6[%c1_31, %c0_32, %c0_33] : memref<2x256x256xf32, #tpu.memory_space<vmem>>, vector<1x256x256xf32>
    %34 = vector.shape_cast %33 : vector<1x256x256xf32> to vector<256x256xf32>
    %c0_34 = arith.constant 0 : index
    %c0_35 = arith.constant 0 : index
    %35 = vector.load %arg7[%c0_34, %c0_35] : memref<256x256xf32, #tpu.memory_space<vmem>>, vector<256x256xf32>
    %36 = arith.maximumf %3, %6 : vector<16x256xf32>
    %37 = arith.maximumf %36, %0 : vector<16x256xf32>
    %cst_36 = arith.constant dense<0.000000e+00> : vector<16x256xf32>
    %38 = tpu.matmul %37, %32, %cst_36 {dimension_numbers = #tpu.dot_dimension_numbers<[1], [0], [0], [1], [0, 0, 1, 1], [], []>} : vector<16x256xf32>, vector<256x256xf32>, vector<16x256xf32> -> vector<16x256xf32>
    %cst_37 = arith.constant dense<0.000000e+00> : vector<16x256xf32>
    %39 = tpu.matmul %37, %34, %cst_37 {dimension_numbers = #tpu.dot_dimension_numbers<[1], [0], [0], [1], [0, 0, 1, 1], [], []>} : vector<16x256xf32>, vector<256x256xf32>, vector<16x256xf32> -> vector<16x256xf32>
    %40 = arith.maximumf %38, %39 : vector<16x256xf32>
    %41 = arith.maximumf %37, %40 : vector<16x256xf32>
    %cst_38 = arith.constant 1.000000e-01 : f32
    %42 = vector.broadcast %cst_38 : f32 to vector<16x256xf32>
    %43 = arith.cmpf ogt, %41, %42 : vector<16x256xf32>
    %44 = arith.extui %43 : vector<16x256xi1> to vector<16x256xi32>
    %45 = arith.sitofp %44 : vector<16x256xi32> to vector<16x256xf32>
    %cst_39 = arith.constant dense<0.000000e+00> : vector<16x256xf32>
    %46 = tpu.matmul %45, %35, %cst_39 {dimension_numbers = #tpu.dot_dimension_numbers<[1], [0], [0], [1], [0, 0, 1, 1], [], []>} : vector<16x256xf32>, vector<256x256xf32>, vector<16x256xf32> -> vector<16x256xf32>
    %c0_40 = arith.constant 0 : index
    %c0_41 = arith.constant 0 : index
    %c0_42 = arith.constant 0 : index
    %47 = vector.load %arg5[%c0_40, %c0_41, %c0_42] : memref<2x16x16xf32, #tpu.memory_space<vmem>>, vector<1x16x16xf32>
    %48 = vector.shape_cast %47 : vector<1x16x16xf32> to vector<16x16xf32>
    %cst_43 = arith.constant dense<0.000000e+00> : vector<16x256xf32>
    %49 = tpu.matmul %48, %30, %cst_43 {dimension_numbers = #tpu.dot_dimension_numbers<[1], [0], [0], [1], [0, 0, 1, 1], [], []>} : vector<16x16xf32>, vector<16x256xf32>, vector<16x256xf32> -> vector<16x256xf32>
    %c1_44 = arith.constant 1 : index
    %c0_45 = arith.constant 0 : index
    %c0_46 = arith.constant 0 : index
    %50 = vector.load %arg5[%c1_44, %c0_45, %c0_46] : memref<2x16x16xf32, #tpu.memory_space<vmem>>, vector<1x16x16xf32>
    %51 = vector.shape_cast %50 : vector<1x16x16xf32> to vector<16x16xf32>
    %cst_47 = arith.constant dense<0.000000e+00> : vector<16x256xf32>
    %52 = tpu.matmul %51, %30, %cst_47 {dimension_numbers = #tpu.dot_dimension_numbers<[1], [0], [0], [1], [0, 0, 1, 1], [], []>} : vector<16x16xf32>, vector<16x256xf32>, vector<16x256xf32> -> vector<16x256xf32>
    %53 = arith.maximumf %49, %52 : vector<16x256xf32>
    %54 = arith.maximumf %53, %30 : vector<16x256xf32>
    %cst_48 = arith.constant dense<0.000000e+00> : vector<16x256xf32>
    %55 = tpu.matmul %54, %32, %cst_48 {dimension_numbers = #tpu.dot_dimension_numbers<[1], [0], [0], [1], [0, 0, 1, 1], [], []>} : vector<16x256xf32>, vector<256x256xf32>, vector<16x256xf32> -> vector<16x256xf32>
    %cst_49 = arith.constant dense<0.000000e+00> : vector<16x256xf32>
    %56 = tpu.matmul %54, %34, %cst_49 {dimension_numbers = #tpu.dot_dimension_numbers<[1], [0], [0], [1], [0, 0, 1, 1], [], []>} : vector<16x256xf32>, vector<256x256xf32>, vector<16x256xf32> -> vector<16x256xf32>
    %57 = arith.maximumf %55, %56 : vector<16x256xf32>
    %58 = arith.maximumf %54, %57 : vector<16x256xf32>
    %cst_50 = arith.constant 1.000000e-01 : f32
    %59 = vector.broadcast %cst_50 : f32 to vector<16x256xf32>
    %60 = arith.cmpf ogt, %58, %59 : vector<16x256xf32>
    %61 = arith.extui %60 : vector<16x256xi1> to vector<16x256xi32>
    %62 = arith.sitofp %61 : vector<16x256xi32> to vector<16x256xf32>
    %cst_51 = arith.constant dense<0.000000e+00> : vector<16x256xf32>
    %63 = tpu.matmul %62, %35, %cst_51 {dimension_numbers = #tpu.dot_dimension_numbers<[1], [0], [0], [1], [0, 0, 1, 1], [], []>} : vector<16x256xf32>, vector<256x256xf32>, vector<16x256xf32> -> vector<16x256xf32>
    %64 = arith.mulf %30, %46 : vector<16x256xf32>
    %65 = arith.mulf %64, %63 : vector<16x256xf32>
    %c0_52 = arith.constant 0 : index
    %c0_53 = arith.constant 0 : index
    %66 = vector.load %arg9[%c0_52, %c0_53] : memref<16x256xf32, #tpu.memory_space<vmem>>, vector<16x256xf32>
    tpu.vector_store %arg9[%c0_52, %c0_53], %65 {strides = array<i32>} : memref<16x256xf32, #tpu.memory_space<vmem>>, vector<16x256xf32>,
    return
  }
  func.func @transform_0(%arg0: i32) -> (i32, i32) {
    %c0_i32 = arith.constant 0 : i32
    %c0_i32_0 = arith.constant 0 : i32
    return %arg0, %c0_i32 : i32, i32
  }
  func.func @transform_1(%arg0: i32) -> (i32, i32) {
    %c0_i32 = arith.constant 0 : i32
    %c0_i32_0 = arith.constant 0 : i32
    return %arg0, %c0_i32 : i32, i32
  }
  func.func @transform_2(%arg0: i32) -> (i32, i32, i32) {
    %c0_i32 = arith.constant 0 : i32
    %c0_i32_0 = arith.constant 0 : i32
    %c0_i32_1 = arith.constant 0 : i32
    %c0_i32_2 = arith.constant 0 : i32
    return %c0_i32, %c0_i32_0, %c0_i32_1 : i32, i32, i32
  }
  func.func @transform_3(%arg0: i32) -> (i32, i32) {
    %c0_i32 = arith.constant 0 : i32
    %c0_i32_0 = arith.constant 0 : i32
    %c0_i32_1 = arith.constant 0 : i32
    return %c0_i32, %c0_i32_0 : i32, i32
  }
  func.func @transform_4(%arg0: i32) -> (i32, i32, i32) {
    %c0_i32 = arith.constant 0 : i32
    %c0_i32_0 = arith.constant 0 : i32
    %c0_i32_1 = arith.constant 0 : i32
    %c0_i32_2 = arith.constant 0 : i32
    return %c0_i32, %c0_i32_0, %c0_i32_1 : i32, i32, i32
  }
  func.func @transform_5(%arg0: i32) -> (i32, i32, i32) {
    %c0_i32 = arith.constant 0 : i32
    %c0_i32_0 = arith.constant 0 : i32
    %c0_i32_1 = arith.constant 0 : i32
    %c0_i32_2 = arith.constant 0 : i32
    return %c0_i32, %c0_i32_0, %c0_i32_1 : i32, i32, i32
  }
  func.func @transform_6(%arg0: i32) -> (i32, i32) {
    %c0_i32 = arith.constant 0 : i32
    %c0_i32_0 = arith.constant 0 : i32
    %c0_i32_1 = arith.constant 0 : i32
    return %c0_i32, %c0_i32_0 : i32, i32
  }
  func.func @transform_7(%arg0: i32) -> (i32, i32) {
    %c0_i32 = arith.constant 0 : i32
    %c0_i32_0 = arith.constant 0 : i32
    %c0_i32_1 = arith.constant 0 : i32
    return %c0_i32, %c0_i32_0 : i32, i32
  }
  func.func @transform_8(%arg0: i32) -> (i32, i32) {
    %c0_i32 = arith.constant 0 : i32
    %c0_i32_0 = arith.constant 0 : i32
    return %arg0, %c0_i32 : i32, i32
  }
}

</mosaic_0001>

<bundles_post_ra>
// kernel: tpu_custom_call.1
= control target key start
LH: loop header
LB: loop body
LE: loop exit
PB: predicated region body
PF: predicated region fallthrough
CT: control target
= control target key end

     0   :  { %13 = vsyncpa [#allocation3], 0  ;;  %s5295_s0 = inlined_call_operand.hbm [shape: f32[32,256], index: 0, kind: input, shape index: {}]   ;;  %s5296_s1 = inlined_call_operand.vmem [shape: f32[32,16], index: 1, kind: input, shape index: {}]   ;;  %s5297_s2 = inlined_call_operand.hbm [shape: f32[3,256,512], index: 2, kind: input, shape index: {}]   ;;  %s5298_s3 = inlined_call_operand.hbm [shape: f32[512,256], index: 3, kind: input, shape index: {}]   ;;  %s5299_s4 = inlined_call_operand.hbm [shape: f32[2,16,16], index: 4, kind: input, shape index: {}]   ;;  %s5300_s5 = inlined_call_operand.hbm [shape: f32[2,256,256], index: 5, kind: input, shape index: {}]   ;;  %s5301_s6 = inlined_call_operand.hbm [shape: f32[256,256], index: 6, kind: input, shape index: {}]   ;;  %s5302_s7 = inlined_call_operand.hbm [shape: f32[16,256], index: 7, kind: input, shape index: {}]   ;;  %s5303_s8 = inlined_call_operand.hbm [shape: f32[32,256], index: 8, kind: output, shape index: {}]  }
   0x1   :  { %15 = vsyncpa [#allocation3 + $0x1], 0 }
   0x2   :  { %16 = vsyncpa [#allocation6], 0 }
   0x3   :  { %17 = vsyncpa [#allocation9], 0 }
   0x4   :  { %18 = vsyncpa [#allocation12], 0 }
   0x5   :  { %19 = vsyncpa [#allocation4], 0 }
   0x6   :  { %21 = vsyncpa [#allocation4 + $0x1], 0  ;;  %s4361_s27 = smov 0   ;;  %s4363_s28 = smov 0  }
   0x7   :  { %s4365_s29 = smov 0   ;;  %s4367_s30 = smov 0  }
   0x8 LB: > { %s4298_s9 = smov [#allocation5]   ;;  %s4382_s11 = sadd.s32 4294967295, %s4296_s30   ;;  %s4296_s30 = sphi %s4367_s30, %s5504_s30   ;;  %s4292_s29 = sphi %s4365_s29, %s5503_s29   ;;  %s4288_s28 = sphi %s4363_s28, %s5502_s28   ;;  %s4284_s27 = sphi %s4361_s27, %s5501_s27  }
   0x9   : > { %s248_s10 = sshll.u32 %s4298_s9, 4  ;;  %p2896_p0 = scmp.ge.s32.totalorder %s4296_s30, 1  ;;  %s4387_s10 = int_to_ptr.vmem [resolvable:$true] %s248_s10 }
   0xa   : > { %p5304_p1 = scmp.eq.s32.totalorder %s4382_s11, 0  ;;  %p236_p2 = scmp.lt.s32.totalorder %s4296_s30, 3 }
   0xb   : > { %s4299_s13 = smov [#allocation8]   ;;  %s4020_s18 = scalar_lea.hbm %s5297_s2, 49152 }
   0xc   : > { %p4389_p3 = pnand %p2896_p0, %p236_p2  ;;  %s274_s14 = sshll.u32 %s4299_s13, 4  ;;  %s4402_s14 = int_to_ptr.vmem [resolvable:$true] %s274_s14 }
   0xd   : > { %p4021_p7 = scmp.ne.s32.totalorder %s5297_s2, %s4020_s18  ;;  %p4027_p11 = scmp.lt.u32.totalorder %s4020_s18, %s5297_s2 }
   0xe   : > { %s5367_s12 = scalar_select %p4389_p3, 1, 0 }
   0xf   : > { %p3921_p5 = pneg %p4389_p3 }
  0x11   : > { %p4398_p6 = pnand %p3921_p5, %p5304_p1 }
  0x13   : > { %p4412_p8 = pneg %p4398_p6 }
  0x15   : > { %p4023_p9 = pnand %p4412_p8, %p4021_p7 }
  0x17   : > { %p4024_p10 = pneg %p4023_p9 }
  0x19   : > { %p4029_p12 = pnand %p4027_p11, %p4024_p10 }
  0x1b   : > { %4032 = shalt.err (!%p4029_p12)
}
  0x1c   : > { %s4033_s24 = scalar_lea.vmem %s4387_s10, 49152  ;;  %p4041_p5 = scmp.lt.s32.totalorder %s4387_s10, %s4387_s10 }
  0x1d   : > { %p4034_p13 = scmp.ne.s32.totalorder %s4387_s10, %s4033_s24  ;;  %p4042_p4 = scmp.lt.s32.totalorder %s4033_s24, %s4033_s24 }
  0x1f   : > { %p4036_p0 = pnand %p4034_p13, %p4412_p8  ;;  %p4043_p7 = por %p4042_p4, %p4041_p5 }
  0x21   : > { %p4037_p2 = pneg %p4036_p0 }
  0x23   : > { %p4044_p9 = pnand %p4043_p7, %p4037_p2 }
  0x25   : > { %4047 = shalt.err (!%p4044_p9)
}
  0x26   : > { %s4300_s25 = smov 512   ;;  %s4301_s26 = smov 32  }
  0x27   : > { %3924 = dma.hbm_to_vmem [thread:$0]  (!%p4398_p6), %s5297_s2, 49152, %s4387_s10, [#allocation6], %s4300_s25, %s4300_s25, %s4301_s26  }
  0x28   : > { %s4048_s18 = scalar_lea.hbm %s5299_s4, 512 }
  0x29   : > { %p4049_p4 = scmp.ne.s32.totalorder %s5299_s4, %s4048_s18  ;;  %p4055_p12 = scmp.lt.u32.totalorder %s4048_s18, %s5299_s4 }
  0x2b   : > { %p4051_p10 = pnand %p4049_p4, %p4412_p8 }
  0x2d   : > { %p4052_p11 = pneg %p4051_p10 }
  0x2f   : > { %p4057_p13 = pnand %p4055_p12, %p4052_p11 }
  0x31   : > { %4060 = shalt.err (!%p4057_p13)
}
  0x32   : > { %s4061_s10 = scalar_lea.vmem %s4402_s14, 512  ;;  %p4069_p7 = scmp.lt.s32.totalorder %s4402_s14, %s4402_s14 }
  0x33   : > { %p4062_p0 = scmp.ne.s32.totalorder %s4402_s14, %s4061_s10  ;;  %p4070_p9 = scmp.lt.s32.totalorder %s4061_s10, %s4061_s10 }
  0x35   : > { %p4064_p2 = pnand %p4062_p0, %p4412_p8  ;;  %p4071_p4 = por %p4070_p9, %p4069_p7 }
  0x37   : > { %p4065_p5 = pneg %p4064_p2 }
  0x39   : > { %p4072_p10 = pnand %p4071_p4, %p4065_p5 }
  0x3b   : > { %4075 = shalt.err (!%p4072_p10)
}
  0x3c   : > { %s4302_s24 = smov 128   ;;  %s4303_s25 = smov 8  }
  0x3d   : > { %3930 = dma.hbm_to_vmem [thread:$0]  (!%p4398_p6), %s5299_s4, 512, %s4402_s14, [#allocation9], %s4302_s24, %s4302_s24, %s4303_s25  }
  0x3e   : > { %s4304_s13 = smov [#allocation11]   ;;  %s4305_s17 = smov [#allocation7]  }
  0x3f   : > { %s300_s16 = sshll.u32 %s4304_s13, 4  ;;  %s261_s18 = sshll.u32 %s4305_s17, 4  ;;  %s301_s16 = int_to_ptr.vmem [resolvable:$true] %s300_s16  ;;  %s4456_s18 = int_to_ptr.vmem [resolvable:$true] %s261_s18 }
  0x40   : > { %s4076_s22 = scalar_lea.hbm %s5301_s6, 8192 }
  0x41   : > { %p4077_p11 = scmp.ne.s32.totalorder %s5301_s6, %s4076_s22  ;;  %p4083_p0 = scmp.lt.u32.totalorder %s4076_s22, %s5301_s6 }
  0x43   : > { %p4079_p12 = pnand %p4077_p11, %p4412_p8 }
  0x45   : > { %p4080_p13 = pneg %p4079_p12 }
  0x47   : > { %p4085_p2 = pnand %p4083_p0, %p4080_p13 }
  0x49   : > { %4088 = shalt.err (!%p4085_p2)
}
  0x4a   : > { %s4089_s24 = scalar_lea.vmem %s301_s16, 8192  ;;  %p4097_p4 = scmp.lt.s32.totalorder %s301_s16, %s301_s16 }
  0x4b   : > { %p4090_p5 = scmp.ne.s32.totalorder %s301_s16, %s4089_s24  ;;  %p4098_p10 = scmp.lt.s32.totalorder %s4089_s24, %s4089_s24 }
  0x4d   : > { %p4092_p7 = pnand %p4090_p5, %p4412_p8  ;;  %p4099_p1 = por %p4098_p10, %p4097_p4 }
  0x4f   : > { %p4093_p9 = pneg %p4092_p7 }
  0x51   : > { %p4100_p3 = pnand %p4099_p1, %p4093_p9 }
  0x53   : > { %4103 = shalt.err (!%p4100_p3)
}
  0x54   : > { %s5306_s25 = smov 256   ;;  %s5307_s9 = smov 16  }
  0x55   : > { %3936 = dma.hbm_to_vmem [thread:$0]  (!%p4398_p6), %s5301_s6, 8192, %s301_s16, [#allocation12], %s5306_s25, %s5306_s25, %s5307_s9  }
  0x56   : > { %s4104_s22 = scalar_lea.hbm %s5298_s3, 16384 }
  0x57   : > { %p4105_p1 = scmp.ne.s32.totalorder %s5298_s3, %s4104_s22  ;;  %p4111_p12 = scmp.lt.u32.totalorder %s4104_s22, %s5298_s3 }
  0x59   : > { %p4107_p3 = pnand %p4105_p1, %p4412_p8 }
  0x5b   : > { %p4108_p11 = pneg %p4107_p3 }
  0x5d   : > { %p4113_p13 = pnand %p4111_p12, %p4108_p11 }
  0x5f   : > { %4116 = shalt.err (!%p4113_p13)
}
  0x60   : > { %s4117_s16 = scalar_lea.vmem %s4456_s18, 16384  ;;  %p4125_p7 = scmp.lt.s32.totalorder %s4456_s18, %s4456_s18 }
  0x61   : > { %p4118_p0 = scmp.ne.s32.totalorder %s4456_s18, %s4117_s16  ;;  %p4126_p9 = scmp.lt.s32.totalorder %s4117_s16, %s4117_s16 }
  0x63   : > { %p4120_p2 = pnand %p4118_p0, %p4412_p8  ;;  %p4127_p4 = por %p4126_p9, %p4125_p7 }
  0x65   : > { %p4121_p5 = pneg %p4120_p2 }
  0x67   : > { %p4128_p10 = pnand %p4127_p4, %p4121_p5 }
  0x69   : > { %4131 = shalt.err (!%p4128_p10)
}
  0x6a   : > { %3927 = dma.hbm_to_vmem [thread:$0]  (!%p4398_p6), %s5298_s3, 16384, %s4456_s18, [#allocation6], %s5306_s25, %s5306_s25, %s5307_s9  }
  0x6b   : > { %s4308_s17 = smov [#allocation10]   ;;  %s4309_s20 = smov [#allocation13]  }
  0x6c   : > { %s287_s19 = sshll.u32 %s4308_s17, 4  ;;  %s313_s22 = sshll.u32 %s4309_s20, 4  ;;  %s288_s19 = int_to_ptr.vmem [resolvable:$true] %s287_s19  ;;  %s4505_s22 = int_to_ptr.vmem [resolvable:$true] %s313_s22 }
  0x6d   : > { %s4132_s26 = scalar_lea.hbm %s5300_s5, 16384 }
  0x6e   : > { %p4133_p1 = scmp.ne.s32.totalorder %s5300_s5, %s4132_s26  ;;  %p4139_p12 = scmp.lt.u32.totalorder %s4132_s26, %s5300_s5 }
  0x70   : > { %p4135_p3 = pnand %p4133_p1, %p4412_p8 }
  0x72   : > { %p4136_p11 = pneg %p4135_p3 }
  0x74   : > { %p4141_p13 = pnand %p4139_p12, %p4136_p11 }
  0x76   : > { %4144 = shalt.err (!%p4141_p13)
}
  0x77   : > { %s4145_s13 = scalar_lea.vmem %s288_s19, 16384  ;;  %p4153_p7 = scmp.lt.s32.totalorder %s288_s19, %s288_s19 }
  0x78   : > { %p4146_p0 = scmp.ne.s32.totalorder %s288_s19, %s4145_s13  ;;  %p4154_p9 = scmp.lt.s32.totalorder %s4145_s13, %s4145_s13 }
  0x7a   : > { %p4148_p2 = pnand %p4146_p0, %p4412_p8  ;;  %p4155_p4 = por %p4154_p9, %p4153_p7 }
  0x7c   : > { %p4149_p5 = pneg %p4148_p2 }
  0x7e   : > { %p4156_p10 = pnand %p4155_p4, %p4149_p5 }
  0x80   : > { %4159 = shalt.err (!%p4156_p10)
}
  0x81   : > { %3933 = dma.hbm_to_vmem [thread:$0]  (!%p4398_p6), %s5300_s5, 16384, %s288_s19, [#allocation9], %s5306_s25, %s5306_s25, %s5307_s9  }
  0x82   : > { %s4160_s26 = scalar_lea.hbm %s5302_s7, 512 }
  0x83   : > { %p4161_p1 = scmp.ne.s32.totalorder %s5302_s7, %s4160_s26  ;;  %p4167_p12 = scmp.lt.u32.totalorder %s4160_s26, %s5302_s7 }
  0x85   : > { %p4163_p3 = pnand %p4161_p1, %p4412_p8 }
  0x87   : > { %p4164_p11 = pneg %p4163_p3 }
  0x89   : > { %p4169_p13 = pnand %p4167_p12, %p4164_p11 }
  0x8b   : > { %4172 = shalt.err (!%p4169_p13)
}
  0x8c   : > { %s4173_s19 = scalar_lea.vmem %s4505_s22, 512  ;;  %p4181_p7 = scmp.lt.s32.totalorder %s4505_s22, %s4505_s22 }
  0x8d   : > { %p4174_p0 = scmp.ne.s32.totalorder %s4505_s22, %s4173_s19  ;;  %p4182_p9 = scmp.lt.s32.totalorder %s4173_s19, %s4173_s19 }
  0x8f   : > { %p4176_p2 = pnand %p4174_p0, %p4412_p8  ;;  %p4183_p4 = por %p4182_p9, %p4181_p7 }
  0x91   : > { %p4177_p5 = pneg %p4176_p2 }
  0x93   : > { %p4184_p10 = pnand %p4183_p4, %p4177_p5 }
  0x95   : > { %4187 = shalt.err (!%p4184_p10)
}
  0x96   : > { %3939 = dma.hbm_to_vmem [thread:$0]  (!%p4398_p6), %s5302_s7, 512, %s4505_s22, [#allocation12], %s5306_s25, %s5306_s25, %s5307_s9  }
  0x97   : > { %s2895_s15 = sadd.s32 4294967294, %s4296_s30   ;;  %s4556_s21 = sadd.s32 1, %s4296_s30  }
  0x98   : > { %s31_s20 = ssub.s32 %s4296_s30, %s4556_s21  ;;  %s34_s23 = sadd.s32 1, %s4292_s29 }
  0x99   : > { %p32_p8 = scmp.eq.s32.totalorder %s31_s20, 0  ;;  %p41_p1 = scmp.ne.s32.totalorder %s4292_s29, %s4288_s28 }
  0x9a   : > { %p42_p3 = scmp.eq.s32.totalorder %s4296_s30, 0  ;;  %p47_p11 = scmp.ne.s32.totalorder %s4288_s28, %s4284_s27 }
  0x9b   : > { %s4567_s10 = scalar_select %p32_p8, %s4292_s29, %s34_s23  }
  0x9c   : > { %p4569_p12 = por %p42_p3, %p41_p1  ;;  %p5371_p13 = scmp.eq.s32.totalorder %s4382_s11, 0 }
  0x9d   : > { %p223_p0 = scmp.eq.s32.totalorder %s4382_s11, 1  ;;  %p229_p2 = scmp.eq.s32.totalorder %s2895_s15, 1 }
  0x9e   : > { %p4575_p6 = por %p5371_p13, %p47_p11  ;;  %p3954_p5 = scmp.lt.s32.totalorder %s4296_s30, 2 }
  0x9f   : > { %s327_s14 = sand.u32 1, %s4292_s29   ;;  %p4582_p7 = por %p223_p0, %p41_p1 }
  0xa0   : > { %p4586_p9 = por %p229_p2, %p47_p11  ;;  %s2904_s18 = sshll.u32 %s327_s14, 5 }
  0xa1   : > { %s5373_s16 = scalar_select %p4582_p7, 1, 0 }
  0xa2   : > { %s5374_s24 = scalar_select %p4586_p9, 1, 0 }
  0xa3   : > { %s2954_s19 = sshll.u32 %s4296_s30, 9  ;;  %s331_s15 = scalar_lea.vmem [#allocation2], %s2904_s18 }
  0xa4   : > { %s4594_s20 = scalar_lea.hbm %s5295_s0, %s2954_s19  ;;  %s339_s23 = sshll.u32 %s331_s15, 4  ;;  %s4596_s23 = int_to_ptr.vmem [resolvable:$true] %s339_s23 }
  0xa5   : > { %p4600_p4 = pnand %p3954_p5, %p4569_p12  ;;  %s4604_s9 = scalar_lea.sflag [#allocation3], %s327_s14 }
  0xa6   : > { %s4188_s13 = scalar_lea.hbm %s4594_s20, 512  ;;  %s4193_s26 = scalar_lea.hbm %s5295_s0, 1024 }
  0xa7   : > { %p4189_p10 = scmp.ne.s32.totalorder %s4594_s20, %s4188_s13  ;;  %p4190_p8 = pneg %p4600_p4 }
  0xa8   : > { %p4194_p11 = scmp.lt.u32.totalorder %s4594_s20, %s5295_s0  ;;  %p4195_p12 = scmp.lt.u32.totalorder %s4193_s26, %s4188_s13 }
  0xa9   : > { %p4191_p1 = pnand %p4190_p8, %p4189_p10  ;;  %p4197_p0 = scmp.lt.u32.totalorder %s4188_s13, %s4594_s20 }
  0xaa   : > { %p4196_p13 = por %p4195_p12, %p4194_p11 }
  0xab   : > { %p4192_p3 = pneg %p4191_p1 }
  0xac   : > { %p4198_p2 = por %p4197_p0, %p4196_p13 }
  0xae   : > { %p4199_p5 = pnand %p4198_p2, %p4192_p3 }
  0xb0   : > { %4202 = shalt.err (!%p4199_p5)
}
  0xb1   : > { %s4203_s14 = scalar_lea.vmem %s4596_s23, 512  ;;  %s4310_s18 = smov [#allocation2]  }
  0xb2   : > { %p4204_p10 = scmp.ne.s32.totalorder %s4596_s23, %s4203_s14  ;;  %s4208_s19 = sshll.u32 %s4310_s18, 4  ;;  %s4209_s19 = int_to_ptr.vmem [resolvable:$false] %s4208_s19 }
  0xb3   : > { %s4210_s17 = scalar_lea.vmem %s4209_s19, 1024  ;;  %p4211_p7 = scmp.lt.s32.totalorder %s4596_s23, %s4209_s19 }
  0xb4   : > { %p4206_p1 = pnand %p4204_p10, %p4190_p8  ;;  %p4212_p11 = scmp.lt.s32.totalorder %s4210_s17, %s4203_s14 }
  0xb6   : > { %p4207_p9 = pneg %p4206_p1  ;;  %p4213_p12 = por %p4212_p11, %p4211_p7 }
  0xb8   : > { %p4214_p13 = pnand %p4213_p12, %p4207_p9 }
  0xba   : > { %4217 = shalt.err (!%p4214_p13)
}
  0xbb   : > { %s5376_s13 = smov 16   ;;  %s5377_s26 = smov 256  }
  0xbc   : > { %3943 = dma.hbm_to_vmem [thread:$0]  (!%p4600_p4), %s4594_s20, 512, %s4596_s23, %s4604_s9, %s5377_s26, %s5377_s26, %s5376_s13  }
  0xbd   : > { %p5378_p8 = scmp.ne.s32.totalorder %s5367_s12, 0 }
  0xbf   : > { %360 = sbr.rel (%p5378_p8) target bundleno = 1691 (0x69b), region = 52 }
  0xc6   : > { %s4638_s15 = sand.u32 1, %s4288_s28  }
  0xc7   : > { %s2909_s14 = sshll.u32 %s4638_s15, 5  ;;  %s363_s18 = scalar_lea.sflag [#allocation3], %s4638_s15 }
  0xc8   : > { %s4644_s25 = scalar_lea.vmem [#allocation2], %s2909_s14 }
  0xc9   : > { %4263 = dma.done.wait (%p4575_p6), %s363_s18, 512  }
  0xca   : > { %4265 = vsyncadd (%p4575_p6), %s363_s18, 4294966784  ;;  %p5379_p7 = scmp.eq.s32.totalorder %s4382_s11, 0 }
  0xcc   : > { %4267 = dma.done.wait (%p5379_p7), [#allocation6], 65536   ;;  %p5380_p9 = pmov %p5379_p7 }
  0xcd   : > { %p5381_p4 = pmov %p5379_p7 }
  0xce   : > { %4269 = vsyncadd (%p5380_p9), [#allocation6], 4294901760 }
  0xcf   : > { %4271 = dma.done.wait (%p5381_p4), [#allocation9], 16896   ;;  %p5382_p3 = pmov %p5381_p4 }
  0xd1   : > { %4273 = vsyncadd (%p5382_p3), [#allocation9], 4294950400  ;;  %p5383_p0 = pmov %p5382_p3 }
  0xd3   : > { %4275 = dma.done.wait (%p5383_p0), [#allocation12], 8704   ;;  %p5384_p2 = pmov %p5383_p0 }
  0xd4   : > { %v5309_v0 = vmov 0.0   ;;  %v4665_v1 = vld [vmem:[%s4644_s25 + $0x8] sm:$0xff]  ;;  %v4668_v2 = vld [vmem:[%s4644_s25 + $0x18] sm:$0xff]  ;;  %v4671_v3 = vld [vmem:[%s4644_s25] sm:$0xff]  ;;  %vm442_vm0 = vcmask 130048   ;;  %s2917_s12 = sshll.u32 %s4382_s11, 1 }
  0xd5   : > { %4277 = vsyncadd (%p5384_p2), [#allocation12], 4294958592  ;;  %513 = vmatprep.mubr.f32.mxu0 %v5309_v0  ;;  %599 = vmatprep.mubr.f32.mxu1 %v5309_v0  ;;  %v2957_v4 = vpack.c.bf16 %v4668_v2, %v4665_v1  ;;  %v4676_v5 = vld [vmem:[%s4644_s25 + $0x10] sm:$0xff]  ;;  %v440_v7 = vld [vmem:[#allocation8] sm:$0xff]  ;;  %p430_p6 = scmp.lt.s32.totalorder %s2917_s12, 3  ;;  %s427_s19 = scalar_lea.vmem [#allocation14], %s2909_s14 }
  0xd6   : > { %v2959_v6 = vpack.c.bf16 %v4676_v5, %v4671_v3  ;;  %v527_v8 = vld [vmem:[#allocation8 + $0x10] sm:$0xff]  ;;  %v742_v9 = vld [vmem:[#allocation5 + $0x408] sm:$0xff]  ;;  %v744_v11 = vld [vmem:[#allocation5 + $0x418] sm:$0xff]  ;;  %s2753_s17 = sshll.u32 %s427_s19, 4  ;;  %s2956_s13 = sshll.u32 %s4382_s11, 9  ;;  %s5246_s17 = int_to_ptr.vmem [resolvable:$true] %s2753_s17 }
  0xd7   : > { %2958 = vmatprep.subr.bf16.mxu0 %v2957_v4  ;;  %2962 = vmatprep.subr.bf16.mxu1 %v2957_v4  ;;  %v746_v10 = vld [vmem:[#allocation5 + $0x428] sm:$0xff]  ;;  %v748_v12 = vld [vmem:[#allocation5 + $0x438] sm:$0xff]  ;;  %v741_v15 = vld [vmem:[#allocation5 + $0x400] sm:$0xff]  ;;  %s5506_s12 = smov (!%p430_p6, %s2917_s12), 3  ;;  %s5251_s11 = scalar_lea.hbm %s5303_s8, %s2956_s13 }
  0xd8   : > { %2960 = vmatpush1.bf16.msra.mxu0 %v2959_v6  ;;  %2964 = vmatpush1.bf16.msra.mxu1 %v2959_v6  ;;  %v2965_v13 = vpack.c.bf16 %v746_v10, %v742_v9  ;;  %v3029_v14 = vpack.c.bf16 %v748_v12, %v744_v11  ;;  %v745_v16 = vld [vmem:[#allocation5 + $0x420] sm:$0xff]  ;;  %v743_v17 = vld [vmem:[#allocation5 + $0x410] sm:$0xff]  ;;  %v750_v20 = vld [vmem:[#allocation5 + $0x448] sm:$0xff]  ;;  %s2918_s9 = sshll.u32 %s5506_s12, 3  ;;  %s2739_s18 = scalar_lea.sflag [#allocation4], %s4638_s15 }
  0xd9   : > { %v2967_v18 = vpack.c.bf16 %v745_v16, %v741_v15  ;;  %v747_v19 = vld [vmem:[#allocation5 + $0x430] sm:$0xff]  ;;  %v754_v21 = vld [vmem:[#allocation5 + $0x468] sm:$0xff]  ;;  %v528_v23 = vld [vmem:[#allocation8 + $0x18] sm:$0xff]  ;;  %s433_s23 = scalar_lea.vmem %s5296_s1, %s2918_s9  ;;  %p5498_p10 = scmp.ne.s32.totalorder %s5373_s16, 0 }
  0xda   : > { %v441_v22 = vld [vmem:[#allocation8 + $0x8] sm:$0xff]  ;;  %2966 = vmatprep.subr.bf16.mxu0 %v2965_v13  ;;  %3030 = vmatprep.subr.bf16.mxu1 %v3029_v14  ;;  %v3031_v24 = vpack.c.bf16 %v747_v19, %v743_v17  ;;  %v2969_v25 = vpack.c.bf16 %v754_v21, %v750_v20  ;;  %v752_v26 = vld [vmem:[#allocation5 + $0x458] sm:$0xff]  ;;  %v749_v28 = vld [vmem:[#allocation5 + $0x440] sm:$0xff]  ;;  %s4313_s12 = smov [#allocation14]  }
  0xdb   : > { %v756_v27 = vld [vmem:[#allocation5 + $0x478] sm:$0xff]  ;;  %2919 = vmatmul.mubr.msk.f32.vlgmr.msra.gmra.mrb[0].mxu0 %vm442_vm0, %v440_v7  ;;  %2921 = vmatmul.mubr.msk.f32.vlgmr.msra.gmra.mrb[0].mxu1 %vm442_vm0, %v527_v8  ;;  %v753_v30 = vld [vmem:[#allocation5 + $0x460] sm:$0xff]  ;;  %v751_v31 = vld [vmem:[#allocation5 + $0x450] sm:$0xff]  ;;  %s4222_s9 = sshll.u32 %s4313_s12, 4  ;;  %s4223_s9 = int_to_ptr.vmem [resolvable:$false] %s4222_s9 }
  0xdc   : > { %v3033_v29 = vpack.c.bf16 %v756_v27, %v752_v26  ;;  %v755_v32 = vld [vmem:[#allocation5 + $0x470] sm:$0xff]  ;;  %519 = vmatprep.mubr.f32.mxu0 %v5309_v0  ;;  %605 = vmatprep.mubr.f32.mxu1 %v5309_v0  ;;  %v758_v33 = vld [vmem:[#allocation5 + $0x488] sm:$0xff]  ;;  %v760_v35 = vld [vmem:[#allocation5 + $0x498] sm:$0xff]  ;;  %v2971_v36 = vpack.c.bf16 %v753_v30, %v749_v28  ;;  %s4224_s22 = scalar_lea.vmem %s4223_s9, 1024  ;;  %p4225_p12 = scmp.lt.s32.totalorder %s5246_s17, %s4223_s9 }
  0xdd   : > { %v762_v34 = vld [vmem:[#allocation5 + $0x4a8] sm:$0xff]  ;;  %2968 = vmatpush1.bf16.msra.mxu0 %v2967_v18  ;;  %3032 = vmatpush1.bf16.msra.mxu1 %v3031_v24  ;;  %v3035_v37 = vpack.c.bf16 %v755_v32, %v751_v31  ;;  %v764_v38 = vld [vmem:[#allocation5 + $0x4b8] sm:$0xff]  ;;  %v757_v39 = vld [vmem:[#allocation5 + $0x480] sm:$0xff] }
  0xde   : > { %v761_v40 = vld [vmem:[#allocation5 + $0x4a0] sm:$0xff]  ;;  %2970 = vmatprep.subr.bf16.mxu0 %v2969_v25  ;;  %3034 = vmatprep.subr.bf16.mxu1 %v3033_v29  ;;  %v2973_v41 = vpack.c.bf16 %v762_v34, %v758_v33  ;;  %v3037_v42 = vpack.c.bf16 %v764_v38, %v760_v35  ;;  %v759_v43 = vld [vmem:[#allocation5 + $0x490] sm:$0xff]  ;;  %v766_v45 = vld [vmem:[#allocation5 + $0x4c8] sm:$0xff] }
  0xdf   : > { %v763_v44 = vld [vmem:[#allocation5 + $0x4b0] sm:$0xff]  ;;  %2920 = vmatmul.mubr.msk.f32.gmra.mrb[2].mxu0 %vm442_vm0, %v441_v22  ;;  %2922 = vmatmul.mubr.msk.f32.gmra.mrb[2].mxu1 %vm442_vm0, %v528_v23  ;;  %v770_v46 = vld [vmem:[#allocation5 + $0x4e8] sm:$0xff]  ;;  %v768_v47 = vld [vmem:[#allocation5 + $0x4d8] sm:$0xff]  ;;  %v2975_v49 = vpack.c.bf16 %v761_v40, %v757_v39 }
  0xe0   : > { %v772_v48 = vld [vmem:[#allocation5 + $0x4f8] sm:$0xff]  ;;  %933 = vmatprep.mubr.f32.mxu0 %v4665_v1  ;;  %1010 = vmatprep.mubr.f32.mxu1 %v4665_v1  ;;  %v3039_v50 = vpack.c.bf16 %v763_v44, %v759_v43  ;;  %v765_v51 = vld [vmem:[#allocation5 + $0x4c0] sm:$0xff]  ;;  %v2977_v53 = vpack.c.bf16 %v770_v46, %v766_v45  ;;  %v767_v55 = vld [vmem:[#allocation5 + $0x4d0] sm:$0xff] }
  0xe1   : > { %2972 = vmatpush1.bf16.msra.mxu0 %v2971_v36  ;;  %3036 = vmatpush1.bf16.msra.mxu1 %v3035_v37  ;;  %v769_v52 = vld [vmem:[#allocation5 + $0x4e0] sm:$0xff]  ;;  %v3041_v54 = vpack.c.bf16 %v772_v48, %v768_v47  ;;  %v771_v56 = vld [vmem:[#allocation5 + $0x4f0] sm:$0xff]  ;;  %v774_v57 = vld [vmem:[#allocation5 + $0x508] sm:$0xff] }
  0xe2   : > { %2974 = vmatprep.subr.bf16.mxu0 %v2973_v41  ;;  %3038 = vmatprep.subr.bf16.mxu1 %v3037_v42  ;;  %v778_v58 = vld [vmem:[#allocation5 + $0x528] sm:$0xff]  ;;  %v776_v59 = vld [vmem:[#allocation5 + $0x518] sm:$0xff]  ;;  %v2979_v61 = vpack.c.bf16 %v769_v52, %v765_v51  ;;  %v3043_v62 = vpack.c.bf16 %v771_v56, %v767_v55  ;;  %v773_v63 = vld [vmem:[#allocation5 + $0x500] sm:$0xff] }
  0xe3   : > { %v780_v60 = vld [vmem:[#allocation5 + $0x538] sm:$0xff]  ;;  %v777_v1 = vld [vmem:[#allocation5 + $0x520] sm:$0xff]  ;;  %v2981_v4 = vpack.c.bf16 %v778_v58, %v774_v57  ;;  %v775_v7 = vld [vmem:[#allocation5 + $0x510] sm:$0xff] }
  0xe4   : > { %v3045_v6 = vpack.c.bf16 %v780_v60, %v776_v59  ;;  %v779_v8 = vld [vmem:[#allocation5 + $0x530] sm:$0xff]  ;;  %v782_v9 = vld [vmem:[#allocation5 + $0x548] sm:$0xff]  ;;  %v784_v11 = vld [vmem:[#allocation5 + $0x558] sm:$0xff]  ;;  %v2983_v13 = vpack.c.bf16 %v777_v1, %v773_v63 }
  0xe5   : > { %2976 = vmatpush1.bf16.msra.mxu0 %v2975_v49  ;;  %3040 = vmatpush1.bf16.msra.mxu1 %v3039_v50  ;;  %v786_v10 = vld [vmem:[#allocation5 + $0x568] sm:$0xff]  ;;  %v788_v12 = vld [vmem:[#allocation5 + $0x578] sm:$0xff]  ;;  %v3047_v14 = vpack.c.bf16 %v779_v8, %v775_v7  ;;  %v781_v15 = vld [vmem:[#allocation5 + $0x540] sm:$0xff] }
  0xe6   : > { %2978 = vmatprep.subr.bf16.mxu0 %v2977_v53  ;;  %3042 = vmatprep.subr.bf16.mxu1 %v3041_v54  ;;  %v785_v16 = vld [vmem:[#allocation5 + $0x560] sm:$0xff]  ;;  %v2985_v17 = vpack.c.bf16 %v786_v10, %v782_v9  ;;  %v3049_v18 = vpack.c.bf16 %v788_v12, %v784_v11  ;;  %v783_v19 = vld [vmem:[#allocation5 + $0x550] sm:$0xff]  ;;  %v790_v21 = vld [vmem:[#allocation5 + $0x588] sm:$0xff] }
  0xe7   : > { %v787_v20 = vld [vmem:[#allocation5 + $0x570] sm:$0xff]  ;;  %v794_v22 = vld [vmem:[#allocation5 + $0x5a8] sm:$0xff]  ;;  %v792_v23 = vld [vmem:[#allocation5 + $0x598] sm:$0xff]  ;;  %v2987_v25 = vpack.c.bf16 %v785_v16, %v781_v15 }
  0xe8   : > { %v796_v24 = vld [vmem:[#allocation5 + $0x5b8] sm:$0xff]  ;;  %v3051_v26 = vpack.c.bf16 %v787_v20, %v783_v19  ;;  %v789_v27 = vld [vmem:[#allocation5 + $0x580] sm:$0xff]  ;;  %v2989_v29 = vpack.c.bf16 %v794_v22, %v790_v21  ;;  %v791_v31 = vld [vmem:[#allocation5 + $0x590] sm:$0xff] }
  0xe9   : > { %2980 = vmatpush1.bf16.msra.mxu0 %v2979_v61  ;;  %3044 = vmatpush1.bf16.msra.mxu1 %v3043_v62  ;;  %v793_v28 = vld [vmem:[#allocation5 + $0x5a0] sm:$0xff]  ;;  %v3053_v30 = vpack.c.bf16 %v796_v24, %v792_v23  ;;  %v795_v32 = vld [vmem:[#allocation5 + $0x5b0] sm:$0xff]  ;;  %v798_v33 = vld [vmem:[#allocation5 + $0x5c8] sm:$0xff] }
  0xea   : > { %2982 = vmatprep.subr.bf16.mxu0 %v2981_v4  ;;  %3046 = vmatprep.subr.bf16.mxu1 %v3045_v6  ;;  %v802_v34 = vld [vmem:[#allocation5 + $0x5e8] sm:$0xff]  ;;  %v800_v35 = vld [vmem:[#allocation5 + $0x5d8] sm:$0xff]  ;;  %v2991_v37 = vpack.c.bf16 %v793_v28, %v789_v27  ;;  %v3055_v38 = vpack.c.bf16 %v795_v32, %v791_v31  ;;  %v797_v39 = vld [vmem:[#allocation5 + $0x5c0] sm:$0xff] }
  0xeb   : > { %v804_v36 = vld [vmem:[#allocation5 + $0x5f8] sm:$0xff]  ;;  %v801_v40 = vld [vmem:[#allocation5 + $0x5e0] sm:$0xff]  ;;  %v2993_v41 = vpack.c.bf16 %v802_v34, %v798_v33  ;;  %v799_v43 = vld [vmem:[#allocation5 + $0x5d0] sm:$0xff] }
  0xec   : > { %v3057_v42 = vpack.c.bf16 %v804_v36, %v800_v35  ;;  %v803_v44 = vld [vmem:[#allocation5 + $0x5f0] sm:$0xff]  ;;  %v806_v45 = vld [vmem:[#allocation5 + $0x608] sm:$0xff]  ;;  %v808_v47 = vld [vmem:[#allocation5 + $0x618] sm:$0xff]  ;;  %v2995_v49 = vpack.c.bf16 %v801_v40, %v797_v39 }
  0xed   : > { %2984 = vmatpush1.bf16.msra.mxu0 %v2983_v13  ;;  %3048 = vmatpush1.bf16.msra.mxu1 %v3047_v14  ;;  %v810_v46 = vld [vmem:[#allocation5 + $0x628] sm:$0xff]  ;;  %v812_v48 = vld [vmem:[#allocation5 + $0x638] sm:$0xff]  ;;  %v3059_v50 = vpack.c.bf16 %v803_v44, %v799_v43  ;;  %v805_v51 = vld [vmem:[#allocation5 + $0x600] sm:$0xff] }
  0xee   : > { %2986 = vmatprep.subr.bf16.mxu0 %v2985_v17  ;;  %3050 = vmatprep.subr.bf16.mxu1 %v3049_v18  ;;  %v809_v52 = vld [vmem:[#allocation5 + $0x620] sm:$0xff]  ;;  %v2997_v53 = vpack.c.bf16 %v810_v46, %v806_v45  ;;  %v3061_v54 = vpack.c.bf16 %v812_v48, %v808_v47  ;;  %v807_v55 = vld [vmem:[#allocation5 + $0x610] sm:$0xff]  ;;  %v814_v57 = vld [vmem:[#allocation5 + $0x648] sm:$0xff] }
  0xef   : > { %v811_v56 = vld [vmem:[#allocation5 + $0x630] sm:$0xff]  ;;  %v818_v58 = vld [vmem:[#allocation5 + $0x668] sm:$0xff]  ;;  %v816_v59 = vld [vmem:[#allocation5 + $0x658] sm:$0xff]  ;;  %v2999_v61 = vpack.c.bf16 %v809_v52, %v805_v51 }
  0xf0   : > { %v820_v60 = vld [vmem:[#allocation5 + $0x678] sm:$0xff]  ;;  %v3063_v62 = vpack.c.bf16 %v811_v56, %v807_v55  ;;  %v813_v63 = vld [vmem:[#allocation5 + $0x640] sm:$0xff]  ;;  %v3001_v4 = vpack.c.bf16 %v818_v58, %v814_v57  ;;  %v815_v7 = vld [vmem:[#allocation5 + $0x650] sm:$0xff] }
  0xf1   : > { %2988 = vmatpush1.bf16.msra.mxu0 %v2987_v25  ;;  %3052 = vmatpush1.bf16.msra.mxu1 %v3051_v26  ;;  %v817_v1 = vld [vmem:[#allocation5 + $0x660] sm:$0xff]  ;;  %v3065_v6 = vpack.c.bf16 %v820_v60, %v816_v59  ;;  %v819_v8 = vld [vmem:[#allocation5 + $0x670] sm:$0xff]  ;;  %v822_v9 = vld [vmem:[#allocation5 + $0x688] sm:$0xff] }
  0xf2   : > { %2990 = vmatprep.subr.bf16.mxu0 %v2989_v29  ;;  %3054 = vmatprep.subr.bf16.mxu1 %v3053_v30  ;;  %v826_v10 = vld [vmem:[#allocation5 + $0x6a8] sm:$0xff]  ;;  %v824_v11 = vld [vmem:[#allocation5 + $0x698] sm:$0xff]  ;;  %v3003_v13 = vpack.c.bf16 %v817_v1, %v813_v63  ;;  %v3067_v14 = vpack.c.bf16 %v819_v8, %v815_v7  ;;  %v821_v15 = vld [vmem:[#allocation5 + $0x680] sm:$0xff] }
  0xf3   : > { %v828_v12 = vld [vmem:[#allocation5 + $0x6b8] sm:$0xff]  ;;  %v825_v16 = vld [vmem:[#allocation5 + $0x6a0] sm:$0xff]  ;;  %v3005_v17 = vpack.c.bf16 %v826_v10, %v822_v9  ;;  %v823_v19 = vld [vmem:[#allocation5 + $0x690] sm:$0xff] }
  0xf4   : > { %v3069_v18 = vpack.c.bf16 %v828_v12, %v824_v11  ;;  %v827_v20 = vld [vmem:[#allocation5 + $0x6b0] sm:$0xff]  ;;  %v830_v21 = vld [vmem:[#allocation5 + $0x6c8] sm:$0xff]  ;;  %v832_v23 = vld [vmem:[#allocation5 + $0x6d8] sm:$0xff]  ;;  %v3007_v25 = vpack.c.bf16 %v825_v16, %v821_v15 }
  0xf5   : > { %2992 = vmatpush1.bf16.msra.mxu0 %v2991_v37  ;;  %3056 = vmatpush1.bf16.msra.mxu1 %v3055_v38  ;;  %v834_v22 = vld [vmem:[#allocation5 + $0x6e8] sm:$0xff]  ;;  %v836_v24 = vld [vmem:[#allocation5 + $0x6f8] sm:$0xff]  ;;  %v3071_v26 = vpack.c.bf16 %v827_v20, %v823_v19  ;;  %v829_v27 = vld [vmem:[#allocation5 + $0x6c0] sm:$0xff] }
  0xf6   : > { %2994 = vmatprep.subr.bf16.mxu0 %v2993_v41  ;;  %3058 = vmatprep.subr.bf16.mxu1 %v3057_v42  ;;  %v833_v28 = vld [vmem:[#allocation5 + $0x6e0] sm:$0xff]  ;;  %v3009_v29 = vpack.c.bf16 %v834_v22, %v830_v21  ;;  %v3073_v30 = vpack.c.bf16 %v836_v24, %v832_v23  ;;  %v831_v31 = vld [vmem:[#allocation5 + $0x6d0] sm:$0xff]  ;;  %v838_v33 = vld [vmem:[#allocation5 + $0x708] sm:$0xff] }
  0xf7   : > { %v835_v32 = vld [vmem:[#allocation5 + $0x6f0] sm:$0xff]  ;;  %v842_v34 = vld [vmem:[#allocation5 + $0x728] sm:$0xff]  ;;  %v840_v35 = vld [vmem:[#allocation5 + $0x718] sm:$0xff]  ;;  %v3011_v37 = vpack.c.bf16 %v833_v28, %v829_v27 }
  0xf8   : > { %v844_v36 = vld [vmem:[#allocation5 + $0x738] sm:$0xff]  ;;  %v3075_v38 = vpack.c.bf16 %v835_v32, %v831_v31  ;;  %v837_v39 = vld [vmem:[#allocation5 + $0x700] sm:$0xff]  ;;  %v3013_v41 = vpack.c.bf16 %v842_v34, %v838_v33  ;;  %v839_v43 = vld [vmem:[#allocation5 + $0x710] sm:$0xff] }
  0xf9   : > { %2996 = vmatpush1.bf16.msra.mxu0 %v2995_v49  ;;  %3060 = vmatpush1.bf16.msra.mxu1 %v3059_v50  ;;  %v841_v40 = vld [vmem:[#allocation5 + $0x720] sm:$0xff]  ;;  %v3077_v42 = vpack.c.bf16 %v844_v36, %v840_v35  ;;  %v843_v44 = vld [vmem:[#allocation5 + $0x730] sm:$0xff]  ;;  %v846_v45 = vld [vmem:[#allocation5 + $0x748] sm:$0xff] }
  0xfa   : > { %2998 = vmatprep.subr.bf16.mxu0 %v2997_v53  ;;  %3062 = vmatprep.subr.bf16.mxu1 %v3061_v54  ;;  %v850_v46 = vld [vmem:[#allocation5 + $0x768] sm:$0xff]  ;;  %v848_v47 = vld [vmem:[#allocation5 + $0x758] sm:$0xff]  ;;  %v3015_v49 = vpack.c.bf16 %v841_v40, %v837_v39  ;;  %v3079_v50 = vpack.c.bf16 %v843_v44, %v839_v43  ;;  %v845_v51 = vld [vmem:[#allocation5 + $0x740] sm:$0xff] }
  0xfb   : > { %v852_v48 = vld [vmem:[#allocation5 + $0x778] sm:$0xff]  ;;  %v849_v52 = vld [vmem:[#allocation5 + $0x760] sm:$0xff]  ;;  %v3017_v53 = vpack.c.bf16 %v850_v46, %v846_v45  ;;  %v847_v55 = vld [vmem:[#allocation5 + $0x750] sm:$0xff] }
  0xfc   : > { %v3081_v54 = vpack.c.bf16 %v852_v48, %v848_v47  ;;  %v851_v56 = vld [vmem:[#allocation5 + $0x770] sm:$0xff]  ;;  %v854_v57 = vld [vmem:[#allocation5 + $0x788] sm:$0xff]  ;;  %v856_v59 = vld [vmem:[#allocation5 + $0x798] sm:$0xff] }
  0xfd   : > { %3000 = vmatpush1.bf16.msra.mxu0 %v2999_v61  ;;  %3064 = vmatpush1.bf16.msra.mxu1 %v3063_v62  ;;  %v858_v58 = vld [vmem:[#allocation5 + $0x7a8] sm:$0xff]  ;;  %v860_v60 = vld [vmem:[#allocation5 + $0x7b8] sm:$0xff]  ;;  %v3019_v61 = vpack.c.bf16 %v849_v52, %v845_v51  ;;  %v3083_v62 = vpack.c.bf16 %v851_v56, %v847_v55  ;;  %v853_v63 = vld [vmem:[#allocation5 + $0x780] sm:$0xff] }
  0xfe   : > { %3002 = vmatprep.subr.bf16.mxu0 %v3001_v4  ;;  %3066 = vmatprep.subr.bf16.mxu1 %v3065_v6  ;;  %v857_v1 = vld [vmem:[#allocation5 + $0x7a0] sm:$0xff]  ;;  %v3021_v4 = vpack.c.bf16 %v858_v58, %v854_v57  ;;  %v3085_v6 = vpack.c.bf16 %v860_v60, %v856_v59  ;;  %v855_v7 = vld [vmem:[#allocation5 + $0x790] sm:$0xff]  ;;  %v862_v9 = vld [vmem:[#allocation5 + $0x7c8] sm:$0xff] }
  0xff   : > { %v859_v8 = vld [vmem:[#allocation5 + $0x7b0] sm:$0xff]  ;;  %v866_v10 = vld [vmem:[#allocation5 + $0x7e8] sm:$0xff]  ;;  %v864_v11 = vld [vmem:[#allocation5 + $0x7d8] sm:$0xff] }
 0x100   : > { %v868_v12 = vld [vmem:[#allocation5 + $0x7f8] sm:$0xff]  ;;  %v861_v15 = vld [vmem:[#allocation5 + $0x7c0] sm:$0xff]  ;;  %v863_v19 = vld [vmem:[#allocation5 + $0x7d0] sm:$0xff] }
 0x101   : > { %3004 = vmatpush1.bf16.msra.mxu0 %v3003_v13  ;;  %3068 = vmatpush1.bf16.msra.mxu1 %v3067_v14  ;;  %v3023_v13 = vpack.c.bf16 %v857_v1, %v853_v63  ;;  %v3087_v14 = vpack.c.bf16 %v859_v8, %v855_v7  ;;  %v865_v16 = vld [vmem:[#allocation5 + $0x7e0] sm:$0xff]  ;;  %v867_v20 = vld [vmem:[#allocation5 + $0x7f0] sm:$0xff]  ;;  %v613_v21 = vld [vmem:[#allocation5 + $0x8] sm:$0xff] }
 0x102   : > { %3006 = vmatprep.subr.bf16.mxu0 %v3005_v17  ;;  %3070 = vmatprep.subr.bf16.mxu1 %v3069_v18  ;;  %v3025_v17 = vpack.c.bf16 %v866_v10, %v862_v9  ;;  %v3089_v18 = vpack.c.bf16 %v868_v12, %v864_v11  ;;  %v617_v22 = vld [vmem:[#allocation5 + $0x28] sm:$0xff]  ;;  %v615_v23 = vld [vmem:[#allocation5 + $0x18] sm:$0xff]  ;;  %v612_v27 = vld [vmem:[#allocation5] sm:$0xff] }
 0x103   : > { %v619_v24 = vld [vmem:[#allocation5 + $0x38] sm:$0xff]  ;;  %v616_v28 = vld [vmem:[#allocation5 + $0x20] sm:$0xff]  ;;  %v614_v31 = vld [vmem:[#allocation5 + $0x10] sm:$0xff] }
 0x104   : > { %v618_v32 = vld [vmem:[#allocation5 + $0x30] sm:$0xff]  ;;  %v621_v33 = vld [vmem:[#allocation5 + $0x48] sm:$0xff]  ;;  %v623_v35 = vld [vmem:[#allocation5 + $0x58] sm:$0xff] }
 0x105   : > { %3008 = vmatpush1.bf16.msra.mxu0 %v3007_v25  ;;  %3072 = vmatpush1.bf16.msra.mxu1 %v3071_v26  ;;  %v3027_v25 = vpack.c.bf16 %v865_v16, %v861_v15  ;;  %v3091_v26 = vpack.c.bf16 %v867_v20, %v863_v19  ;;  %v625_v34 = vld [vmem:[#allocation5 + $0x68] sm:$0xff]  ;;  %v627_v36 = vld [vmem:[#allocation5 + $0x78] sm:$0xff]  ;;  %v620_v39 = vld [vmem:[#allocation5 + $0x40] sm:$0xff] }
 0x106   : > { %3010 = vmatprep.subr.bf16.mxu0 %v3009_v29  ;;  %3074 = vmatprep.subr.bf16.mxu1 %v3073_v30  ;;  %v3093_v29 = vpack.c.bf16 %v617_v22, %v613_v21  ;;  %v3157_v30 = vpack.c.bf16 %v619_v24, %v615_v23  ;;  %v624_v40 = vld [vmem:[#allocation5 + $0x60] sm:$0xff]  ;;  %v622_v43 = vld [vmem:[#allocation5 + $0x50] sm:$0xff]  ;;  %v629_v45 = vld [vmem:[#allocation5 + $0x88] sm:$0xff] }
 0x107   : > { %v626_v44 = vld [vmem:[#allocation5 + $0x70] sm:$0xff]  ;;  %v633_v46 = vld [vmem:[#allocation5 + $0xa8] sm:$0xff]  ;;  %v631_v47 = vld [vmem:[#allocation5 + $0x98] sm:$0xff] }
 0x108   : > { %v635_v48 = vld [vmem:[#allocation5 + $0xb8] sm:$0xff]  ;;  %v628_v51 = vld [vmem:[#allocation5 + $0x80] sm:$0xff]  ;;  %v630_v55 = vld [vmem:[#allocation5 + $0x90] sm:$0xff] }
 0x109   : > { %3012 = vmatpush1.bf16.msra.mxu0 %v3011_v37  ;;  %3076 = vmatpush1.bf16.msra.mxu1 %v3075_v38  ;;  %v3095_v37 = vpack.c.bf16 %v616_v28, %v612_v27  ;;  %v3159_v38 = vpack.c.bf16 %v618_v32, %v614_v31  ;;  %v632_v52 = vld [vmem:[#allocation5 + $0xa0] sm:$0xff]  ;;  %v634_v56 = vld [vmem:[#allocation5 + $0xb0] sm:$0xff]  ;;  %v637_v57 = vld [vmem:[#allocation5 + $0xc8] sm:$0xff] }
 0x10a   : > { %3014 = vmatprep.subr.bf16.mxu0 %v3013_v41  ;;  %3078 = vmatprep.subr.bf16.mxu1 %v3077_v42  ;;  %v3097_v41 = vpack.c.bf16 %v625_v34, %v621_v33  ;;  %v3161_v42 = vpack.c.bf16 %v627_v36, %v623_v35  ;;  %v641_v58 = vld [vmem:[#allocation5 + $0xe8] sm:$0xff]  ;;  %v639_v59 = vld [vmem:[#allocation5 + $0xd8] sm:$0xff]  ;;  %v640_v63 = vld [vmem:[#allocation5 + $0xe0] sm:$0xff] }
 0x10b   : > { %v643_v60 = vld [vmem:[#allocation5 + $0xf8] sm:$0xff]  ;;  %v3105_v1 = vpack.c.bf16 %v641_v58, %v637_v57  ;;  %v642_v7 = vld [vmem:[#allocation5 + $0xf0] sm:$0xff]  ;;  %v645_v8 = vld [vmem:[#allocation5 + $0x108] sm:$0xff] }
 0x10c   : > { %v649_v9 = vld [vmem:[#allocation5 + $0x128] sm:$0xff]  ;;  %v647_v10 = vld [vmem:[#allocation5 + $0x118] sm:$0xff]  ;;  %v644_v12 = vld [vmem:[#allocation5 + $0x100] sm:$0xff] }
 0x10d   : > { %3016 = vmatpush1.bf16.msra.mxu0 %v3015_v49  ;;  %3080 = vmatpush1.bf16.msra.mxu1 %v3079_v50  ;;  %v3099_v49 = vpack.c.bf16 %v624_v40, %v620_v39  ;;  %v3163_v50 = vpack.c.bf16 %v626_v44, %v622_v43  ;;  %v646_v16 = vld [vmem:[#allocation5 + $0x110] sm:$0xff]  ;;  %v657_v19 = vld [vmem:[#allocation5 + $0x168] sm:$0xff]  ;;  %v655_v20 = vld [vmem:[#allocation5 + $0x158] sm:$0xff] }
 0x10e   : > { %3018 = vmatprep.subr.bf16.mxu0 %v3017_v53  ;;  %3082 = vmatprep.subr.bf16.mxu1 %v3081_v54  ;;  %v3101_v53 = vpack.c.bf16 %v633_v46, %v629_v45  ;;  %v3165_v54 = vpack.c.bf16 %v635_v48, %v631_v47  ;;  %v659_v21 = vld [vmem:[#allocation5 + $0x178] sm:$0xff]  ;;  %v652_v24 = vld [vmem:[#allocation5 + $0x140] sm:$0xff]  ;;  %v654_v28 = vld [vmem:[#allocation5 + $0x150] sm:$0xff] }
 0x10f   : > { %v3177_v27 = vpack.c.bf16 %v659_v21, %v655_v20  ;;  %v665_v31 = vld [vmem:[#allocation5 + $0x1a8] sm:$0xff]  ;;  %v663_v32 = vld [vmem:[#allocation5 + $0x198] sm:$0xff]  ;;  %v660_v36 = vld [vmem:[#allocation5 + $0x180] sm:$0xff] }
 0x110   : > { %v667_v33 = vld [vmem:[#allocation5 + $0x1b8] sm:$0xff]  ;;  %v662_v40 = vld [vmem:[#allocation5 + $0x190] sm:$0xff]  ;;  %v673_v43 = vld [vmem:[#allocation5 + $0x1e8] sm:$0xff] }
 0x111   : > { %3020 = vmatpush1.bf16.msra.mxu0 %v3019_v61  ;;  %3084 = vmatpush1.bf16.msra.mxu1 %v3083_v62  ;;  %v3167_v61 = vpack.c.bf16 %v634_v56, %v630_v55  ;;  %v636_v62 = vld [vmem:[#allocation5 + $0xc0] sm:$0xff]  ;;  %v3181_v39 = vpack.c.bf16 %v667_v33, %v663_v32  ;;  %v671_v44 = vld [vmem:[#allocation5 + $0x1d8] sm:$0xff]  ;;  %v681_v55 = vld [vmem:[#allocation5 + $0x228] sm:$0xff] }
 0x112   : > { %3022 = vmatprep.subr.bf16.mxu0 %v3021_v4  ;;  %3086 = vmatprep.subr.bf16.mxu1 %v3085_v6  ;;  %v3169_v4 = vpack.c.bf16 %v643_v60, %v639_v59  ;;  %v638_v6 = vld [vmem:[#allocation5 + $0xd0] sm:$0xff]  ;;  %v3107_v11 = vpack.c.bf16 %v640_v63, %v636_v62  ;;  %v675_v45 = vld [vmem:[#allocation5 + $0x1f8] sm:$0xff]  ;;  %v668_v48 = vld [vmem:[#allocation5 + $0x1c0] sm:$0xff] }
 0x113   : > { %v679_v56 = vld [vmem:[#allocation5 + $0x218] sm:$0xff]  ;;  %v676_v60 = vld [vmem:[#allocation5 + $0x200] sm:$0xff]  ;;  %v678_v63 = vld [vmem:[#allocation5 + $0x210] sm:$0xff] }
 0x114   : > { %v683_v57 = vld [vmem:[#allocation5 + $0x238] sm:$0xff]  ;;  %v692_v21 = vld [vmem:[#allocation5 + $0x280] sm:$0xff]  ;;  %v1955_v0 = vld [vmem:[#allocation10 + $0x2e8] sm:$0xff] }
 0x115   : > { %3024 = vmatpush1.bf16.msra.mxu0 %v3023_v13  ;;  %3088 = vmatpush1.bf16.msra.mxu1 %v3087_v14  ;;  %v648_v13 = vld [vmem:[#allocation5 + $0x120] sm:$0xff]  ;;  %v3109_v14 = vpack.c.bf16 %v649_v9, %v645_v8  ;;  %v3189_v62 = vpack.c.bf16 %v683_v57, %v679_v56  ;;  %v691_v8 = vld [vmem:[#allocation5 + $0x278] sm:$0xff] }
 0x116   : > { %3026 = vmatprep.subr.bf16.mxu0 %v3025_v17  ;;  %3090 = vmatprep.subr.bf16.mxu1 %v3089_v18  ;;  %v650_v17 = vld [vmem:[#allocation5 + $0x130] sm:$0xff]  ;;  %v653_v18 = vld [vmem:[#allocation5 + $0x148] sm:$0xff]  ;;  %v3111_v22 = vpack.c.bf16 %v648_v13, %v644_v12  ;;  %v700_v33 = vld [vmem:[#allocation5 + $0x2c0] sm:$0xff] }
 0x117   : > { %v3175_v23 = vpack.c.bf16 %v650_v17, %v646_v16  ;;  %v686_v13 = vld [vmem:[#allocation5 + $0x250] sm:$0xff]  ;;  %v697_v16 = vld [vmem:[#allocation5 + $0x2a8] sm:$0xff]  ;;  %v695_v17 = vld [vmem:[#allocation5 + $0x298] sm:$0xff] }
 0x118   : > { %v716_v57 = vld [vmem:[#allocation5 + $0x340] sm:$0xff] }
 0x119   : > { %3028 = vmatpush1.bf16.msra.mxu0 %v3027_v25  ;;  %3092 = vmatpush1.bf16.msra.mxu1 %v3091_v26  ;;  %v656_v25 = vld [vmem:[#allocation5 + $0x160] sm:$0xff]  ;;  %v3113_v26 = vpack.c.bf16 %v657_v19, %v653_v18  ;;  %v699_v18 = vld [vmem:[#allocation5 + $0x2b8] sm:$0xff] }
 0x11a   : > { %3094 = vmatprep.subr.bf16.mxu0 %v3093_v29  ;;  %3158 = vmatprep.subr.bf16.mxu1 %v3157_v30  ;;  %v658_v29 = vld [vmem:[#allocation5 + $0x170] sm:$0xff]  ;;  %v661_v30 = vld [vmem:[#allocation5 + $0x188] sm:$0xff]  ;;  %v3115_v34 = vpack.c.bf16 %v656_v25, %v652_v24  ;;  %v3197_v24 = vpack.c.bf16 %v699_v18, %v695_v17  ;;  %v732_v18 = vld [vmem:[#allocation5 + $0x3c0] sm:$0xff] }
 0x11b   : > { %v3179_v35 = vpack.c.bf16 %v658_v29, %v654_v28  ;;  %v694_v25 = vld [vmem:[#allocation5 + $0x290] sm:$0xff]  ;;  %v705_v28 = vld [vmem:[#allocation5 + $0x2e8] sm:$0xff]  ;;  %v703_v29 = vld [vmem:[#allocation5 + $0x2d8] sm:$0xff] }
 0x11c   : > { %934 = vmatmul.mubr.f32.vlgmr.msra.gmra.mrb[4].mxu0 %v4671_v3  ;;  %1011 = vmatmul.mubr.f32.vlgmr.msra.gmra.mrb[4].mxu1 %v4671_v3  ;;  %v3103_v3 = vpack.c.bf16 %v632_v52, %v628_v51  ;;  %v3185_v51 = vpack.c.bf16 %v675_v45, %v671_v44  ;;  %v670_v52 = vld [vmem:[#allocation5 + $0x1d0] sm:$0xff]  ;;  %v708_v45 = vld [vmem:[#allocation5 + $0x300] sm:$0xff] }
 0x11d   : > { %3096 = vmatpush1.bf16.msra.mxu0 %v3095_v37  ;;  %3160 = vmatpush1.bf16.msra.mxu1 %v3159_v38  ;;  %v664_v37 = vld [vmem:[#allocation5 + $0x1a0] sm:$0xff]  ;;  %v3117_v38 = vpack.c.bf16 %v665_v31, %v661_v30  ;;  %v707_v30 = vld [vmem:[#allocation5 + $0x2f8] sm:$0xff] }
 0x11e   : > { %3098 = vmatprep.subr.bf16.mxu0 %v3097_v41  ;;  %3162 = vmatprep.subr.bf16.mxu1 %v3161_v42  ;;  %v666_v41 = vld [vmem:[#allocation5 + $0x1b0] sm:$0xff]  ;;  %v669_v42 = vld [vmem:[#allocation5 + $0x1c8] sm:$0xff]  ;;  %v3119_v46 = vpack.c.bf16 %v664_v37, %v660_v36  ;;  %v3201_v36 = vpack.c.bf16 %v707_v30, %v703_v29 }
 0x11f   : > { %939 = vmatprep.mubr.f32.mxu0 %v4668_v2  ;;  %1016 = vmatprep.mubr.f32.mxu1 %v4668_v2  ;;  %v651_v2 = vld [vmem:[#allocation5 + $0x138] sm:$0xff]  ;;  %v3183_v47 = vpack.c.bf16 %v666_v41, %v662_v40  ;;  %v702_v37 = vld [vmem:[#allocation5 + $0x2d0] sm:$0xff]  ;;  %v713_v40 = vld [vmem:[#allocation5 + $0x328] sm:$0xff] }
 0x120   : > { %940 = vmatmul.mubr.f32.gmra.mrb[6].mxu0 %v4676_v5  ;;  %1017 = vmatmul.mubr.f32.gmra.mrb[6].mxu1 %v4676_v5  ;;  %v3171_v5 = vpack.c.bf16 %v642_v7, %v638_v6  ;;  %v3173_v15 = vpack.c.bf16 %v651_v2, %v647_v10  ;;  %v689_v6 = vld [vmem:[#allocation5 + $0x268] sm:$0xff]  ;;  %v687_v7 = vld [vmem:[#allocation5 + $0x258] sm:$0xff]  ;;  %v684_v2 = vld [vmem:[#allocation5 + $0x240] sm:$0xff] }
 0x121   : > { %3100 = vmatpush1.bf16.msra.mxu0 %v3099_v49  ;;  %3164 = vmatpush1.bf16.msra.mxu1 %v3163_v50  ;;  %v672_v49 = vld [vmem:[#allocation5 + $0x1e0] sm:$0xff]  ;;  %v3121_v50 = vpack.c.bf16 %v673_v43, %v669_v42  ;;  %v3193_v12 = vpack.c.bf16 %v691_v8, %v687_v7  ;;  %v711_v41 = vld [vmem:[#allocation5 + $0x318] sm:$0xff] }
 0x122   : > { %3102 = vmatprep.subr.bf16.mxu0 %v3101_v53  ;;  %3166 = vmatprep.subr.bf16.mxu1 %v3165_v54  ;;  %v674_v53 = vld [vmem:[#allocation5 + $0x1f0] sm:$0xff]  ;;  %v677_v54 = vld [vmem:[#allocation5 + $0x208] sm:$0xff]  ;;  %v3123_v58 = vpack.c.bf16 %v672_v49, %v668_v48  ;;  %v715_v42 = vld [vmem:[#allocation5 + $0x338] sm:$0xff] }
 0x123   : > { %v3187_v59 = vpack.c.bf16 %v674_v53, %v670_v52  ;;  %v3205_v48 = vpack.c.bf16 %v715_v42, %v711_v41  ;;  %v710_v49 = vld [vmem:[#allocation5 + $0x310] sm:$0xff]  ;;  %v721_v52 = vld [vmem:[#allocation5 + $0x368] sm:$0xff]  ;;  %v719_v53 = vld [vmem:[#allocation5 + $0x358] sm:$0xff] }
 0x124   : > { %v724_v8 = vld [vmem:[#allocation5 + $0x380] sm:$0xff] }
 0x125   : > { %3104 = vmatpush1.bf16.msra.mxu0 %v3103_v3  ;;  %3168 = vmatpush1.bf16.msra.mxu1 %v3167_v61  ;;  %v680_v3 = vld [vmem:[#allocation5 + $0x220] sm:$0xff]  ;;  %v3125_v61 = vpack.c.bf16 %v681_v55, %v677_v54  ;;  %v723_v54 = vld [vmem:[#allocation5 + $0x378] sm:$0xff] }
 0x126   : > { %3106 = vmatprep.subr.bf16.mxu0 %v3105_v1  ;;  %3170 = vmatprep.subr.bf16.mxu1 %v3169_v4  ;;  %v682_v1 = vld [vmem:[#allocation5 + $0x230] sm:$0xff]  ;;  %v685_v4 = vld [vmem:[#allocation5 + $0x248] sm:$0xff]  ;;  %v3127_v9 = vpack.c.bf16 %v680_v3, %v676_v60  ;;  %v3209_v60 = vpack.c.bf16 %v723_v54, %v719_v53 }
 0x127   : > { %v3191_v10 = vpack.c.bf16 %v682_v1, %v678_v63  ;;  %v718_v3 = vld [vmem:[#allocation5 + $0x350] sm:$0xff]  ;;  %v729_v63 = vld [vmem:[#allocation5 + $0x3a8] sm:$0xff]  ;;  %v727_v1 = vld [vmem:[#allocation5 + $0x398] sm:$0xff] }
 0x128   : > { %v1195_v53 = vld [vmem:[#allocation5 + $0x888] sm:$0xff] }
 0x129   : > { %3108 = vmatpush1.bf16.msra.mxu0 %v3107_v11  ;;  %3172 = vmatpush1.bf16.msra.mxu1 %v3171_v5  ;;  %v688_v11 = vld [vmem:[#allocation5 + $0x260] sm:$0xff]  ;;  %v3129_v5 = vpack.c.bf16 %v689_v6, %v685_v4  ;;  %v731_v4 = vld [vmem:[#allocation5 + $0x3b8] sm:$0xff] }
 0x12a   : > { %3110 = vmatprep.subr.bf16.mxu0 %v3109_v14  ;;  %3174 = vmatprep.subr.bf16.mxu1 %v3173_v15  ;;  %v690_v14 = vld [vmem:[#allocation5 + $0x270] sm:$0xff]  ;;  %v693_v15 = vld [vmem:[#allocation5 + $0x288] sm:$0xff]  ;;  %v3131_v19 = vpack.c.bf16 %v688_v11, %v684_v2  ;;  %v3213_v2 = vpack.c.bf16 %v731_v4, %v727_v1 }
 0x12b   : > { %v3195_v20 = vpack.c.bf16 %v690_v14, %v686_v13  ;;  %v726_v11 = vld [vmem:[#allocation5 + $0x390] sm:$0xff]  ;;  %v737_v13 = vld [vmem:[#allocation5 + $0x3e8] sm:$0xff]  ;;  %v735_v14 = vld [vmem:[#allocation5 + $0x3d8] sm:$0xff] }
 0x12c   : > { %v1196_v4 = vld [vmem:[#allocation5 + $0x890] sm:$0xff] }
 0x12d   : > { %3112 = vmatpush1.bf16.msra.mxu0 %v3111_v22  ;;  %3176 = vmatpush1.bf16.msra.mxu1 %v3175_v23  ;;  %v696_v22 = vld [vmem:[#allocation5 + $0x2a0] sm:$0xff]  ;;  %v3133_v23 = vpack.c.bf16 %v697_v16, %v693_v15  ;;  %v739_v15 = vld [vmem:[#allocation5 + $0x3f8] sm:$0xff] }
 0x12e   : > { %3114 = vmatprep.subr.bf16.mxu0 %v3113_v26  ;;  %3178 = vmatprep.subr.bf16.mxu1 %v3177_v27  ;;  %v698_v26 = vld [vmem:[#allocation5 + $0x2b0] sm:$0xff]  ;;  %v701_v27 = vld [vmem:[#allocation5 + $0x2c8] sm:$0xff]  ;;  %v3135_v31 = vpack.c.bf16 %v696_v22, %v692_v21  ;;  %v3217_v21 = vpack.c.bf16 %v739_v15, %v735_v14  ;;  %v1202_v15 = vld [vmem:[#allocation5 + $0x8c0] sm:$0xff] }
 0x12f   : > { %v3199_v32 = vpack.c.bf16 %v698_v26, %v694_v25  ;;  %v734_v22 = vld [vmem:[#allocation5 + $0x3d0] sm:$0xff]  ;;  %v1183_v25 = vld [vmem:[#allocation5 + $0x828] sm:$0xff]  ;;  %v1181_v26 = vld [vmem:[#allocation5 + $0x818] sm:$0xff] }
 0x131   : > { %3116 = vmatpush1.bf16.msra.mxu0 %v3115_v34  ;;  %3180 = vmatpush1.bf16.msra.mxu1 %v3179_v35  ;;  %v704_v34 = vld [vmem:[#allocation5 + $0x2e0] sm:$0xff]  ;;  %v3137_v35 = vpack.c.bf16 %v705_v28, %v701_v27  ;;  %v1185_v27 = vld [vmem:[#allocation5 + $0x838] sm:$0xff] }
 0x132   : > { %3118 = vmatprep.subr.bf16.mxu0 %v3117_v38  ;;  %3182 = vmatprep.subr.bf16.mxu1 %v3181_v39  ;;  %v706_v38 = vld [vmem:[#allocation5 + $0x2f0] sm:$0xff]  ;;  %v709_v39 = vld [vmem:[#allocation5 + $0x308] sm:$0xff]  ;;  %v3139_v43 = vpack.c.bf16 %v704_v34, %v700_v33  ;;  %v1182_v33 = vld [vmem:[#allocation5 + $0x820] sm:$0xff] }
 0x133   : > { %v3203_v44 = vpack.c.bf16 %v706_v38, %v702_v37  ;;  %v1180_v34 = vld [vmem:[#allocation5 + $0x810] sm:$0xff]  ;;  %v1191_v37 = vld [vmem:[#allocation5 + $0x868] sm:$0xff]  ;;  %v1189_v38 = vld [vmem:[#allocation5 + $0x858] sm:$0xff] }
 0x135   : > { %3120 = vmatpush1.bf16.msra.mxu0 %v3119_v46  ;;  %3184 = vmatpush1.bf16.msra.mxu1 %v3183_v47  ;;  %v712_v46 = vld [vmem:[#allocation5 + $0x320] sm:$0xff]  ;;  %v3141_v47 = vpack.c.bf16 %v713_v40, %v709_v39  ;;  %v1193_v39 = vld [vmem:[#allocation5 + $0x878] sm:$0xff] }
 0x136   : > { %3122 = vmatprep.subr.bf16.mxu0 %v3121_v50  ;;  %3186 = vmatprep.subr.bf16.mxu1 %v3185_v51  ;;  %v714_v50 = vld [vmem:[#allocation5 + $0x330] sm:$0xff]  ;;  %v717_v51 = vld [vmem:[#allocation5 + $0x348] sm:$0xff]  ;;  %v3143_v55 = vpack.c.bf16 %v712_v46, %v708_v45  ;;  %v1190_v45 = vld [vmem:[#allocation5 + $0x860] sm:$0xff] }
 0x137   : > { %v3207_v56 = vpack.c.bf16 %v714_v50, %v710_v49  ;;  %v3289_v50 = vpack.c.bf16 %v1193_v39, %v1189_v38  ;;  %v1218_v39 = vld [vmem:[#allocation5 + $0x940] sm:$0xff] }
 0x139   : > { %3124 = vmatpush1.bf16.msra.mxu0 %v3123_v58  ;;  %3188 = vmatpush1.bf16.msra.mxu1 %v3187_v59  ;;  %v720_v58 = vld [vmem:[#allocation5 + $0x360] sm:$0xff]  ;;  %v3145_v59 = vpack.c.bf16 %v721_v52, %v717_v51  ;;  %v1188_v51 = vld [vmem:[#allocation5 + $0x850] sm:$0xff] }
 0x13a   : > { %3126 = vmatprep.subr.bf16.mxu0 %v3125_v61  ;;  %3190 = vmatprep.subr.bf16.mxu1 %v3189_v62  ;;  %v722_v61 = vld [vmem:[#allocation5 + $0x370] sm:$0xff]  ;;  %v725_v62 = vld [vmem:[#allocation5 + $0x388] sm:$0xff]  ;;  %v3147_v6 = vpack.c.bf16 %v720_v58, %v716_v57  ;;  %v1201_v57 = vld [vmem:[#allocation5 + $0x8b8] sm:$0xff] }
 0x13b   : > { %v3211_v7 = vpack.c.bf16 %v722_v61, %v718_v3  ;;  %v1192_v52 = vld [vmem:[#allocation5 + $0x870] sm:$0xff]  ;;  %v1198_v3 = vld [vmem:[#allocation5 + $0x8a0] sm:$0xff] }
 0x13d   : > { %3128 = vmatpush1.bf16.msra.mxu0 %v3127_v9  ;;  %3192 = vmatpush1.bf16.msra.mxu1 %v3191_v10  ;;  %v728_v9 = vld [vmem:[#allocation5 + $0x3a0] sm:$0xff]  ;;  %v3149_v10 = vpack.c.bf16 %v729_v63, %v725_v62 }
 0x13e   : > { %3130 = vmatprep.subr.bf16.mxu0 %v3129_v5  ;;  %3194 = vmatprep.subr.bf16.mxu1 %v3193_v12  ;;  %v730_v5 = vld [vmem:[#allocation5 + $0x3b0] sm:$0xff]  ;;  %v733_v12 = vld [vmem:[#allocation5 + $0x3c8] sm:$0xff]  ;;  %v3151_v16 = vpack.c.bf16 %v728_v9, %v724_v8 }
 0x13f   : > { %v3215_v17 = vpack.c.bf16 %v730_v5, %v726_v11  ;;  %v1205_v11 = vld [vmem:[#allocation5 + $0x8d8] sm:$0xff] }
 0x140   : > { %v1209_v5 = vld [vmem:[#allocation5 + $0x8f8] sm:$0xff] }
 0x141   : > { %3132 = vmatpush1.bf16.msra.mxu0 %v3131_v19  ;;  %3196 = vmatpush1.bf16.msra.mxu1 %v3195_v20  ;;  %v736_v19 = vld [vmem:[#allocation5 + $0x3e0] sm:$0xff]  ;;  %v3153_v20 = vpack.c.bf16 %v737_v13, %v733_v12 }
 0x142   : > { %3134 = vmatprep.subr.bf16.mxu0 %v3133_v23  ;;  %3198 = vmatprep.subr.bf16.mxu1 %v3197_v24  ;;  %v738_v23 = vld [vmem:[#allocation5 + $0x3f0] sm:$0xff]  ;;  %v1179_v24 = vld [vmem:[#allocation5 + $0x808] sm:$0xff]  ;;  %v3155_v28 = vpack.c.bf16 %v736_v19, %v732_v18  ;;  %v3297_v18 = vpack.c.bf16 %v1209_v5, %v1205_v11  ;;  %v1234_v5 = vld [vmem:[#allocation5 + $0x9c0] sm:$0xff] }
 0x143   : > { %v3219_v29 = vpack.c.bf16 %v738_v23, %v734_v22  ;;  %v3221_v30 = vpack.c.bf16 %v1183_v25, %v1179_v24  ;;  %v1204_v19 = vld [vmem:[#allocation5 + $0x8d0] sm:$0xff]  ;;  %v1215_v22 = vld [vmem:[#allocation5 + $0x928] sm:$0xff]  ;;  %v1213_v23 = vld [vmem:[#allocation5 + $0x918] sm:$0xff] }
 0x144   : > { %v1217_v24 = vld [vmem:[#allocation5 + $0x938] sm:$0xff] }
 0x145   : > { %3136 = vmatpush1.bf16.msra.mxu0 %v3135_v31  ;;  %3200 = vmatpush1.bf16.msra.mxu1 %v3199_v32  ;;  %v3285_v31 = vpack.c.bf16 %v1185_v27, %v1181_v26  ;;  %v1178_v32 = vld [vmem:[#allocation5 + $0x800] sm:$0xff] }
 0x146   : > { %3138 = vmatprep.subr.bf16.mxu0 %v3137_v35  ;;  %3202 = vmatprep.subr.bf16.mxu1 %v3201_v36  ;;  %v1184_v35 = vld [vmem:[#allocation5 + $0x830] sm:$0xff]  ;;  %v1187_v36 = vld [vmem:[#allocation5 + $0x848] sm:$0xff]  ;;  %v3223_v42 = vpack.c.bf16 %v1182_v33, %v1178_v32  ;;  %v1210_v27 = vld [vmem:[#allocation5 + $0x900] sm:$0xff] }
 0x147   : > { %v3225_v49 = vpack.c.bf16 %v1191_v37, %v1187_v36  ;;  %v1216_v32 = vld [vmem:[#allocation5 + $0x930] sm:$0xff]  ;;  %v1219_v33 = vld [vmem:[#allocation5 + $0x948] sm:$0xff]  ;;  %v1225_v36 = vld [vmem:[#allocation5 + $0x978] sm:$0xff] }
 0x149   : > { %3140 = vmatpush1.bf16.msra.mxu0 %v3139_v43  ;;  %3204 = vmatpush1.bf16.msra.mxu1 %v3203_v44  ;;  %v3287_v43 = vpack.c.bf16 %v1184_v35, %v1180_v34  ;;  %v1186_v44 = vld [vmem:[#allocation5 + $0x840] sm:$0xff]  ;;  %v1223_v34 = vld [vmem:[#allocation5 + $0x968] sm:$0xff]  ;;  %v1221_v35 = vld [vmem:[#allocation5 + $0x958] sm:$0xff] }
 0x14a   : > { %3142 = vmatprep.subr.bf16.mxu0 %v3141_v47  ;;  %3206 = vmatprep.subr.bf16.mxu1 %v3205_v48  ;;  %v3227_v58 = vpack.c.bf16 %v1190_v45, %v1186_v44  ;;  %v3305_v44 = vpack.c.bf16 %v1225_v36, %v1221_v35  ;;  %v1220_v45 = vld [vmem:[#allocation5 + $0x950] sm:$0xff]  ;;  %v1250_v36 = vld [vmem:[#allocation5 + $0xa40] sm:$0xff] }
 0x14d   : > { %3144 = vmatpush1.bf16.msra.mxu0 %v3143_v55  ;;  %3208 = vmatpush1.bf16.msra.mxu1 %v3207_v56  ;;  %v1199_v55 = vld [vmem:[#allocation5 + $0x8a8] sm:$0xff]  ;;  %v1197_v56 = vld [vmem:[#allocation5 + $0x898] sm:$0xff] }
 0x14e   : > { %3146 = vmatprep.subr.bf16.mxu0 %v3145_v59  ;;  %3210 = vmatprep.subr.bf16.mxu1 %v3209_v60  ;;  %v3291_v59 = vpack.c.bf16 %v1192_v52, %v1188_v51  ;;  %v1194_v60 = vld [vmem:[#allocation5 + $0x880] sm:$0xff]  ;;  %v3229_v63 = vpack.c.bf16 %v1199_v55, %v1195_v53  ;;  %v3293_v1 = vpack.c.bf16 %v1201_v57, %v1197_v56  ;;  %v1231_v51 = vld [vmem:[#allocation5 + $0x9a8] sm:$0xff]  ;;  %v1229_v52 = vld [vmem:[#allocation5 + $0x998] sm:$0xff] }
 0x14f   : > { %v3231_v13 = vpack.c.bf16 %v1198_v3, %v1194_v60  ;;  %v1233_v53 = vld [vmem:[#allocation5 + $0x9b8] sm:$0xff]  ;;  %v1226_v57 = vld [vmem:[#allocation5 + $0x980] sm:$0xff]  ;;  %v1228_v3 = vld [vmem:[#allocation5 + $0x990] sm:$0xff] }
 0x150   : > { %v3309_v60 = vpack.c.bf16 %v1233_v53, %v1229_v52  ;;  %v1258_v53 = vld [vmem:[#allocation5 + $0xa80] sm:$0xff] }
 0x151   : > { %3148 = vmatpush1.bf16.msra.mxu0 %v3147_v6  ;;  %3212 = vmatpush1.bf16.msra.mxu1 %v3211_v7  ;;  %v1200_v6 = vld [vmem:[#allocation5 + $0x8b0] sm:$0xff]  ;;  %v1203_v7 = vld [vmem:[#allocation5 + $0x8c8] sm:$0xff] }
 0x152   : > { %3150 = vmatprep.subr.bf16.mxu0 %v3149_v10  ;;  %3214 = vmatprep.subr.bf16.mxu1 %v3213_v2  ;;  %v1207_v2 = vld [vmem:[#allocation5 + $0x8e8] sm:$0xff]  ;;  %v3295_v14 = vpack.c.bf16 %v1200_v6, %v1196_v4  ;;  %v1237_v6 = vld [vmem:[#allocation5 + $0x9d8] sm:$0xff] }
 0x153   : > { %v1239_v4 = vld [vmem:[#allocation5 + $0x9e8] sm:$0xff] }
 0x155   : > { %3152 = vmatpush1.bf16.msra.mxu0 %v3151_v16  ;;  %3216 = vmatpush1.bf16.msra.mxu1 %v3215_v17  ;;  %v1206_v16 = vld [vmem:[#allocation5 + $0x8e0] sm:$0xff]  ;;  %v3233_v17 = vpack.c.bf16 %v1207_v2, %v1203_v7  ;;  %v1241_v7 = vld [vmem:[#allocation5 + $0x9f8] sm:$0xff] }
 0x156   : > { %3154 = vmatprep.subr.bf16.mxu0 %v3153_v20  ;;  %3218 = vmatprep.subr.bf16.mxu1 %v3217_v21  ;;  %v1208_v20 = vld [vmem:[#allocation5 + $0x8f0] sm:$0xff]  ;;  %v1211_v21 = vld [vmem:[#allocation5 + $0x908] sm:$0xff]  ;;  %v3235_v25 = vpack.c.bf16 %v1206_v16, %v1202_v15  ;;  %v3313_v15 = vpack.c.bf16 %v1241_v7, %v1237_v6  ;;  %v1266_v7 = vld [vmem:[#allocation5 + $0xac0] sm:$0xff] }
 0x157   : > { %v3299_v26 = vpack.c.bf16 %v1208_v20, %v1204_v19  ;;  %v1236_v16 = vld [vmem:[#allocation5 + $0x9d0] sm:$0xff]  ;;  %v1247_v19 = vld [vmem:[#allocation5 + $0xa28] sm:$0xff]  ;;  %v1245_v20 = vld [vmem:[#allocation5 + $0xa18] sm:$0xff] }
 0x159   : > { %3156 = vmatpush1.bf16.msra.mxu0 %v3155_v28  ;;  %3220 = vmatpush1.bf16.msra.mxu1 %v3219_v29  ;;  %v1214_v28 = vld [vmem:[#allocation5 + $0x920] sm:$0xff]  ;;  %v3237_v29 = vpack.c.bf16 %v1215_v22, %v1211_v21  ;;  %v1249_v21 = vld [vmem:[#allocation5 + $0xa38] sm:$0xff] }
 0x15a   : > { %3222 = vmatprep.subr.bf16.mxu0 %v3221_v30  ;;  %3286 = vmatprep.subr.bf16.mxu1 %v3285_v31  ;;  %v3301_v30 = vpack.c.bf16 %v1217_v24, %v1213_v23  ;;  %v1212_v31 = vld [vmem:[#allocation5 + $0x910] sm:$0xff]  ;;  %v3239_v37 = vpack.c.bf16 %v1214_v28, %v1210_v27  ;;  %v1242_v24 = vld [vmem:[#allocation5 + $0xa00] sm:$0xff]  ;;  %v3317_v27 = vpack.c.bf16 %v1249_v21, %v1245_v20 }
 0x15b   : > { %v3303_v38 = vpack.c.bf16 %v1216_v32, %v1212_v31  ;;  %v1244_v28 = vld [vmem:[#allocation5 + $0xa10] sm:$0xff]  ;;  %v1255_v31 = vld [vmem:[#allocation5 + $0xa68] sm:$0xff]  ;;  %v1253_v32 = vld [vmem:[#allocation5 + $0xa58] sm:$0xff] }
 0x15c   : > { %v1274_v21 = vld [vmem:[#allocation5 + $0xb00] sm:$0xff] }
 0x1ae   : > { %v4694_v40 = vpop.f32.mrb[0].mxu0  ;;  %v4696_v41 = vpop.f32.mrb[0].mxu1 }
 0x1af   : > { %v2054_v46 = vmax.f32 %v4694_v40, %v4696_v41  ;;  %v4700_v47 = vpop.f32.mrb[1].mxu0  ;;  %v4702_v48 = vpop.f32.mrb[1].mxu1 }
 0x1b0   : > { %v2055_v54 = vmax.f32 %v4700_v47, %v4702_v48  ;;  %1087 = vmatprep.mubr.f32.mxu0 %v4700_v47  ;;  %1164 = vmatprep.mubr.f32.mxu1 %v4700_v47 }
 0x1b1   : > { %1088 = vmatmul.mubr.f32.vlgmr.msra.gmra.mrb[4].mxu0 %v4694_v40  ;;  %1165 = vmatmul.mubr.f32.vlgmr.msra.gmra.mrb[4].mxu1 %v4694_v40 }
 0x1b2   : > { %3224 = vmatpush1.bf16.msra.mxu0 %v3223_v42  ;;  %3288 = vmatpush1.bf16.msra.mxu1 %v3287_v43  ;;  %v4710_v61 = vpop.f32.mrb[2].mxu0  ;;  %v4712_v62 = vpop.f32.mrb[2].mxu1  ;;  %v1222_v42 = vld [vmem:[#allocation5 + $0x960] sm:$0xff]  ;;  %v3241_v43 = vpack.c.bf16 %v1223_v34, %v1219_v33  ;;  %v1257_v33 = vld [vmem:[#allocation5 + $0xa78] sm:$0xff] }
 0x1b3   : > { %3226 = vmatprep.subr.bf16.mxu0 %v3225_v49  ;;  %3290 = vmatprep.subr.bf16.mxu1 %v3289_v50  ;;  %v4714_v8 = vpop.f32.mrb[3].mxu0  ;;  %v2056_v9 = vmax.f32 %v4710_v61, %v4712_v62  ;;  %v4718_v10 = vpop.f32.mrb[3].mxu1  ;;  %v1224_v49 = vld [vmem:[#allocation5 + $0x970] sm:$0xff]  ;;  %v1227_v50 = vld [vmem:[#allocation5 + $0x988] sm:$0xff]  ;;  %v3243_v55 = vpack.c.bf16 %v1222_v42, %v1218_v39  ;;  %v3321_v39 = vpack.c.bf16 %v1257_v33, %v1253_v32  ;;  %v1282_v33 = vld [vmem:[#allocation5 + $0xb40] sm:$0xff] }
 0x1b4   : > { %v2057_v12 = vmax.f32 %v4714_v8, %v4718_v10  ;;  %1093 = vmatprep.mubr.f32.mxu0 %v4714_v8  ;;  %1170 = vmatprep.mubr.f32.mxu1 %v4714_v8  ;;  %v3307_v56 = vpack.c.bf16 %v1224_v49, %v1220_v45  ;;  %v1252_v42 = vld [vmem:[#allocation5 + $0xa50] sm:$0xff]  ;;  %v1263_v45 = vld [vmem:[#allocation5 + $0xaa8] sm:$0xff]  ;;  %v1261_v49 = vld [vmem:[#allocation5 + $0xa98] sm:$0xff] }
 0x1b5   : > { %1094 = vmatmul.mubr.f32.gmra.mrb[6].mxu0 %v4710_v61  ;;  %1171 = vmatmul.mubr.f32.gmra.mrb[6].mxu1 %v4710_v61 }
 0x1b6   : > { %3228 = vmatpush1.bf16.msra.mxu0 %v3227_v58  ;;  %3292 = vmatpush1.bf16.msra.mxu1 %v3291_v59  ;;  %v1230_v58 = vld [vmem:[#allocation5 + $0x9a0] sm:$0xff]  ;;  %v3245_v59 = vpack.c.bf16 %v1231_v51, %v1227_v50  ;;  %v1265_v50 = vld [vmem:[#allocation5 + $0xab8] sm:$0xff] }
 0x1b7   : > { %3230 = vmatprep.subr.bf16.mxu0 %v3229_v63  ;;  %3294 = vmatprep.subr.bf16.mxu1 %v3293_v1  ;;  %v1232_v63 = vld [vmem:[#allocation5 + $0x9b0] sm:$0xff]  ;;  %v1235_v1 = vld [vmem:[#allocation5 + $0x9c8] sm:$0xff]  ;;  %v3247_v2 = vpack.c.bf16 %v1230_v58, %v1226_v57  ;;  %v3325_v57 = vpack.c.bf16 %v1265_v50, %v1261_v49  ;;  %v1290_v50 = vld [vmem:[#allocation5 + $0xb80] sm:$0xff] }
 0x1b8   : > { %1370 = vmatprep.mubr.f32.mxu0 %v4702_v48  ;;  %1447 = vmatprep.mubr.f32.mxu1 %v4702_v48  ;;  %v3311_v11 = vpack.c.bf16 %v1232_v63, %v1228_v3  ;;  %v1260_v58 = vld [vmem:[#allocation5 + $0xa90] sm:$0xff]  ;;  %v1271_v3 = vld [vmem:[#allocation5 + $0xae8] sm:$0xff]  ;;  %v1269_v63 = vld [vmem:[#allocation5 + $0xad8] sm:$0xff] }
 0x1b9   : > { %v1478_v48 = vld [vmem:[#allocation7 + $0x10] sm:$0xff] }
 0x1ba   : > { %3232 = vmatpush1.bf16.msra.mxu0 %v3231_v13  ;;  %3296 = vmatpush1.bf16.msra.mxu1 %v3295_v14  ;;  %v1238_v13 = vld [vmem:[#allocation5 + $0x9e0] sm:$0xff]  ;;  %v3249_v14 = vpack.c.bf16 %v1239_v4, %v1235_v1  ;;  %v1273_v1 = vld [vmem:[#allocation5 + $0xaf8] sm:$0xff] }
 0x1bb   : > { %3234 = vmatprep.subr.bf16.mxu0 %v3233_v17  ;;  %3298 = vmatprep.subr.bf16.mxu1 %v3297_v18  ;;  %v1240_v17 = vld [vmem:[#allocation5 + $0x9f0] sm:$0xff]  ;;  %v1243_v18 = vld [vmem:[#allocation5 + $0xa08] sm:$0xff]  ;;  %v3251_v22 = vpack.c.bf16 %v1238_v13, %v1234_v5  ;;  %v3329_v5 = vpack.c.bf16 %v1273_v1, %v1269_v63  ;;  %v1298_v1 = vld [vmem:[#allocation5 + $0xbc0] sm:$0xff] }
 0x1bc   : > { %v3315_v23 = vpack.c.bf16 %v1240_v17, %v1236_v16  ;;  %v1268_v13 = vld [vmem:[#allocation5 + $0xad0] sm:$0xff]  ;;  %v1279_v16 = vld [vmem:[#allocation5 + $0xb28] sm:$0xff]  ;;  %v1277_v17 = vld [vmem:[#allocation5 + $0xb18] sm:$0xff] }
 0x1be   : > { %3236 = vmatpush1.bf16.msra.mxu0 %v3235_v25  ;;  %3300 = vmatpush1.bf16.msra.mxu1 %v3299_v26  ;;  %v1246_v25 = vld [vmem:[#allocation5 + $0xa20] sm:$0xff]  ;;  %v3253_v26 = vpack.c.bf16 %v1247_v19, %v1243_v18  ;;  %v1281_v18 = vld [vmem:[#allocation5 + $0xb38] sm:$0xff] }
 0x1bf   : > { %3238 = vmatprep.subr.bf16.mxu0 %v3237_v29  ;;  %3302 = vmatprep.subr.bf16.mxu1 %v3301_v30  ;;  %v1248_v29 = vld [vmem:[#allocation5 + $0xa30] sm:$0xff]  ;;  %v1251_v30 = vld [vmem:[#allocation5 + $0xa48] sm:$0xff]  ;;  %v3255_v34 = vpack.c.bf16 %v1246_v25, %v1242_v24  ;;  %v3333_v24 = vpack.c.bf16 %v1281_v18, %v1277_v17  ;;  %v1861_v17 = vld [vmem:[#allocation10] sm:$0xff] }
 0x1c0   : > { %v3319_v35 = vpack.c.bf16 %v1248_v29, %v1244_v28  ;;  %v1276_v25 = vld [vmem:[#allocation5 + $0xb10] sm:$0xff]  ;;  %v1287_v28 = vld [vmem:[#allocation5 + $0xb68] sm:$0xff]  ;;  %v1285_v29 = vld [vmem:[#allocation5 + $0xb58] sm:$0xff] }
 0x1c1   : > { %v1863_v18 = vld [vmem:[#allocation10 + $0x10] sm:$0xff] }
 0x1c2   : > { %3240 = vmatpush1.bf16.msra.mxu0 %v3239_v37  ;;  %3304 = vmatpush1.bf16.msra.mxu1 %v3303_v38  ;;  %v1254_v37 = vld [vmem:[#allocation5 + $0xa60] sm:$0xff]  ;;  %v3257_v38 = vpack.c.bf16 %v1255_v31, %v1251_v30  ;;  %v1289_v30 = vld [vmem:[#allocation5 + $0xb78] sm:$0xff] }
 0x1c3   : > { %3242 = vmatprep.subr.bf16.mxu0 %v3241_v43  ;;  %3306 = vmatprep.subr.bf16.mxu1 %v3305_v44  ;;  %v1256_v43 = vld [vmem:[#allocation5 + $0xa70] sm:$0xff]  ;;  %v1259_v44 = vld [vmem:[#allocation5 + $0xa88] sm:$0xff]  ;;  %v3259_v51 = vpack.c.bf16 %v1254_v37, %v1250_v36  ;;  %v3337_v36 = vpack.c.bf16 %v1289_v30, %v1285_v29  ;;  %v1869_v29 = vld [vmem:[#allocation10 + $0x40] sm:$0xff] }
 0x1c4   : > { %v3323_v52 = vpack.c.bf16 %v1256_v43, %v1252_v42  ;;  %v1284_v37 = vld [vmem:[#allocation5 + $0xb50] sm:$0xff]  ;;  %v1295_v42 = vld [vmem:[#allocation5 + $0xba8] sm:$0xff]  ;;  %v1293_v43 = vld [vmem:[#allocation5 + $0xb98] sm:$0xff] }
 0x1c5   : > { %v1871_v30 = vld [vmem:[#allocation10 + $0x50] sm:$0xff] }
 0x1c6   : > { %3244 = vmatpush1.bf16.msra.mxu0 %v3243_v55  ;;  %3308 = vmatpush1.bf16.msra.mxu1 %v3307_v56  ;;  %v1262_v55 = vld [vmem:[#allocation5 + $0xaa0] sm:$0xff]  ;;  %v3261_v56 = vpack.c.bf16 %v1263_v45, %v1259_v44  ;;  %v1297_v44 = vld [vmem:[#allocation5 + $0xbb8] sm:$0xff] }
 0x1c7   : > { %3246 = vmatprep.subr.bf16.mxu0 %v3245_v59  ;;  %3310 = vmatprep.subr.bf16.mxu1 %v3309_v60  ;;  %v1264_v59 = vld [vmem:[#allocation5 + $0xab0] sm:$0xff]  ;;  %v1267_v60 = vld [vmem:[#allocation5 + $0xac8] sm:$0xff]  ;;  %v3263_v4 = vpack.c.bf16 %v1262_v55, %v1258_v53  ;;  %v3341_v53 = vpack.c.bf16 %v1297_v44, %v1293_v43  ;;  %v1483_v43 = vld [vmem:[#allocation7 + $0x38] sm:$0xff] }
 0x1c8   : > { %v3327_v6 = vpack.c.bf16 %v1264_v59, %v1260_v58  ;;  %v1292_v55 = vld [vmem:[#allocation5 + $0xb90] sm:$0xff]  ;;  %v1303_v58 = vld [vmem:[#allocation5 + $0xbe8] sm:$0xff]  ;;  %v1301_v59 = vld [vmem:[#allocation5 + $0xbd8] sm:$0xff] }
 0x1ca   : > { %3248 = vmatpush1.bf16.msra.mxu0 %v3247_v2  ;;  %3312 = vmatpush1.bf16.msra.mxu1 %v3311_v11  ;;  %v1270_v2 = vld [vmem:[#allocation5 + $0xae0] sm:$0xff]  ;;  %v3265_v11 = vpack.c.bf16 %v1271_v3, %v1267_v60  ;;  %v1305_v60 = vld [vmem:[#allocation5 + $0xbf8] sm:$0xff] }
 0x1cb   : > { %3250 = vmatprep.subr.bf16.mxu0 %v3249_v14  ;;  %3314 = vmatprep.subr.bf16.mxu1 %v3313_v15  ;;  %v1272_v14 = vld [vmem:[#allocation5 + $0xaf0] sm:$0xff]  ;;  %v1275_v15 = vld [vmem:[#allocation5 + $0xb08] sm:$0xff]  ;;  %v3267_v19 = vpack.c.bf16 %v1270_v2, %v1266_v7  ;;  %v1302_v7 = vld [vmem:[#allocation5 + $0xbe0] sm:$0xff] }
 0x1cc   : > { %v3331_v20 = vpack.c.bf16 %v1272_v14, %v1268_v13  ;;  %v1300_v2 = vld [vmem:[#allocation5 + $0xbd0] sm:$0xff]  ;;  %v1864_v13 = vld [vmem:[#allocation10 + $0x18] sm:$0xff]  ;;  %v3283_v14 = vpack.c.bf16 %v1302_v7, %v1298_v1 }
 0x1cd   : > { %v1491_v7 = vld [vmem:[#allocation7 + $0x78] sm:$0xff] }
 0x1ce   : > { %3252 = vmatpush1.bf16.msra.mxu0 %v3251_v22  ;;  %3316 = vmatpush1.bf16.msra.mxu1 %v3315_v23  ;;  %v1278_v22 = vld [vmem:[#allocation5 + $0xb20] sm:$0xff]  ;;  %v3269_v23 = vpack.c.bf16 %v1279_v16, %v1275_v15 }
 0x1cf   : > { %3254 = vmatprep.subr.bf16.mxu0 %v3253_v26  ;;  %3318 = vmatprep.subr.bf16.mxu1 %v3317_v27  ;;  %v1280_v26 = vld [vmem:[#allocation5 + $0xb30] sm:$0xff]  ;;  %v1283_v27 = vld [vmem:[#allocation5 + $0xb48] sm:$0xff]  ;;  %v3271_v31 = vpack.c.bf16 %v1278_v22, %v1274_v21  ;;  %v4730_v21 = vpack.c.bf16 %v1863_v18, %v1861_v17  ;;  %v1488_v17 = vld [vmem:[#allocation7 + $0x60] sm:$0xff] }
 0x1d0   : > { %v3335_v32 = vpack.c.bf16 %v1280_v26, %v1276_v25  ;;  %v1870_v25 = vld [vmem:[#allocation10 + $0x48] sm:$0xff]  ;;  %v1872_v26 = vld [vmem:[#allocation10 + $0x58] sm:$0xff]  ;;  %v1490_v18 = vld [vmem:[#allocation7 + $0x70] sm:$0xff] }
 0x1d1   : > { %5386 = vst [vmem:[#allocation21_spill] sm:$0xff] %v4730_v21 }
 0x1d2   : > { %3256 = vmatpush1.bf16.msra.mxu0 %v3255_v34  ;;  %3320 = vmatpush1.bf16.msra.mxu1 %v3319_v35  ;;  %v1286_v34 = vld [vmem:[#allocation5 + $0xb60] sm:$0xff]  ;;  %v3273_v35 = vpack.c.bf16 %v1287_v28, %v1283_v27  ;;  %v4743_v28 = vpack.c.bf16 %v1872_v26, %v1870_v25  ;;  %v1886_v25 = vld [vmem:[#allocation10 + $0xc8] sm:$0xff]  ;;  %v1888_v26 = vld [vmem:[#allocation10 + $0xd8] sm:$0xff] }
 0x1d3   : > { %3258 = vmatprep.subr.bf16.mxu0 %v3257_v38  ;;  %3322 = vmatprep.subr.bf16.mxu1 %v3321_v39  ;;  %v1288_v38 = vld [vmem:[#allocation5 + $0xb70] sm:$0xff]  ;;  %v1291_v39 = vld [vmem:[#allocation5 + $0xb88] sm:$0xff]  ;;  %v3275_v45 = vpack.c.bf16 %v1286_v34, %v1282_v33  ;;  %v1876_v34 = vld [vmem:[#allocation10 + $0x78] sm:$0xff] }
 0x1d4   : > { %v3339_v49 = vpack.c.bf16 %v1288_v38, %v1284_v37  ;;  %5389 = vst [vmem:[#allocation24_spill] sm:$0xff] %v4743_v28  ;;  %v1874_v33 = vld [vmem:[#allocation10 + $0x68] sm:$0xff]  ;;  %v1479_v38 = vld [vmem:[#allocation7 + $0x18] sm:$0xff] }
 0x1d5   : > { %v1477_v37 = vld [vmem:[#allocation7 + $0x8] sm:$0xff]  ;;  %v4758_v44 = vpack.c.bf16 %v1876_v34, %v1874_v33  ;;  %v1492_v34 = vld [vmem:[#allocation7 + $0x80] sm:$0xff] }
 0x1d6   : > { %3260 = vmatpush1.bf16.msra.mxu0 %v3259_v51  ;;  %3324 = vmatpush1.bf16.msra.mxu1 %v3323_v52  ;;  %v1294_v51 = vld [vmem:[#allocation5 + $0xba0] sm:$0xff]  ;;  %v3277_v52 = vpack.c.bf16 %v1295_v42, %v1291_v39  ;;  %v4755_v42 = vpack.c.bf16 %v1871_v30, %v1869_v29  ;;  %v3349_v47 = vpack.c.bf16 %v1479_v38, %v1477_v37  ;;  %v1887_v37 = vld [vmem:[#allocation10 + $0xd0] sm:$0xff]  ;;  %v1497_v38 = vld [vmem:[#allocation7 + $0xa8] sm:$0xff] }
 0x1d7   : > { %3262 = vmatprep.subr.bf16.mxu0 %v3261_v56  ;;  %3326 = vmatprep.subr.bf16.mxu1 %v3325_v57  ;;  %v1296_v56 = vld [vmem:[#allocation5 + $0xbb0] sm:$0xff]  ;;  %v1299_v57 = vld [vmem:[#allocation5 + $0xbc8] sm:$0xff]  ;;  %v3279_v3 = vpack.c.bf16 %v1294_v51, %v1290_v50  ;;  %v1476_v39 = vld [vmem:[#allocation7] sm:$0xff]  ;;  %5391 = vst [vmem:[#allocation26_spill] sm:$0xff] %v4758_v44  ;;  %v3363_v29 = vpack.c.bf16 %v1490_v18, %v1488_v17 }
 0x1d8   : > { %v3343_v63 = vpack.c.bf16 %v1296_v56, %v1292_v55  ;;  %5390 = vst [vmem:[#allocation25_spill] sm:$0xff] %v4755_v42  ;;  %v1480_v50 = vld [vmem:[#allocation7 + $0x20] sm:$0xff]  ;;  %v1482_v51 = vld [vmem:[#allocation7 + $0x30] sm:$0xff]  ;;  %v1880_v55 = vld [vmem:[#allocation10 + $0x98] sm:$0xff] }
 0x1d9   : > { %v1487_v56 = vld [vmem:[#allocation7 + $0x58] sm:$0xff] }
 0x1da   : > { %3264 = vmatpush1.bf16.msra.mxu0 %v3263_v4  ;;  %3328 = vmatpush1.bf16.msra.mxu1 %v3327_v6  ;;  %v3281_v4 = vpack.c.bf16 %v1303_v58, %v1299_v57  ;;  %v3345_v6 = vpack.c.bf16 %v1305_v60, %v1301_v59  ;;  %v3355_v57 = vpack.c.bf16 %v1482_v51, %v1480_v50  ;;  %v1877_v59 = vld [vmem:[#allocation10 + $0x80] sm:$0xff]  ;;  %v1498_v51 = vld [vmem:[#allocation7 + $0xb0] sm:$0xff]  ;;  %v1900_v17 = vld [vmem:[#allocation10 + $0x138] sm:$0xff] }
 0x1db   : > { %3266 = vmatprep.subr.bf16.mxu0 %v3265_v11  ;;  %3330 = vmatprep.subr.bf16.mxu1 %v3329_v5  ;;  %v1304_v11 = vld [vmem:[#allocation5 + $0xbf0] sm:$0xff]  ;;  %v1862_v5 = vld [vmem:[#allocation10 + $0x8] sm:$0xff]  ;;  %v1496_v50 = vld [vmem:[#allocation7 + $0xa0] sm:$0xff] }
 0x1dc   : > { %v3347_v15 = vpack.c.bf16 %v1304_v11, %v1300_v2  ;;  %v4728_v16 = vpack.c.bf16 %v1864_v13, %v1862_v5  ;;  %v1882_v2 = vld [vmem:[#allocation10 + $0xa8] sm:$0xff]  ;;  %v1884_v11 = vld [vmem:[#allocation10 + $0xb8] sm:$0xff] }
 0x1de   : > { %3268 = vmatpush1.bf16.msra.mxu0 %v3267_v19  ;;  %3332 = vmatpush1.bf16.msra.mxu1 %v3331_v20  ;;  %5385 = vst [vmem:[#allocation20_spill] sm:$0xff] %v4728_v16  ;;  %v1866_v19 = vld [vmem:[#allocation10 + $0x28] sm:$0xff]  ;;  %v1868_v20 = vld [vmem:[#allocation10 + $0x38] sm:$0xff] }
 0x1df   : > { %3270 = vmatprep.subr.bf16.mxu0 %v3269_v23  ;;  %3334 = vmatprep.subr.bf16.mxu1 %v3333_v24  ;;  %v4733_v22 = vpack.c.bf16 %v1868_v20, %v1866_v19  ;;  %v1865_v23 = vld [vmem:[#allocation10 + $0x20] sm:$0xff]  ;;  %v1867_v24 = vld [vmem:[#allocation10 + $0x30] sm:$0xff]  ;;  %v4770_v19 = vpack.c.bf16 %v1884_v11, %v1882_v2 }
 0x1e0   : > { %v4739_v27 = vpack.c.bf16 %v1867_v24, %v1865_v23  ;;  %v1883_v20 = vld [vmem:[#allocation10 + $0xb0] sm:$0xff]  ;;  %v1493_v23 = vld [vmem:[#allocation7 + $0x88] sm:$0xff]  ;;  %v1495_v24 = vld [vmem:[#allocation7 + $0x98] sm:$0xff] }
 0x1e1   : > { %5387 = vst [vmem:[#allocation22_spill] sm:$0xff] %v4733_v22  ;;  %5395 = vst [vmem:[#allocation30_spill] sm:$0xff] %v4770_v19  ;;  %v3365_v33 = vpack.c.bf16 %v1495_v24, %v1493_v23  ;;  %v1895_v11 = vld [vmem:[#allocation10 + $0x110] sm:$0xff]  ;;  %v1897_v23 = vld [vmem:[#allocation10 + $0x120] sm:$0xff] }
 0x1e2   : > { %3272 = vmatpush1.bf16.msra.mxu0 %v3271_v31  ;;  %3336 = vmatpush1.bf16.msra.mxu1 %v3335_v32  ;;  %5388 = vst [vmem:[#allocation23_spill] sm:$0xff] %v4739_v27  ;;  %v4010_v31 = vld [vmem:[%s4644_s25 + $0x8] sm:$0xff] }
 0x1e3   : > { %3274 = vmatprep.subr.bf16.mxu0 %v3273_v35  ;;  %3338 = vmatprep.subr.bf16.mxu1 %v3337_v36  ;;  %v4749_v32 = vmax.f32 %v2055_v54, %v4010_v31  ;;  %v1873_v35 = vld [vmem:[#allocation10 + $0x60] sm:$0xff]  ;;  %v1875_v36 = vld [vmem:[#allocation10 + $0x70] sm:$0xff]  ;;  %v1481_v54 = vld [vmem:[#allocation7 + $0x28] sm:$0xff] }
 0x1e4   : > { %v4761_v58 = vpack.c.bf16 %v1875_v36, %v1873_v35  ;;  %v1885_v31 = vld [vmem:[#allocation10 + $0xc0] sm:$0xff]  ;;  %v1494_v35 = vld [vmem:[#allocation7 + $0x90] sm:$0xff]  ;;  %v4776_v36 = vpack.c.bf16 %v1888_v26, %v1886_v25 }
 0x1e5   : > { %v1504_v25 = vld [vmem:[#allocation7 + $0xe0] sm:$0xff]  ;;  %v1506_v26 = vld [vmem:[#allocation7 + $0xf0] sm:$0xff] }
 0x1e6   : > { %3276 = vmatpush1.bf16.msra.mxu0 %v3275_v45  ;;  %3340 = vmatpush1.bf16.msra.mxu1 %v3339_v49  ;;  %v3351_v45 = vpack.c.bf16 %v1478_v48, %v1476_v39  ;;  %v3353_v49 = vpack.c.bf16 %v1483_v43, %v1481_v54  ;;  %5392 = vst [vmem:[#allocation27_spill] sm:$0xff] %v4761_v58  ;;  %5397 = vst [vmem:[#allocation32_spill] sm:$0xff] %v4776_v36  ;;  %v1499_v39 = vld [vmem:[#allocation7 + $0xb8] sm:$0xff] }
 0x1e7   : > { %3278 = vmatprep.subr.bf16.mxu0 %v3277_v52  ;;  %3342 = vmatprep.subr.bf16.mxu1 %v3341_v53  ;;  %v1485_v52 = vld [vmem:[#allocation7 + $0x48] sm:$0xff]  ;;  %v1892_v48 = vld [vmem:[#allocation10 + $0xf8] sm:$0xff]  ;;  %v3367_v54 = vpack.c.bf16 %v1494_v35, %v1492_v34  ;;  %v4779_v43 = vpack.c.bf16 %v1887_v37, %v1885_v31  ;;  %v1899_v31 = vld [vmem:[#allocation10 + $0x130] sm:$0xff] }
 0x1e8   : > { %v1878_v53 = vld [vmem:[#allocation10 + $0x88] sm:$0xff]  ;;  %v3357_v60 = vpack.c.bf16 %v1487_v56, %v1485_v52  ;;  %v1503_v56 = vld [vmem:[#allocation7 + $0xd8] sm:$0xff] }
 0x1e9   : > { %v4764_v1 = vpack.c.bf16 %v1880_v55, %v1878_v53  ;;  %5398 = vst [vmem:[#allocation33_spill] sm:$0xff] %v4779_v43  ;;  %v1891_v53 = vld [vmem:[#allocation10 + $0xf0] sm:$0xff]  ;;  %v1501_v55 = vld [vmem:[#allocation7 + $0xc8] sm:$0xff]  ;;  %v1511_v34 = vld [vmem:[#allocation7 + $0x118] sm:$0xff] }
 0x1ea   : > { %3280 = vmatpush1.bf16.msra.mxu0 %v3279_v3  ;;  %3344 = vmatpush1.bf16.msra.mxu1 %v3343_v63  ;;  %v1484_v3 = vld [vmem:[#allocation7 + $0x40] sm:$0xff]  ;;  %v1486_v63 = vld [vmem:[#allocation7 + $0x50] sm:$0xff]  ;;  %v1902_v35 = vld [vmem:[#allocation10 + $0x148] sm:$0xff] }
 0x1eb   : > { %3282 = vmatprep.subr.bf16.mxu0 %v3281_v4  ;;  %3346 = vmatprep.subr.bf16.mxu1 %v3345_v6  ;;  %5393 = vst [vmem:[#allocation28_spill] sm:$0xff] %v4764_v1  ;;  %v1879_v4 = vld [vmem:[#allocation10 + $0x90] sm:$0xff]  ;;  %v1489_v6 = vld [vmem:[#allocation7 + $0x68] sm:$0xff]  ;;  %v3359_v5 = vpack.c.bf16 %v1486_v63, %v1484_v3  ;;  %v1893_v63 = vld [vmem:[#allocation10 + $0x100] sm:$0xff] }
 0x1ec   : > { %v4767_v13 = vpack.c.bf16 %v1879_v4, %v1877_v59  ;;  %v1896_v59 = vld [vmem:[#allocation10 + $0x118] sm:$0xff]  ;;  %v3373_v4 = vpack.c.bf16 %v1503_v56, %v1501_v55  ;;  %v1906_v55 = vld [vmem:[#allocation10 + $0x168] sm:$0xff] }
 0x1ed   : > { %v1904_v37 = vld [vmem:[#allocation10 + $0x158] sm:$0xff] }
 0x1ee   : > { %3284 = vmatpush1.bf16.msra.mxu0 %v3283_v14  ;;  %3348 = vmatpush1.bf16.msra.mxu1 %v3347_v15  ;;  %5394 = vst [vmem:[#allocation29_spill] sm:$0xff] %v4767_v13  ;;  %v1881_v14 = vld [vmem:[#allocation10 + $0xa0] sm:$0xff]  ;;  %v3361_v15 = vpack.c.bf16 %v1491_v7, %v1489_v6  ;;  %v1502_v7 = vld [vmem:[#allocation7 + $0xd0] sm:$0xff]  ;;  %v1908_v56 = vld [vmem:[#allocation10 + $0x178] sm:$0xff] }
 0x1ef   : > { %3482 = vmatprep.subr.bf16.mxu1 %v4728_v16  ;;  %3350 = vmatprep.subr.bf16.mxu0 %v3349_v47  ;;  %v4773_v30 = vpack.c.bf16 %v1883_v20, %v1881_v14  ;;  %v1890_v47 = vld [vmem:[#allocation10 + $0xe8] sm:$0xff]  ;;  %v1500_v6 = vld [vmem:[#allocation7 + $0xc0] sm:$0xff]  ;;  %v1507_v14 = vld [vmem:[#allocation7 + $0xf8] sm:$0xff]  ;;  %v4791_v20 = vpack.c.bf16 %v1895_v11, %v1893_v63 }
 0x1f0   : > { %v4782_v52 = vpack.c.bf16 %v1892_v48, %v1890_v47  ;;  %v3375_v18 = vpack.c.bf16 %v1502_v7, %v1500_v6  ;;  %v1901_v47 = vld [vmem:[#allocation10 + $0x140] sm:$0xff]  ;;  %v1514_v6 = vld [vmem:[#allocation7 + $0x130] sm:$0xff]  ;;  %v4806_v7 = vpack.c.bf16 %v1908_v56, %v1906_v55 }
 0x1f1   : > { %1371 = vmatmul.mubr.f32.vlgmr.msra.gmra.mrb[4].mxu0 %v4696_v41  ;;  %1448 = vmatmul.mubr.f32.vlgmr.msra.gmra.mrb[4].mxu1 %v4696_v41  ;;  %5396 = vst [vmem:[#allocation31_spill] sm:$0xff] %v4773_v30  ;;  %5402 = vst [vmem:[#allocation37_spill] sm:$0xff] %v4791_v20  ;;  %v1907_v11 = vld [vmem:[#allocation10 + $0x170] sm:$0xff]  ;;  %v1552_v16 = vld [vmem:[#allocation7 + $0x260] sm:$0xff] }
 0x1f2   : > { %3484 = vmatpush1.bf16.msra.mxu1 %v4730_v21  ;;  %1376 = vmatprep.mubr.f32.mxu0 %v4718_v10  ;;  %5399 = vst [vmem:[#allocation34_spill] sm:$0xff] %v4782_v52  ;;  %5407 = vst [vmem:[#allocation42_spill] sm:$0xff] %v4806_v7  ;;  %v1915_v56 = vld [vmem:[#allocation10 + $0x1b0] sm:$0xff] }
 0x1f3   : > { %1453 = vmatprep.mubr.f32.mxu1 %v4718_v10  ;;  %3486 = vmatprep.subr.bf16.mxu1 %v4733_v22  ;;  %v4865_v41 = vld [vmem:[%s4644_s25 + $0x10] sm:$0xff]  ;;  %v1934_v10 = vld [vmem:[#allocation10 + $0x240] sm:$0xff] }
 0x1f4   : > { %3352 = vmatpush1.bf16.msra.mxu0 %v3351_v45  ;;  %v1889_v45 = vld [vmem:[#allocation10 + $0xe0] sm:$0xff] }
 0x1f5   : > { %1377 = vmatmul.mubr.f32.gmra.mrb[6].mxu0 %v4712_v62  ;;  %1454 = vmatmul.mubr.f32.gmra.mrb[6].mxu1 %v4712_v62  ;;  %v4785_v3 = vpack.c.bf16 %v1891_v53, %v1889_v45  ;;  %v1510_v45 = vld [vmem:[#allocation7 + $0x110] sm:$0xff]  ;;  %v1515_v53 = vld [vmem:[#allocation7 + $0x138] sm:$0xff]  ;;  %v1938_v62 = vld [vmem:[#allocation10 + $0x260] sm:$0xff] }
 0x1f6   : > { %3488 = vmatpush1.bf16.msra.mxu1 %v4739_v27  ;;  %2126 = vmatprep.mubr.f32.mxu1 %v4749_v32 }
 0x1f7   : > { %3490 = vmatprep.subr.bf16.mxu1 %v4743_v28  ;;  %3354 = vmatprep.subr.bf16.mxu0 %v3353_v49  ;;  %v3369_v49 = vpack.c.bf16 %v1499_v39, %v1497_v38  ;;  %5400 = vst [vmem:[#allocation35_spill] sm:$0xff] %v4785_v3  ;;  %v3379_v38 = vpack.c.bf16 %v1506_v26, %v1504_v25  ;;  %v1516_v26 = vld [vmem:[#allocation7 + $0x140] sm:$0xff] }
 0x1f8   : > { %3356 = vmatpush1.bf16.msra.mxu0 %v3355_v57  ;;  %v1894_v57 = vld [vmem:[#allocation10 + $0x108] sm:$0xff]  ;;  %v4797_v39 = vpack.c.bf16 %v1899_v31, %v1897_v23  ;;  %v1518_v31 = vld [vmem:[#allocation7 + $0x150] sm:$0xff] }
 0x1f9   : > { %3358 = vmatprep.subr.bf16.mxu0 %v3357_v60  ;;  %v3371_v60 = vpack.c.bf16 %v1498_v51, %v1496_v50  ;;  %v4788_v2 = vpack.c.bf16 %v1896_v59, %v1894_v57  ;;  %v1903_v50 = vld [vmem:[#allocation10 + $0x150] sm:$0xff]  ;;  %v1513_v51 = vld [vmem:[#allocation7 + $0x128] sm:$0xff] }
 0x1fa   : > { %3492 = vmatpush1.bf16.msra.mxu1 %v4755_v42  ;;  %5404 = vst [vmem:[#allocation39_spill] sm:$0xff] %v4797_v39  ;;  %v4803_v59 = vpack.c.bf16 %v1903_v50, %v1901_v47  ;;  %v3385_v63 = vpack.c.bf16 %v1515_v53, %v1513_v51  ;;  %v1916_v47 = vld [vmem:[#allocation10 + $0x1b8] sm:$0xff]  ;;  %v1520_v51 = vld [vmem:[#allocation7 + $0x160] sm:$0xff]  ;;  %v1522_v53 = vld [vmem:[#allocation7 + $0x170] sm:$0xff] }
 0x1fb   : > { %3494 = vmatprep.subr.bf16.mxu1 %v4758_v44  ;;  %5401 = vst [vmem:[#allocation36_spill] sm:$0xff] %v4788_v2 }
 0x1fc   : > { %3360 = vmatpush1.bf16.msra.mxu0 %v3359_v5  ;;  %v1505_v5 = vld [vmem:[#allocation7 + $0xe8] sm:$0xff]  ;;  %5406 = vst [vmem:[#allocation41_spill] sm:$0xff] %v4803_v59 }
 0x1fd   : > { %3362 = vmatprep.subr.bf16.mxu0 %v3361_v15  ;;  %v1898_v15 = vld [vmem:[#allocation10 + $0x128] sm:$0xff]  ;;  %v3377_v24 = vpack.c.bf16 %v1507_v14, %v1505_v5  ;;  %v1519_v14 = vld [vmem:[#allocation7 + $0x158] sm:$0xff] }
 0x1fe   : > { %3496 = vmatpush1.bf16.msra.mxu1 %v4761_v58  ;;  %v1517_v5 = vld [vmem:[#allocation7 + $0x148] sm:$0xff]  ;;  %v1551_v58 = vld [vmem:[#allocation7 + $0x258] sm:$0xff] }
 0x1ff   : > { %3498 = vmatprep.subr.bf16.mxu1 %v4764_v1  ;;  %v3389_v25 = vpack.c.bf16 %v1519_v14, %v1517_v5  ;;  %v1917_v5 = vld [vmem:[#allocation10 + $0x1c0] sm:$0xff]  ;;  %v1549_v1 = vld [vmem:[#allocation7 + $0x248] sm:$0xff] }
 0x200   : > { %3364 = vmatpush1.bf16.msra.mxu0 %v3363_v29  ;;  %v4794_v29 = vpack.c.bf16 %v1900_v17, %v1898_v15  ;;  %v1910_v15 = vld [vmem:[#allocation10 + $0x188] sm:$0xff]  ;;  %v1912_v17 = vld [vmem:[#allocation10 + $0x198] sm:$0xff] }
 0x201   : > { %3366 = vmatprep.subr.bf16.mxu0 %v3365_v33  ;;  %v1509_v33 = vld [vmem:[#allocation7 + $0x108] sm:$0xff] }
 0x202   : > { %3500 = vmatpush1.bf16.msra.mxu1 %v4767_v13  ;;  %5403 = vst [vmem:[#allocation38_spill] sm:$0xff] %v4794_v29  ;;  %v3381_v48 = vpack.c.bf16 %v1511_v34, %v1509_v33  ;;  %v4812_v33 = vpack.c.bf16 %v1912_v17, %v1910_v15  ;;  %v1911_v34 = vld [vmem:[#allocation10 + $0x190] sm:$0xff]  ;;  %v1524_v15 = vld [vmem:[#allocation7 + $0x180] sm:$0xff] }
 0x203   : > { %3502 = vmatprep.subr.bf16.mxu1 %v4770_v19  ;;  %v1526_v17 = vld [vmem:[#allocation7 + $0x190] sm:$0xff] }
 0x204   : > { %3368 = vmatpush1.bf16.msra.mxu0 %v3367_v54  ;;  %v1508_v54 = vld [vmem:[#allocation7 + $0x100] sm:$0xff]  ;;  %5409 = vst [vmem:[#allocation44_spill] sm:$0xff] %v4812_v33 }
 0x205   : > { %3370 = vmatprep.subr.bf16.mxu0 %v3369_v49  ;;  %v4800_v49 = vpack.c.bf16 %v1904_v37, %v1902_v35  ;;  %v3383_v57 = vpack.c.bf16 %v1510_v45, %v1508_v54  ;;  %v1521_v35 = vld [vmem:[#allocation7 + $0x168] sm:$0xff]  ;;  %v1523_v37 = vld [vmem:[#allocation7 + $0x178] sm:$0xff]  ;;  %v1913_v45 = vld [vmem:[#allocation10 + $0x1a0] sm:$0xff] }
 0x206   : > { %3504 = vmatpush1.bf16.msra.mxu1 %v4773_v30  ;;  %v3393_v50 = vpack.c.bf16 %v1523_v37, %v1521_v35  ;;  %v3399_v35 = vpack.c.bf16 %v1526_v17, %v1524_v15  ;;  %v1926_v17 = vld [vmem:[#allocation10 + $0x200] sm:$0xff]  ;;  %v1546_v30 = vld [vmem:[#allocation7 + $0x230] sm:$0xff] }
 0x207   : > { %3506 = vmatprep.subr.bf16.mxu1 %v4776_v36  ;;  %5405 = vst [vmem:[#allocation40_spill] sm:$0xff] %v4800_v49  ;;  %v1544_v36 = vld [vmem:[#allocation7 + $0x220] sm:$0xff] }
 0x208   : > { %3372 = vmatpush1.bf16.msra.mxu0 %v3371_v60  ;;  %v1905_v60 = vld [vmem:[#allocation10 + $0x160] sm:$0xff]  ;;  %v3419_v27 = vpack.c.bf16 %v1546_v30, %v1544_v36  ;;  %v1558_v30 = vld [vmem:[#allocation7 + $0x290] sm:$0xff]  ;;  %v1561_v36 = vld [vmem:[#allocation7 + $0x2a8] sm:$0xff] }
 0x209   : > { %3374 = vmatprep.subr.bf16.mxu0 %v3373_v4  ;;  %v1512_v4 = vld [vmem:[#allocation7 + $0x120] sm:$0xff]  ;;  %v4809_v23 = vpack.c.bf16 %v1907_v11, %v1905_v60  ;;  %v1527_v60 = vld [vmem:[#allocation7 + $0x198] sm:$0xff]  ;;  %v4821_v11 = vpack.c.bf16 %v1915_v56, %v1913_v45  ;;  %v1530_v45 = vld [vmem:[#allocation7 + $0x1b0] sm:$0xff] }
 0x20a   : > { %3508 = vmatpush1.bf16.msra.mxu1 %v4779_v43  ;;  %v1535_v56 = vld [vmem:[#allocation7 + $0x1d8] sm:$0xff] }
 0x20b   : > { %3510 = vmatprep.subr.bf16.mxu1 %v4782_v52  ;;  %5408 = vst [vmem:[#allocation43_spill] sm:$0xff] %v4809_v23  ;;  %5412 = vst [vmem:[#allocation47_spill] sm:$0xff] %v4821_v11 }
 0x20c   : > { %3376 = vmatpush1.bf16.msra.mxu0 %v3375_v18  ;;  %v3387_v18 = vpack.c.bf16 %v1514_v6, %v1512_v4  ;;  %v1920_v4 = vld [vmem:[#allocation10 + $0x1d8] sm:$0xff]  ;;  %v3395_v6 = vpack.c.bf16 %v1522_v53, %v1520_v51  ;;  %v1923_v51 = vld [vmem:[#allocation10 + $0x1f0] sm:$0xff]  ;;  %v1533_v53 = vld [vmem:[#allocation7 + $0x1c8] sm:$0xff] }
 0x20d   : > { %3378 = vmatprep.subr.bf16.mxu0 %v3377_v24  ;;  %v1909_v24 = vld [vmem:[#allocation10 + $0x180] sm:$0xff] }
 0x20e   : > { %3512 = vmatpush1.bf16.msra.mxu1 %v4785_v3  ;;  %v4815_v54 = vpack.c.bf16 %v1911_v34, %v1909_v24  ;;  %v1919_v24 = vld [vmem:[#allocation10 + $0x1d0] sm:$0xff]  ;;  %v1924_v34 = vld [vmem:[#allocation10 + $0x1f8] sm:$0xff] }
 0x20f   : > { %3514 = vmatprep.subr.bf16.mxu1 %v4788_v2  ;;  %v4827_v37 = vpack.c.bf16 %v1919_v24, %v1917_v5  ;;  %v1532_v5 = vld [vmem:[#allocation7 + $0x1c0] sm:$0xff]  ;;  %v1928_v24 = vld [vmem:[#allocation10 + $0x210] sm:$0xff] }
 0x210   : > { %3380 = vmatpush1.bf16.msra.mxu0 %v3379_v38  ;;  %v1914_v38 = vld [vmem:[#allocation10 + $0x1a8] sm:$0xff]  ;;  %5410 = vst [vmem:[#allocation45_spill] sm:$0xff] %v4815_v54 }
 0x211   : > { %3382 = vmatprep.subr.bf16.mxu0 %v3381_v48  ;;  %v3391_v48 = vpack.c.bf16 %v1518_v31, %v1516_v26  ;;  %v4818_v55 = vpack.c.bf16 %v1916_v47, %v1914_v38  ;;  %v1531_v26 = vld [vmem:[#allocation7 + $0x1b8] sm:$0xff]  ;;  %v1922_v31 = vld [vmem:[#allocation10 + $0x1e8] sm:$0xff]  ;;  %5414 = vst [vmem:[#allocation49_spill] sm:$0xff] %v4827_v37  ;;  %v1921_v38 = vld [vmem:[#allocation10 + $0x1e0] sm:$0xff] }
 0x212   : > { %3516 = vmatpush1.bf16.msra.mxu1 %v4791_v20  ;;  %v1988_v20 = vld [vmem:[#allocation10 + $0x3f0] sm:$0xff] }
 0x213   : > { %3518 = vmatprep.subr.bf16.mxu1 %v4794_v29  ;;  %5411 = vst [vmem:[#allocation46_spill] sm:$0xff] %v4818_v55  ;;  %v1986_v29 = vld [vmem:[#allocation10 + $0x3e0] sm:$0xff] }
 0x214   : > { %3384 = vmatpush1.bf16.msra.mxu0 %v3383_v57  ;;  %v1525_v57 = vld [vmem:[#allocation7 + $0x188] sm:$0xff] }
 0x215   : > { %3386 = vmatprep.subr.bf16.mxu0 %v3385_v63  ;;  %v1918_v63 = vld [vmem:[#allocation10 + $0x1c8] sm:$0xff]  ;;  %v3397_v14 = vpack.c.bf16 %v1527_v60, %v1525_v57  ;;  %v1929_v60 = vld [vmem:[#allocation10 + $0x218] sm:$0xff] }
 0x216   : > { %3520 = vmatpush1.bf16.msra.mxu1 %v4797_v39  ;;  %v1927_v57 = vld [vmem:[#allocation10 + $0x208] sm:$0xff]  ;;  %v1984_v39 = vld [vmem:[#allocation10 + $0x3d0] sm:$0xff] }
 0x217   : > { %3522 = vmatprep.subr.bf16.mxu1 %v4800_v49  ;;  %v4836_v15 = vpack.c.bf16 %v1929_v60, %v1927_v57  ;;  %v1937_v57 = vld [vmem:[#allocation10 + $0x258] sm:$0xff]  ;;  %v1939_v60 = vld [vmem:[#allocation10 + $0x268] sm:$0xff]  ;;  %v1982_v49 = vld [vmem:[#allocation10 + $0x3c0] sm:$0xff] }
 0x218   : > { %3388 = vmatpush1.bf16.msra.mxu0 %v3387_v18  ;;  %v4824_v18 = vpack.c.bf16 %v1920_v4, %v1918_v63  ;;  %v4833_v4 = vpack.c.bf16 %v1923_v51, %v1921_v38  ;;  %v4851_v51 = vld [vmem:[%s4644_s25 + $0x18] sm:$0xff] }
 0x219   : > { %3390 = vmatprep.subr.bf16.mxu0 %v3389_v25  ;;  %v1529_v25 = vld [vmem:[#allocation7 + $0x1a8] sm:$0xff] }
 0x21a   : > { %3524 = vmatpush1.bf16.msra.mxu1 %v4803_v59  ;;  %5413 = vst [vmem:[#allocation48_spill] sm:$0xff] %v4824_v18  ;;  %v3401_v47 = vpack.c.bf16 %v1531_v26, %v1529_v25  ;;  %5416 = vst [vmem:[#allocation51_spill] sm:$0xff] %v4833_v4  ;;  %v1931_v25 = vld [vmem:[#allocation10 + $0x228] sm:$0xff]  ;;  %v1933_v26 = vld [vmem:[#allocation10 + $0x238] sm:$0xff] }
 0x21b   : > { %3526 = vmatprep.subr.bf16.mxu1 %v4806_v7  ;;  %v1978_v7 = vld [vmem:[#allocation10 + $0x3a0] sm:$0xff]  ;;  %v1980_v59 = vld [vmem:[#allocation10 + $0x3b0] sm:$0xff] }
 0x21c   : > { %3392 = vmatpush1.bf16.msra.mxu0 %v3391_v48  ;;  %v1528_v48 = vld [vmem:[#allocation7 + $0x1a0] sm:$0xff] }
 0x21d   : > { %3394 = vmatprep.subr.bf16.mxu0 %v3393_v50  ;;  %v4830_v50 = vpack.c.bf16 %v1924_v34, %v1922_v31  ;;  %v3403_v63 = vpack.c.bf16 %v1530_v45, %v1528_v48  ;;  %v4839_v34 = vpack.c.bf16 %v1928_v24, %v1926_v17  ;;  %v1930_v48 = vld [vmem:[#allocation10 + $0x220] sm:$0xff]  ;;  %v1932_v45 = vld [vmem:[#allocation10 + $0x230] sm:$0xff] }
 0x21e   : > { %3528 = vmatpush1.bf16.msra.mxu1 %v4809_v23  ;;  %v4862_v40 = vpack.c.bf16 %v1932_v45, %v1930_v48  ;;  %v1976_v23 = vld [vmem:[#allocation10 + $0x390] sm:$0xff] }
 0x21f   : > { %3530 = vmatprep.subr.bf16.mxu1 %v4812_v33  ;;  %5415 = vst [vmem:[#allocation50_spill] sm:$0xff] %v4830_v50  ;;  %v1974_v33 = vld [vmem:[#allocation10 + $0x380] sm:$0xff] }
 0x220   : > { %3396 = vmatpush1.bf16.msra.mxu0 %v3395_v6  ;;  %v3405_v6 = vpack.c.bf16 %v1535_v56, %v1533_v53  ;;  %v4857_v53 = vmax.f32 %v2057_v12, %v4851_v51  ;;  %v1935_v56 = vld [vmem:[#allocation10 + $0x248] sm:$0xff]  ;;  %v1936_v12 = vld [vmem:[#allocation10 + $0x250] sm:$0xff] }
 0x221   : > { %3398 = vmatprep.subr.bf16.mxu0 %v3397_v14  ;;  %v1534_v14 = vld [vmem:[#allocation7 + $0x1d0] sm:$0xff]  ;;  %v4874_v8 = vpack.c.bf16 %v1937_v57, %v1935_v56  ;;  %v1946_v56 = vld [vmem:[#allocation10 + $0x2a0] sm:$0xff] }
 0x222   : > { %3532 = vmatpush1.bf16.msra.mxu1 %v4815_v54  ;;  %v3407_v31 = vpack.c.bf16 %v1534_v14, %v1532_v5  ;;  %v1943_v5 = vld [vmem:[#allocation10 + $0x288] sm:$0xff]  ;;  %v1945_v14 = vld [vmem:[#allocation10 + $0x298] sm:$0xff]  ;;  %v1948_v57 = vld [vmem:[#allocation10 + $0x2b0] sm:$0xff] }
 0x223   : > { %3534 = vmatprep.subr.bf16.mxu1 %v4818_v55  ;;  %v4888_v24 = vpack.c.bf16 %v1945_v14, %v1943_v5  ;;  %v1536_v5 = vld [vmem:[#allocation7 + $0x1e0] sm:$0xff]  ;;  %v1538_v14 = vld [vmem:[#allocation7 + $0x1f0] sm:$0xff] }
 0x224   : > { %3400 = vmatpush1.bf16.msra.mxu0 %v3399_v35  ;;  %v4011_v35 = vld [vmem:[%s4644_s25] sm:$0xff]  ;;  %v1972_v54 = vld [vmem:[#allocation10 + $0x370] sm:$0xff] }
 0x225   : > { %3402 = vmatprep.subr.bf16.mxu0 %v3401_v47  ;;  %v4845_v38 = vmax.f32 %v2054_v46, %v4011_v35  ;;  %v4848_v47 = vpack.c.bf16 %v1933_v26, %v1931_v25  ;;  %v4871_v46 = vmax.f32 %v2056_v9, %v4865_v41  ;;  %v1940_v9 = vld [vmem:[#allocation10 + $0x270] sm:$0xff]  ;;  %v1942_v25 = vld [vmem:[#allocation10 + $0x280] sm:$0xff]  ;;  %v1949_v35 = vld [vmem:[#allocation10 + $0x2b8] sm:$0xff] }
 0x226   : > { %3536 = vmatpush1.bf16.msra.mxu1 %v4821_v11  ;;  %v4885_v17 = vpack.c.bf16 %v1940_v9, %v1938_v62  ;;  %v1944_v26 = vld [vmem:[#allocation10 + $0x290] sm:$0xff]  ;;  %v4897_v62 = vpack.c.bf16 %v1948_v57, %v1946_v56  ;;  %v1970_v55 = vld [vmem:[#allocation10 + $0x360] sm:$0xff] }
 0x227   : > { %3538 = vmatprep.subr.bf16.mxu1 %v4824_v18  ;;  %v4891_v48 = vpack.c.bf16 %v1944_v26, %v1942_v25  ;;  %v1950_v26 = vld [vmem:[#allocation10 + $0x2c0] sm:$0xff]  ;;  %v1961_v18 = vld [vmem:[#allocation10 + $0x318] sm:$0xff]  ;;  %v1968_v11 = vld [vmem:[#allocation10 + $0x350] sm:$0xff] }
 0x228   : > { %3404 = vmatpush1.bf16.msra.mxu0 %v3403_v63  ;;  %v1941_v63 = vld [vmem:[#allocation10 + $0x278] sm:$0xff] }
 0x229   : > { %3406 = vmatprep.subr.bf16.mxu0 %v3405_v6  ;;  %v4879_v6 = vpack.c.bf16 %v1936_v12, %v1934_v10  ;;  %v4882_v61 = vpack.c.bf16 %v1941_v63, %v1939_v60  ;;  %v1951_v10 = vld [vmem:[#allocation10 + $0x2c8] sm:$0xff]  ;;  %v1953_v12 = vld [vmem:[#allocation10 + $0x2d8] sm:$0xff] }
 0x22a   : > { %3540 = vmatpush1.bf16.msra.mxu1 %v4827_v37  ;;  %v1537_v60 = vld [vmem:[#allocation7 + $0x1e8] sm:$0xff]  ;;  %v1539_v63 = vld [vmem:[#allocation7 + $0x1f8] sm:$0xff]  ;;  %v4900_v25 = vpack.c.bf16 %v1953_v12, %v1951_v10  ;;  %v1954_v10 = vld [vmem:[#allocation10 + $0x2e0] sm:$0xff] }
 0x22b   : > { %3542 = vmatprep.subr.bf16.mxu1 %v4830_v50  ;;  %v3409_v9 = vpack.c.bf16 %v1539_v63, %v1537_v60  ;;  %v1541_v50 = vld [vmem:[#allocation7 + $0x208] sm:$0xff]  ;;  %v1543_v37 = vld [vmem:[#allocation7 + $0x218] sm:$0xff]  ;;  %v1956_v12 = vld [vmem:[#allocation10 + $0x2f0] sm:$0xff] }
 0x22c   : > { %3408 = vmatpush1.bf16.msra.mxu0 %v3407_v31  ;;  %v1947_v31 = vld [vmem:[#allocation10 + $0x2a8] sm:$0xff]  ;;  %v3413_v57 = vpack.c.bf16 %v1543_v37, %v1541_v50  ;;  %v1965_v50 = vld [vmem:[#allocation10 + $0x338] sm:$0xff] }
 0x22d   : > { %v4894_v45 = vpack.c.bf16 %v1949_v35, %v1947_v31  ;;  %v1952_v31 = vld [vmem:[#allocation10 + $0x2d0] sm:$0xff]  ;;  %v3411_v35 = vpack.c.bf16 %v1538_v14, %v1536_v5  ;;  %3410 = vmatprep.subr.bf16.mxu0 %v3409_v9  ;;  %v1959_v63 = vld [vmem:[#allocation10 + $0x308] sm:$0xff]  ;;  %v4909_v9 = vpack.c.bf16 %v1956_v12, %v1954_v10  ;;  %v1958_v14 = vld [vmem:[#allocation10 + $0x300] sm:$0xff] }
 0x22e   : > { %3544 = vmatpush1.bf16.msra.mxu1 %v4833_v4  ;;  %v1957_v4 = vld [vmem:[#allocation10 + $0x2f8] sm:$0xff]  ;;  %v4903_v56 = vpack.c.bf16 %v1952_v31, %v1950_v26  ;;  %v4912_v5 = vpack.c.bf16 %v1961_v18, %v1959_v63  ;;  %v1960_v26 = vld [vmem:[#allocation10 + $0x310] sm:$0xff]  ;;  %v1963_v37 = vld [vmem:[#allocation10 + $0x328] sm:$0xff] }
 0x22f   : > { %3546 = vmatprep.subr.bf16.mxu1 %v4836_v15  ;;  %v4906_v60 = vpack.c.bf16 %v1957_v4, %v1955_v0  ;;  %v4915_v0 = vpack.c.bf16 %v1960_v26, %v1958_v14  ;;  %v4918_v4 = vpack.c.bf16 %v1965_v50, %v1963_v37  ;;  %v1962_v31 = vld [vmem:[#allocation10 + $0x320] sm:$0xff]  ;;  %v1969_v10 = vld [vmem:[#allocation10 + $0x358] sm:$0xff]  ;;  %v1971_v14 = vld [vmem:[#allocation10 + $0x368] sm:$0xff] }
 0x230   : > { %3412 = vmatpush1.bf16.msra.mxu0 %v3411_v35  ;;  %v1964_v35 = vld [vmem:[#allocation10 + $0x330] sm:$0xff]  ;;  %v1966_v63 = vld [vmem:[#allocation10 + $0x340] sm:$0xff]  ;;  %v1973_v26 = vld [vmem:[#allocation10 + $0x378] sm:$0xff] }
 0x231   : > { %2127 = vmatmul.mubr.f32.vlgmr.msra.gmra.mrb[8].mxu1 %v4845_v38  ;;  %3414 = vmatprep.subr.bf16.mxu0 %v3413_v57  ;;  %v1967_v57 = vld [vmem:[#allocation10 + $0x348] sm:$0xff]  ;;  %v4921_v18 = vpack.c.bf16 %v1964_v35, %v1962_v31  ;;  %v4927_v37 = vpack.c.bf16 %v1968_v11, %v1966_v63  ;;  %v4930_v50 = vpack.c.bf16 %v1973_v26, %v1971_v14  ;;  %v1977_v35 = vld [vmem:[#allocation10 + $0x398] sm:$0xff] }
 0x232   : > { %2132 = vmatprep.mubr.f32.mxu1 %v4857_v53  ;;  %3548 = vmatpush1.bf16.msra.mxu1 %v4839_v34  ;;  %v4924_v12 = vpack.c.bf16 %v1969_v10, %v1967_v57  ;;  %v1975_v31 = vld [vmem:[#allocation10 + $0x388] sm:$0xff]  ;;  %v4933_v57 = vpack.c.bf16 %v1972_v54, %v1970_v55  ;;  %v1981_v63 = vld [vmem:[#allocation10 + $0x3b8] sm:$0xff]  ;;  %v4939_v14 = vpack.c.bf16 %v1976_v23, %v1974_v33 }
 0x233   : > { %3550 = vmatprep.subr.bf16.mxu1 %v4848_v47  ;;  %v4936_v10 = vpack.c.bf16 %v1977_v35, %v1975_v31  ;;  %v1979_v11 = vld [vmem:[#allocation10 + $0x3a8] sm:$0xff]  ;;  %v1985_v55 = vld [vmem:[#allocation10 + $0x3d8] sm:$0xff]  ;;  %v4945_v31 = vpack.c.bf16 %v1980_v59, %v1978_v7  ;;  %v4957_v59 = vpack.c.bf16 %v1988_v20, %v1986_v29  ;;  %v1542_v7 = vld [vmem:[#allocation7 + $0x210] sm:$0xff] }
 0x234   : > { %v4942_v26 = vpack.c.bf16 %v1981_v63, %v1979_v11  ;;  %v1983_v54 = vld [vmem:[#allocation10 + $0x3c8] sm:$0xff]  ;;  %v1989_v33 = vld [vmem:[#allocation10 + $0x3f8] sm:$0xff]  ;;  %v4951_v11 = vpack.c.bf16 %v1984_v39, %v1982_v49  ;;  %v5417_v39 = vmov 0.0   ;;  %v1540_v49 = vld [vmem:[#allocation7 + $0x200] sm:$0xff] }
 0x235   : > { %2133 = vmatmul.mubr.f32.gmra.mrb[10].mxu1 %v4871_v46  ;;  %v4948_v35 = vpack.c.bf16 %v1985_v55, %v1983_v54  ;;  %v1987_v23 = vld [vmem:[#allocation10 + $0x3e8] sm:$0xff]  ;;  %v1547_v20 = vld [vmem:[#allocation7 + $0x238] sm:$0xff]  ;;  %v3415_v3 = vpack.c.bf16 %v1542_v7, %v1540_v49  ;;  %v3421_v49 = vpack.c.bf16 %v1551_v58, %v1549_v1  ;;  %v1548_v7 = vld [vmem:[#allocation7 + $0x240] sm:$0xff] }
 0x236   : > { %3552 = vmatpush1.bf16.msra.mxu1 %v4862_v40  ;;  %2203 = vmatprep.mubr.f32.mxu1 %v4749_v32  ;;  %v4954_v63 = vpack.c.bf16 %v1989_v33, %v1987_v23  ;;  %v1545_v23 = vld [vmem:[#allocation7 + $0x228] sm:$0xff]  ;;  %v1556_v1 = vld [vmem:[#allocation7 + $0x280] sm:$0xff] }
 0x237   : > { %3554 = vmatprep.subr.bf16.mxu1 %v4874_v8  ;;  %v3417_v43 = vpack.c.bf16 %v1547_v20, %v1545_v23  ;;  %v1553_v20 = vld [vmem:[#allocation7 + $0x268] sm:$0xff] }
 0x23a   : > { %3556 = vmatpush1.bf16.msra.mxu1 %v4879_v6 }
 0x23b   : > { %3558 = vmatprep.subr.bf16.mxu1 %v4882_v61 }
 0x23e   : > { %3560 = vmatpush1.bf16.msra.mxu1 %v4885_v17 }
 0x23f   : > { %3562 = vmatprep.subr.bf16.mxu1 %v4888_v24 }
 0x242   : > { %3564 = vmatpush1.bf16.msra.mxu1 %v4891_v48 }
 0x243   : > { %3566 = vmatprep.subr.bf16.mxu1 %v4894_v45 }
 0x246   : > { %3568 = vmatpush1.bf16.msra.mxu1 %v4897_v62 }
 0x247   : > { %3570 = vmatprep.subr.bf16.mxu1 %v4900_v25 }
 0x24a   : > { %3572 = vmatpush1.bf16.msra.mxu1 %v4903_v56 }
 0x24b   : > { %3574 = vmatprep.subr.bf16.mxu1 %v4906_v60 }
 0x24e   : > { %3576 = vmatpush1.bf16.msra.mxu1 %v4909_v9 }
 0x24f   : > { %3578 = vmatprep.subr.bf16.mxu1 %v4912_v5 }
 0x252   : > { %3580 = vmatpush1.bf16.msra.mxu1 %v4915_v0 }
 0x253   : > { %3582 = vmatprep.subr.bf16.mxu1 %v4918_v4 }
 0x256   : > { %3584 = vmatpush1.bf16.msra.mxu1 %v4921_v18 }
 0x257   : > { %3586 = vmatprep.subr.bf16.mxu1 %v4924_v12 }
 0x25a   : > { %3588 = vmatpush1.bf16.msra.mxu1 %v4927_v37 }
 0x25b   : > { %3590 = vmatprep.subr.bf16.mxu1 %v4930_v50 }
 0x25e   : > { %3592 = vmatpush1.bf16.msra.mxu1 %v4933_v57 }
 0x25f   : > { %3594 = vmatprep.subr.bf16.mxu1 %v4936_v10 }
 0x262   : > { %3596 = vmatpush1.bf16.msra.mxu1 %v4939_v14 }
 0x263   : > { %3598 = vmatprep.subr.bf16.mxu1 %v4942_v26 }
 0x266   : > { %3600 = vmatpush1.bf16.msra.mxu1 %v4945_v31 }
 0x267   : > { %3602 = vmatprep.subr.bf16.mxu1 %v4948_v35 }
 0x26a   : > { %3604 = vmatpush1.bf16.msra.mxu1 %v4951_v11 }
 0x26b   : > { %3606 = vmatprep.subr.bf16.mxu1 %v4954_v63 }
 0x26e   : > { %3608 = vmatpush1.bf16.msra.mxu1 %v4957_v59 }
 0x271   : > { %2204 = vmatmul.mubr.f32.vlgmr.msra.gmra.mrb[12].mxu1 %v4845_v38 }
 0x272   : > { %2209 = vmatprep.mubr.f32.mxu1 %v4857_v53 }
 0x275   : > { %2210 = vmatmul.mubr.f32.gmra.mrb[14].mxu1 %v4871_v46 }
 0x276   : > { %2377 = vmatprep.mubr.f32.mxu1 %v5417_v39 }
 0x2c4   : > { %v1372_v54 = vpop.f32.mrb[4].mxu0  ;;  %v4965_v55 = vpop.f32.mrb[4].mxu1 }
 0x2c5   : > { %v1374_v29 = vpop.f32.mrb[5].mxu0  ;;  %v1451_v33 = vpop.f32.mrb[5].mxu1  ;;  %v1468_v52 = vmax.f32 %v1372_v54, 0.0  ;;  %v1550_v54 = vld [vmem:[#allocation7 + $0x250] sm:$0xff] }
 0x2c6   : > { %v1469_v2 = vmax.f32 %v1374_v29, 0.0  ;;  %v1471_v23 = vmax.f32 %v1451_v33, 0.0  ;;  %v1555_v29 = vld [vmem:[#allocation7 + $0x278] sm:$0xff]  ;;  %v1562_v33 = vld [vmem:[#allocation7 + $0x2b0] sm:$0xff] }
 0x2c7   : > { %v3425_v21 = vpack.c.bf16 %v1555_v29, %v1553_v20  ;;  %v1564_v20 = vld [vmem:[#allocation7 + $0x2c0] sm:$0xff]  ;;  %v1571_v29 = vld [vmem:[#allocation7 + $0x2f8] sm:$0xff] }
 0x2c8   : > { %v1378_v19 = vpop.f32.mrb[6].mxu0  ;;  %v4967_v13 = vpop.f32.mrb[6].mxu1  ;;  %1668 = vmatprep.mubr.f32.mxu0 %v1469_v2  ;;  %v3423_v2 = vpack.c.bf16 %v1550_v54, %v1548_v7  ;;  %v1567_v7 = vld [vmem:[#allocation7 + $0x2d8] sm:$0xff] }
 0x2c9   : > { %v1380_v44 = vpop.f32.mrb[7].mxu0  ;;  %v4969_v42 = vpop.f32.mrb[7].mxu1  ;;  %1669 = vmatmul.mubr.f32.vlgmr.msra.gmra.mrb[8].mxu0 %v1468_v52  ;;  %v1472_v22 = vmax.f32 %v1378_v19, 0.0  ;;  %v1554_v52 = vld [vmem:[#allocation7 + $0x270] sm:$0xff] }
 0x2ca   : > { %v1473_v28 = vmax.f32 %v1380_v44, 0.0  ;;  %3416 = vmatpush1.bf16.msra.mxu0 %v3415_v3  ;;  %v1557_v44 = vld [vmem:[#allocation7 + $0x288] sm:$0xff]  ;;  %v1559_v3 = vld [vmem:[#allocation7 + $0x298] sm:$0xff]  ;;  %v3427_v19 = vpack.c.bf16 %v1554_v52, %v1552_v16  ;;  %v1566_v16 = vld [vmem:[#allocation7 + $0x2d0] sm:$0xff] }
 0x2cb   : > { %3418 = vmatprep.subr.bf16.mxu0 %v3417_v43  ;;  %v3429_v58 = vpack.c.bf16 %v1559_v3, %v1557_v44  ;;  %v3431_v43 = vpack.c.bf16 %v1558_v30, %v1556_v1  ;;  %v1568_v44 = vld [vmem:[#allocation7 + $0x2e0] sm:$0xff]  ;;  %v1570_v3 = vld [vmem:[#allocation7 + $0x2f0] sm:$0xff] }
 0x2cc   : > { %1674 = vmatprep.mubr.f32.mxu0 %v1473_v28  ;;  %v1563_v28 = vld [vmem:[#allocation7 + $0x2b8] sm:$0xff]  ;;  %v3443_v1 = vpack.c.bf16 %v1570_v3, %v1568_v44 }
 0x2cd   : > { %1675 = vmatmul.mubr.f32.gmra.mrb[10].mxu0 %v1472_v22  ;;  %v3433_v22 = vpack.c.bf16 %v1563_v28, %v1561_v36  ;;  %v1572_v36 = vld [vmem:[#allocation7 + $0x300] sm:$0xff]  ;;  %v1574_v28 = vld [vmem:[#allocation7 + $0x310] sm:$0xff] }
 0x2ce   : > { %3420 = vmatpush1.bf16.msra.mxu0 %v3419_v27  ;;  %1745 = vmatprep.mubr.f32.mxu0 %v1471_v23  ;;  %v1560_v27 = vld [vmem:[#allocation7 + $0x2a0] sm:$0xff] }
 0x2cf   : > { %3422 = vmatprep.subr.bf16.mxu0 %v3421_v49  ;;  %v1565_v49 = vld [vmem:[#allocation7 + $0x2c8] sm:$0xff]  ;;  %v3435_v54 = vpack.c.bf16 %v1562_v33, %v1560_v27  ;;  %v3447_v27 = vpack.c.bf16 %v1574_v28, %v1572_v36 }
 0x2d0   : > { %v3437_v23 = vpack.c.bf16 %v1567_v7, %v1565_v49  ;;  %v1576_v49 = vld [vmem:[#allocation7 + $0x320] sm:$0xff]  ;;  %v1578_v7 = vld [vmem:[#allocation7 + $0x330] sm:$0xff] }
 0x2d2   : > { %3424 = vmatpush1.bf16.msra.mxu0 %v3423_v2  ;;  %v3439_v2 = vpack.c.bf16 %v1566_v16, %v1564_v20  ;;  %v3451_v20 = vpack.c.bf16 %v1578_v7, %v1576_v49 }
 0x2d3   : > { %3426 = vmatprep.subr.bf16.mxu0 %v3425_v21  ;;  %v1569_v21 = vld [vmem:[#allocation7 + $0x2e8] sm:$0xff] }
 0x2d4   : > { %v3441_v52 = vpack.c.bf16 %v1571_v29, %v1569_v21  ;;  %v1580_v21 = vld [vmem:[#allocation7 + $0x340] sm:$0xff]  ;;  %v1582_v29 = vld [vmem:[#allocation7 + $0x350] sm:$0xff] }
 0x2d5   : > { %v3455_v44 = vpack.c.bf16 %v1582_v29, %v1580_v21 }
 0x2d6   : > { %3428 = vmatpush1.bf16.msra.mxu0 %v3427_v19  ;;  %v1573_v19 = vld [vmem:[#allocation7 + $0x308] sm:$0xff] }
 0x2d7   : > { %3430 = vmatprep.subr.bf16.mxu0 %v3429_v58  ;;  %v1575_v58 = vld [vmem:[#allocation7 + $0x318] sm:$0xff] }
 0x2d8   : > { %v3445_v30 = vpack.c.bf16 %v1575_v58, %v1573_v19  ;;  %v1584_v19 = vld [vmem:[#allocation7 + $0x360] sm:$0xff]  ;;  %v1586_v58 = vld [vmem:[#allocation7 + $0x370] sm:$0xff] }
 0x2d9   : > { %v3459_v36 = vpack.c.bf16 %v1586_v58, %v1584_v19 }
 0x2da   : > { %3432 = vmatpush1.bf16.msra.mxu0 %v3431_v43  ;;  %v1577_v43 = vld [vmem:[#allocation7 + $0x328] sm:$0xff] }
 0x2db   : > { %3434 = vmatprep.subr.bf16.mxu0 %v3433_v22  ;;  %v1579_v22 = vld [vmem:[#allocation7 + $0x338] sm:$0xff] }
 0x2dc   : > { %v3449_v33 = vpack.c.bf16 %v1579_v22, %v1577_v43  ;;  %v1588_v43 = vld [vmem:[#allocation7 + $0x380] sm:$0xff]  ;;  %v1590_v22 = vld [vmem:[#allocation7 + $0x390] sm:$0xff] }
 0x2dd   : > { %v3463_v49 = vpack.c.bf16 %v1590_v22, %v1588_v43 }
 0x2de   : > { %3436 = vmatpush1.bf16.msra.mxu0 %v3435_v54  ;;  %v1581_v54 = vld [vmem:[#allocation7 + $0x348] sm:$0xff] }
 0x2df   : > { %3438 = vmatprep.subr.bf16.mxu0 %v3437_v23  ;;  %v1583_v23 = vld [vmem:[#allocation7 + $0x358] sm:$0xff] }
 0x2e0   : > { %v3453_v16 = vpack.c.bf16 %v1583_v23, %v1581_v54  ;;  %v1592_v54 = vld [vmem:[#allocation7 + $0x3a0] sm:$0xff]  ;;  %v1594_v23 = vld [vmem:[#allocation7 + $0x3b0] sm:$0xff] }
 0x2e1   : > { %v3467_v21 = vpack.c.bf16 %v1594_v23, %v1592_v54  ;;  %v1993_v54 = vld [vmem:[#allocation11 + $0x18] sm:$0xff] }
 0x2e2   : > { %3440 = vmatpush1.bf16.msra.mxu0 %v3439_v2  ;;  %v1585_v2 = vld [vmem:[#allocation7 + $0x368] sm:$0xff] }
 0x2e3   : > { %3442 = vmatprep.subr.bf16.mxu0 %v3441_v52  ;;  %v1587_v52 = vld [vmem:[#allocation7 + $0x378] sm:$0xff] }
 0x2e4   : > { %v3457_v3 = vpack.c.bf16 %v1587_v52, %v1585_v2  ;;  %v1596_v2 = vld [vmem:[#allocation7 + $0x3c0] sm:$0xff]  ;;  %v1598_v52 = vld [vmem:[#allocation7 + $0x3d0] sm:$0xff] }
 0x2e5   : > { %v3471_v19 = vpack.c.bf16 %v1598_v52, %v1596_v2  ;;  %v1758_v52 = vld [vmem:[%s433_s23] sm:$0xff] }
 0x2e6   : > { %3444 = vmatpush1.bf16.msra.mxu0 %v3443_v1  ;;  %v1589_v1 = vld [vmem:[#allocation7 + $0x388] sm:$0xff]  ;;  %vm1760_vm1 = vcmp.le.f32.partialorder %v1758_v52, 0.5  ;;  %v2005_v52 = vld [vmem:[#allocation11 + $0x78] sm:$0xff] }
 0x2e7   : > { %3446 = vmatprep.subr.bf16.mxu0 %v3445_v30  ;;  %v1591_v30 = vld [vmem:[#allocation7 + $0x398] sm:$0xff] }
 0x2e8   : > { %v3461_v28 = vpack.c.bf16 %v1591_v30, %v1589_v1  ;;  %v1600_v1 = vld [vmem:[#allocation7 + $0x3e0] sm:$0xff]  ;;  %v1602_v30 = vld [vmem:[#allocation7 + $0x3f0] sm:$0xff] }
 0x2e9   : > { %v3475_v43 = vpack.c.bf16 %v1602_v30, %v1600_v1  ;;  %v1997_v1 = vld [vmem:[#allocation11 + $0x38] sm:$0xff]  ;;  %v1759_v30 = vld [vmem:[%s433_s23 + $0x8] sm:$0xff] }
 0x2ea   : > { %3448 = vmatpush1.bf16.msra.mxu0 %v3447_v27  ;;  %v1593_v27 = vld [vmem:[#allocation7 + $0x3a8] sm:$0xff]  ;;  %vm1761_vm2 = vcmp.le.f32.partialorder %v1759_v30, 0.5  ;;  %v2009_v30 = vld [vmem:[#allocation11 + $0x98] sm:$0xff] }
 0x2eb   : > { %3450 = vmatprep.subr.bf16.mxu0 %v3449_v33  ;;  %v1595_v33 = vld [vmem:[#allocation7 + $0x3b8] sm:$0xff] }
 0x2ec   : > { %v3465_v7 = vpack.c.bf16 %v1595_v33, %v1593_v27  ;;  %v1766_v27 = vld [vmem:[#allocation13] sm:$0xff]  ;;  %v1768_v33 = vld [vmem:[#allocation13 + $0x10] sm:$0xff] }
 0x2ee   : > { %3452 = vmatpush1.bf16.msra.mxu0 %v3451_v20  ;;  %v1597_v20 = vld [vmem:[#allocation7 + $0x3c8] sm:$0xff] }
 0x2ef   : > { %3454 = vmatprep.subr.bf16.mxu0 %v3453_v16  ;;  %v1599_v16 = vld [vmem:[#allocation7 + $0x3d8] sm:$0xff] }
 0x2f0   : > { %v3469_v29 = vpack.c.bf16 %v1599_v16, %v1597_v20  ;;  %v3479_v20 = vpack.c.bf16 %v1768_v33, %v1766_v27  ;;  %v1470_v16 = vmax.f32 %v4965_v55, 0.0  ;;  %v1992_v55 = vld [vmem:[#allocation11 + $0x10] sm:$0xff]  ;;  %v2001_v27 = vld [vmem:[#allocation11 + $0x58] sm:$0xff]  ;;  %v2924_v33 = vsel %vm1761_vm2, 1.0, %v5417_v39 }
 0x2f2   : > { %3456 = vmatpush1.bf16.msra.mxu0 %v3455_v44  ;;  %v1601_v44 = vld [vmem:[#allocation7 + $0x3e8] sm:$0xff] }
 0x2f3   : > { %3458 = vmatprep.subr.bf16.mxu0 %v3457_v3  ;;  %v1603_v3 = vld [vmem:[#allocation7 + $0x3f8] sm:$0xff] }
 0x2f4   : > { %v3473_v58 = vpack.c.bf16 %v1603_v3, %v1601_v44  ;;  %v1474_v3 = vmax.f32 %v4967_v13, 0.0  ;;  %v1996_v13 = vld [vmem:[#allocation11 + $0x30] sm:$0xff] }
 0x2f6   : > { %3460 = vmatpush1.bf16.msra.mxu0 %v3459_v36  ;;  %v1767_v36 = vld [vmem:[#allocation13 + $0x8] sm:$0xff] }
 0x2f7   : > { %3462 = vmatprep.subr.bf16.mxu0 %v3461_v28  ;;  %v1769_v28 = vld [vmem:[#allocation13 + $0x18] sm:$0xff] }
 0x2f8   : > { %v3477_v22 = vpack.c.bf16 %v1769_v28, %v1767_v36 }
 0x2fa   : > { %3464 = vmatpush1.bf16.msra.mxu0 %v3463_v49 }
 0x2fb   : > { %3466 = vmatprep.subr.bf16.mxu0 %v3465_v7  ;;  %v1991_v7 = vld [vmem:[#allocation11 + $0x8] sm:$0xff] }
 0x2fe   : > { %3468 = vmatpush1.bf16.msra.mxu0 %v3467_v21  ;;  %v4980_v21 = vpack.c.bf16 %v1993_v54, %v1991_v7 }
 0x2ff   : > { %3470 = vmatprep.subr.bf16.mxu0 %v3469_v29  ;;  %v1475_v29 = vmax.f32 %v4969_v42, 0.0  ;;  %v2923_v42 = vsel %vm1760_vm1, 1.0, %v5417_v39 }
 0x302   : > { %3472 = vmatpush1.bf16.msra.mxu0 %v3471_v19  ;;  %v1990_v19 = vld [vmem:[#allocation11] sm:$0xff] }
 0x303   : > { %3474 = vmatprep.subr.bf16.mxu0 %v3473_v58  ;;  %v1995_v58 = vld [vmem:[#allocation11 + $0x28] sm:$0xff]  ;;  %v4991_v36 = vpack.c.bf16 %v1992_v55, %v1990_v19  ;;  %v2002_v55 = vld [vmem:[#allocation11 + $0x60] sm:$0xff] }
 0x304   : > { %v4972_v49 = vpop.f32.mrb[8].mxu1  ;;  %v4993_v28 = vpack.c.bf16 %v1997_v1, %v1995_v58  ;;  %v2004_v58 = vld [vmem:[#allocation11 + $0x70] sm:$0xff]  ;;  %v2007_v1 = vld [vmem:[#allocation11 + $0x88] sm:$0xff] }
 0x305   : > { %v4974_v23 = vpop.f32.mrb[9].mxu1 }
 0x306   : > { %3476 = vmatpush1.bf16.msra.mxu0 %v3475_v43  ;;  %v1994_v43 = vld [vmem:[#allocation11 + $0x20] sm:$0xff] }
 0x307   : > { %3478 = vmatprep.subr.bf16.mxu0 %v3477_v22  ;;  %v1999_v22 = vld [vmem:[#allocation11 + $0x48] sm:$0xff]  ;;  %v4999_v7 = vpack.c.bf16 %v1996_v13, %v1994_v43  ;;  %v5015_v43 = vpack.c.bf16 %v2009_v30, %v2007_v1  ;;  %v2006_v13 = vld [vmem:[#allocation11 + $0x80] sm:$0xff] }
 0x308   : > { %v4983_v2 = vpop.f32.mrb[10].mxu1  ;;  %v5002_v54 = vpack.c.bf16 %v2001_v27, %v1999_v22  ;;  %v2008_v22 = vld [vmem:[#allocation11 + $0x90] sm:$0xff]  ;;  %v2011_v27 = vld [vmem:[#allocation11 + $0xa8] sm:$0xff] }
 0x309   : > { %1746 = vmatmul.mubr.f32.vlgmr.msra.gmra.mrb[8].mxu0 %v1470_v16  ;;  %v4985_v44 = vpop.f32.mrb[11].mxu1  ;;  %5418 = vst [vmem:[#allocation52_spill] sm:$0xff] %v4999_v7  ;;  %v2000_v16 = vld [vmem:[#allocation11 + $0x50] sm:$0xff]  ;;  %5423 = vst [vmem:[#allocation57_spill] sm:$0xff] %v5015_v43 }
 0x30a   : > { %1751 = vmatprep.mubr.f32.mxu0 %v1475_v29  ;;  %3480 = vmatpush1.bf16.msra.mxu0 %v3479_v20  ;;  %5419 = vst [vmem:[#allocation53_spill] sm:$0xff] %v5002_v54  ;;  %v1998_v20 = vld [vmem:[#allocation11 + $0x40] sm:$0xff]  ;;  %v2003_v29 = vld [vmem:[#allocation11 + $0x68] sm:$0xff] }
 0x30b   : > { %3610 = vmatprep.subr.bf16.mxu0 %v4980_v21  ;;  %v5009_v19 = vpack.c.bf16 %v2005_v52, %v2003_v29  ;;  %v2010_v29 = vld [vmem:[#allocation11 + $0xa0] sm:$0xff]  ;;  %v2012_v52 = vld [vmem:[#allocation11 + $0xb0] sm:$0xff] }
 0x30c   : > { %v5024_v1 = vpack.c.bf16 %v2012_v52, %v2010_v29  ;;  %v2023_v29 = vld [vmem:[#allocation11 + $0x108] sm:$0xff]  ;;  %v2025_v52 = vld [vmem:[#allocation11 + $0x118] sm:$0xff] }
 0x30d   : > { %1752 = vmatmul.mubr.f32.gmra.mrb[10].mxu0 %v1474_v3  ;;  %v5006_v3 = vpack.c.bf16 %v2000_v16, %v1998_v20  ;;  %5421 = vst [vmem:[#allocation55_spill] sm:$0xff] %v5009_v19  ;;  %v5018_v20 = vpack.c.bf16 %v2008_v22, %v2006_v13  ;;  %v2019_v13 = vld [vmem:[#allocation11 + $0xe8] sm:$0xff]  ;;  %v2021_v22 = vld [vmem:[#allocation11 + $0xf8] sm:$0xff] }
 0x30e   : > { %1840 = vmatprep.mubr.f32.mxu0 %v5417_v39  ;;  %5426 = vst [vmem:[#allocation60_spill] sm:$0xff] %v5024_v1 }
 0x30f   : > { %5420 = vst [vmem:[#allocation54_spill] sm:$0xff] %v5006_v3  ;;  %5424 = vst [vmem:[#allocation58_spill] sm:$0xff] %v5018_v20 }
 0x311   : > { %2925 = vmatmul.mubr.msk.f32.vlgmr.msra.gmra.mrb[12].mxu0 %vm442_vm0, %v2923_v42  ;;  %v5012_v42 = vpack.c.bf16 %v2004_v58, %v2002_v55  ;;  %v2015_v55 = vld [vmem:[#allocation11 + $0xc8] sm:$0xff]  ;;  %v2017_v58 = vld [vmem:[#allocation11 + $0xd8] sm:$0xff] }
 0x312   : > { %3612 = vmatpush1.bf16.msra.mxu0 %v4991_v36  ;;  %1846 = vmatprep.mubr.f32.mxu0 %v5417_v39  ;;  %v5027_v30 = vpack.c.bf16 %v2017_v58, %v2015_v55  ;;  %v5039_v58 = vpack.c.bf16 %v2025_v52, %v2023_v29 }
 0x313   : > { %3614 = vmatprep.subr.bf16.mxu0 %v4993_v28  ;;  %5422 = vst [vmem:[#allocation56_spill] sm:$0xff] %v5012_v42 }
 0x314   : > { %5427 = vst [vmem:[#allocation61_spill] sm:$0xff] %v5027_v30  ;;  %5431 = vst [vmem:[#allocation65_spill] sm:$0xff] %v5039_v58 }
 0x315   : > { %2926 = vmatmul.mubr.msk.f32.gmra.mrb[14].mxu0 %vm442_vm0, %v2924_v33  ;;  %v2013_v33 = vld [vmem:[#allocation11 + $0xb8] sm:$0xff] }
 0x316   : > { %3616 = vmatpush1.bf16.msra.mxu0 %v4999_v7  ;;  %v5021_v16 = vpack.c.bf16 %v2013_v33, %v2011_v27  ;;  %v5033_v33 = vpack.c.bf16 %v2021_v22, %v2019_v13 }
 0x317   : > { %3618 = vmatprep.subr.bf16.mxu0 %v5002_v54 }
 0x318   : > { %5425 = vst [vmem:[#allocation59_spill] sm:$0xff] %v5021_v16  ;;  %5429 = vst [vmem:[#allocation63_spill] sm:$0xff] %v5033_v33 }
 0x31a   : > { %3620 = vmatpush1.bf16.msra.mxu0 %v5006_v3  ;;  %v2053_v3 = vld [vmem:[#allocation11 + $0x1f8] sm:$0xff] }
 0x31b   : > { %3622 = vmatprep.subr.bf16.mxu0 %v5009_v19  ;;  %v2014_v19 = vld [vmem:[#allocation11 + $0xc0] sm:$0xff] }
 0x31e   : > { %3624 = vmatpush1.bf16.msra.mxu0 %v5012_v42  ;;  %v2016_v42 = vld [vmem:[#allocation11 + $0xd0] sm:$0xff] }
 0x31f   : > { %3626 = vmatprep.subr.bf16.mxu0 %v5015_v43  ;;  %v5030_v27 = vpack.c.bf16 %v2016_v42, %v2014_v19  ;;  %v2018_v43 = vld [vmem:[#allocation11 + $0xe0] sm:$0xff]  ;;  %v2027_v19 = vld [vmem:[#allocation11 + $0x128] sm:$0xff]  ;;  %v2029_v42 = vld [vmem:[#allocation11 + $0x138] sm:$0xff] }
 0x320   : > { %v5045_v22 = vpack.c.bf16 %v2029_v42, %v2027_v19 }
 0x321   : > { %5428 = vst [vmem:[#allocation62_spill] sm:$0xff] %v5030_v27 }
 0x322   : > { %3628 = vmatpush1.bf16.msra.mxu0 %v5018_v20  ;;  %v2020_v20 = vld [vmem:[#allocation11 + $0xf0] sm:$0xff]  ;;  %5433 = vst [vmem:[#allocation67_spill] sm:$0xff] %v5045_v22 }
 0x323   : > { %3630 = vmatprep.subr.bf16.mxu0 %v5021_v16  ;;  %v5036_v55 = vpack.c.bf16 %v2020_v20, %v2018_v43  ;;  %v2022_v16 = vld [vmem:[#allocation11 + $0x100] sm:$0xff]  ;;  %v2031_v43 = vld [vmem:[#allocation11 + $0x148] sm:$0xff]  ;;  %v2033_v20 = vld [vmem:[#allocation11 + $0x158] sm:$0xff] }
 0x324   : > { %v5051_v52 = vpack.c.bf16 %v2033_v20, %v2031_v43 }
 0x325   : > { %5430 = vst [vmem:[#allocation64_spill] sm:$0xff] %v5036_v55 }
 0x326   : > { %3632 = vmatpush1.bf16.msra.mxu0 %v5024_v1  ;;  %v2024_v1 = vld [vmem:[#allocation11 + $0x110] sm:$0xff]  ;;  %5435 = vst [vmem:[#allocation69_spill] sm:$0xff] %v5051_v52 }
 0x327   : > { %3634 = vmatprep.subr.bf16.mxu0 %v5027_v30  ;;  %v5042_v13 = vpack.c.bf16 %v2024_v1, %v2022_v16  ;;  %v2026_v30 = vld [vmem:[#allocation11 + $0x120] sm:$0xff]  ;;  %v2035_v16 = vld [vmem:[#allocation11 + $0x168] sm:$0xff]  ;;  %v2037_v1 = vld [vmem:[#allocation11 + $0x178] sm:$0xff] }
 0x328   : > { %v5057_v42 = vpack.c.bf16 %v2037_v1, %v2035_v16 }
 0x329   : > { %5432 = vst [vmem:[#allocation66_spill] sm:$0xff] %v5042_v13 }
 0x32a   : > { %3636 = vmatpush1.bf16.msra.mxu0 %v5030_v27  ;;  %v2028_v27 = vld [vmem:[#allocation11 + $0x130] sm:$0xff]  ;;  %5437 = vst [vmem:[#allocation71_spill] sm:$0xff] %v5057_v42 }
 0x32b   : > { %3638 = vmatprep.subr.bf16.mxu0 %v5033_v33  ;;  %v5048_v29 = vpack.c.bf16 %v2028_v27, %v2026_v30  ;;  %v2030_v33 = vld [vmem:[#allocation11 + $0x140] sm:$0xff]  ;;  %v2039_v30 = vld [vmem:[#allocation11 + $0x188] sm:$0xff]  ;;  %v2041_v27 = vld [vmem:[#allocation11 + $0x198] sm:$0xff] }
 0x32c   : > { %v5063_v20 = vpack.c.bf16 %v2041_v27, %v2039_v30 }
 0x32d   : > { %5434 = vst [vmem:[#allocation68_spill] sm:$0xff] %v5048_v29 }
 0x32e   : > { %3640 = vmatpush1.bf16.msra.mxu0 %v5036_v55  ;;  %v2032_v55 = vld [vmem:[#allocation11 + $0x150] sm:$0xff]  ;;  %5439 = vst [vmem:[#allocation73_spill] sm:$0xff] %v5063_v20 }
 0x32f   : > { %3642 = vmatprep.subr.bf16.mxu0 %v5039_v58  ;;  %v5054_v19 = vpack.c.bf16 %v2032_v55, %v2030_v33  ;;  %v2034_v58 = vld [vmem:[#allocation11 + $0x160] sm:$0xff]  ;;  %v2043_v33 = vld [vmem:[#allocation11 + $0x1a8] sm:$0xff]  ;;  %v2045_v55 = vld [vmem:[#allocation11 + $0x1b8] sm:$0xff] }
 0x330   : > { %v5069_v1 = vpack.c.bf16 %v2045_v55, %v2043_v33 }
 0x331   : > { %5436 = vst [vmem:[#allocation70_spill] sm:$0xff] %v5054_v19 }
 0x332   : > { %3644 = vmatpush1.bf16.msra.mxu0 %v5042_v13  ;;  %v2036_v13 = vld [vmem:[#allocation11 + $0x170] sm:$0xff]  ;;  %5441 = vst [vmem:[#allocation75_spill] sm:$0xff] %v5069_v1 }
 0x333   : > { %3646 = vmatprep.subr.bf16.mxu0 %v5045_v22  ;;  %v5060_v43 = vpack.c.bf16 %v2036_v13, %v2034_v58  ;;  %v2038_v22 = vld [vmem:[#allocation11 + $0x180] sm:$0xff]  ;;  %v2047_v58 = vld [vmem:[#allocation11 + $0x1c8] sm:$0xff]  ;;  %v2049_v13 = vld [vmem:[#allocation11 + $0x1d8] sm:$0xff] }
 0x334   : > { %v5075_v27 = vpack.c.bf16 %v2049_v13, %v2047_v58  ;;  %v2052_v58 = vld [vmem:[#allocation11 + $0x1f0] sm:$0xff] }
 0x335   : > { %5438 = vst [vmem:[#allocation72_spill] sm:$0xff] %v5060_v43 }
 0x336   : > { %3648 = vmatpush1.bf16.msra.mxu0 %v5048_v29  ;;  %v2040_v29 = vld [vmem:[#allocation11 + $0x190] sm:$0xff] }
 0x337   : > { %3650 = vmatprep.subr.bf16.mxu0 %v5051_v52  ;;  %v5066_v16 = vpack.c.bf16 %v2040_v29, %v2038_v22  ;;  %v2042_v52 = vld [vmem:[#allocation11 + $0x1a0] sm:$0xff]  ;;  %v2051_v29 = vld [vmem:[#allocation11 + $0x1e8] sm:$0xff] }
 0x339   : > { %5440 = vst [vmem:[#allocation74_spill] sm:$0xff] %v5066_v16 }
 0x33a   : > { %3652 = vmatpush1.bf16.msra.mxu0 %v5054_v19  ;;  %v2044_v19 = vld [vmem:[#allocation11 + $0x1b0] sm:$0xff] }
 0x33b   : > { %3654 = vmatprep.subr.bf16.mxu0 %v5057_v42  ;;  %v5072_v30 = vpack.c.bf16 %v2044_v19, %v2042_v52  ;;  %v2046_v42 = vld [vmem:[#allocation11 + $0x1c0] sm:$0xff]  ;;  %v5083_v52 = vpack.c.bf16 %v2053_v3, %v2051_v29 }
 0x33c   : > { %v2050_v19 = vld [vmem:[#allocation11 + $0x1e0] sm:$0xff] }
 0x33e   : > { %3656 = vmatpush1.bf16.msra.mxu0 %v5060_v43  ;;  %v2048_v43 = vld [vmem:[#allocation11 + $0x1d0] sm:$0xff] }
 0x33f   : > { %3658 = vmatprep.subr.bf16.mxu0 %v5063_v20  ;;  %v5080_v54 = vpack.c.bf16 %v2048_v43, %v2046_v42  ;;  %v4312_v42 = vmov 1.0   ;;  %v5458_v43 = vld [vmem:[#allocation36_spill] sm:$0xff] }
 0x342   : > { %3660 = vmatpush1.bf16.msra.mxu0 %v5066_v16 }
 0x343   : > { %3662 = vmatprep.subr.bf16.mxu0 %v5069_v1 }
 0x344   : > { %v2205_v22 = vpop.f32.mrb[12].mxu1 }
 0x345   : > { %v2216_v33 = vmax.f32 %v4972_v49, %v2205_v22  ;;  %v2207_v55 = vpop.f32.mrb[13].mxu1  ;;  %v5462_v22 = vld [vmem:[#allocation40_spill] sm:$0xff] }
 0x346   : > { %3664 = vmatpush1.bf16.msra.mxu0 %v5072_v30  ;;  %v2217_v20 = vmax.f32 %v4974_v23, %v2207_v55  ;;  %v5089_v23 = vpack.c.bf16 %v2052_v58, %v2050_v19  ;;  %v5463_v55 = vld [vmem:[#allocation41_spill] sm:$0xff]  ;;  %v5464_v19 = vld [vmem:[#allocation42_spill] sm:$0xff] }
 0x347   : > { %3666 = vmatprep.subr.bf16.mxu0 %v5075_v27  ;;  %v2220_v3 = vmax.f32 %v4845_v38, %v2216_v33 }
 0x348   : > { %v2221_v13 = vmax.f32 %v4749_v32, %v2217_v20  ;;  %v2211_v1 = vpop.f32.mrb[14].mxu1  ;;  %v5459_v20 = vld [vmem:[#allocation37_spill] sm:$0xff] }
 0x349   : > { %v2218_v16 = vmax.f32 %v4983_v2, %v2211_v1  ;;  %v2213_v7 = vpop.f32.mrb[15].mxu1  ;;  %vm2224_vm5 = vcmp.gt.f32.partialorder %v2220_v3, 0.1  ;;  %v5461_v1 = vld [vmem:[#allocation39_spill] sm:$0xff]  ;;  %v5466_v3 = vld [vmem:[#allocation44_spill] sm:$0xff] }
 0x34a   : > { %vm2225_vm3 = vcmp.gt.f32.partialorder %v2221_v13, 0.1  ;;  %3668 = vmatpush1.bf16.msra.mxu0 %v5080_v54  ;;  %v2219_v49 = vmax.f32 %v4985_v44, %v2213_v7  ;;  %v5456_v44 = vld [vmem:[#allocation34_spill] sm:$0xff]  ;;  %v5457_v7 = vld [vmem:[#allocation35_spill] sm:$0xff] }
 0x34b   : > { %3670 = vmatprep.subr.bf16.mxu0 %v5083_v52  ;;  %2931 = vmatprep.mubr.msk.f32.mxu0 %vm2225_vm3, %v4312_v42  ;;  %v2222_v2 = vmax.f32 %v4871_v46, %v2218_v16  ;;  %v5460_v16 = vld [vmem:[#allocation38_spill] sm:$0xff] }
 0x34c   : > { %v2223_v32 = vmax.f32 %v4857_v53, %v2219_v49  ;;  %v5465_v49 = vld [vmem:[#allocation43_spill] sm:$0xff] }
 0x34d   : > { %vm2226_vm6 = vcmp.gt.f32.partialorder %v2222_v2, 0.1  ;;  %v5468_v2 = vld [vmem:[#allocation46_spill] sm:$0xff] }
 0x34e   : > { %3672 = vmatpush1.bf16.msra.mxu0 %v5089_v23  ;;  %vm2227_vm4 = vcmp.gt.f32.partialorder %v2223_v32, 0.1  ;;  %v5467_v32 = vld [vmem:[#allocation45_spill] sm:$0xff] }
 0x34f   : > { %3746 = vmatprep.subr.bf16.mxu0 %v4836_v15 }
 0x351   : > { %2932 = vmatmul.mubr.msk.f32.vlgmr.msra.gmra.mrb[16].mxu0 %vm2224_vm5, %v4312_v42 }
 0x352   : > { %2933 = vmatprep.mubr.msk.f32.mxu0 %vm2227_vm4, %v4312_v42  ;;  %3748 = vmatpush1.bf16.msra.mxu0 %v4839_v34 }
 0x353   : > { %3750 = vmatprep.subr.bf16.mxu0 %v4848_v47 }
 0x355   : > { %2934 = vmatmul.mubr.msk.f32.gmra.mrb[18].mxu0 %vm2226_vm6, %v4312_v42 }
 0x356   : > { %3752 = vmatpush1.bf16.msra.mxu0 %v4862_v40 }
 0x357   : > { %3754 = vmatprep.subr.bf16.mxu0 %v4874_v8 }
 0x35a   : > { %3756 = vmatpush1.bf16.msra.mxu0 %v4879_v6 }
 0x35b   : > { %3758 = vmatprep.subr.bf16.mxu0 %v4882_v61 }
 0x35e   : > { %3760 = vmatpush1.bf16.msra.mxu0 %v4885_v17 }
 0x35f   : > { %3762 = vmatprep.subr.bf16.mxu0 %v4888_v24 }
 0x362   : > { %3764 = vmatpush1.bf16.msra.mxu0 %v4891_v48 }
 0x363   : > { %3766 = vmatprep.subr.bf16.mxu0 %v4894_v45  ;;  %v4014_v45 = vld [vmem:[%s4644_s25 + $0x8] sm:$0xff] }
 0x366   : > { %3768 = vmatpush1.bf16.msra.mxu0 %v4897_v62 }
 0x367   : > { %3770 = vmatprep.subr.bf16.mxu0 %v4900_v25 }
 0x36a   : > { %3772 = vmatpush1.bf16.msra.mxu0 %v4903_v56  ;;  %v4015_v56 = vld [vmem:[%s4644_s25] sm:$0xff]  ;;  %s4218_s25 = scalar_lea.vmem %s5246_s17, 512 }
 0x36b   : > { %3774 = vmatprep.subr.bf16.mxu0 %v4906_v60  ;;  %p4219_p5 = scmp.ne.s32.totalorder %s5246_s17, %s4218_s25  ;;  %p4226_p13 = scmp.lt.s32.totalorder %s4224_s22, %s4218_s25 }
 0x36d   : > { %p4220_p1 = pnand %p4219_p5, %p5498_p10  ;;  %p4227_p8 = por %p4226_p13, %p4225_p12 }
 0x36e   : > { %3776 = vmatpush1.bf16.msra.mxu0 %v4909_v9 }
 0x36f   : > { %3778 = vmatprep.subr.bf16.mxu0 %v4912_v5  ;;  %p4221_p11 = pneg %p4220_p1 }
 0x371   : > { %p4228_p7 = pnand %p4227_p8, %p4221_p11 }
 0x372   : > { %3780 = vmatpush1.bf16.msra.mxu0 %v4915_v0  ;;  %v4017_v0 = vld [vmem:[#allocation8 + $0x8] sm:$0xff] }
 0x373   : > { %3782 = vmatprep.subr.bf16.mxu0 %v4918_v4  ;;  %v4018_v4 = vld [vmem:[#allocation8 + $0x10] sm:$0xff] }
 0x376   : > { %3784 = vmatpush1.bf16.msra.mxu0 %v4921_v18  ;;  %v5443_v18 = vld [vmem:[#allocation21_spill] sm:$0xff] }
 0x377   : > { %3786 = vmatprep.subr.bf16.mxu0 %v4924_v12  ;;  %v5444_v12 = vld [vmem:[#allocation22_spill] sm:$0xff] }
 0x37a   : > { %3788 = vmatpush1.bf16.msra.mxu0 %v4927_v37  ;;  %v4019_v37 = vld [vmem:[#allocation8 + $0x18] sm:$0xff] }
 0x37b   : > { %3790 = vmatprep.subr.bf16.mxu0 %v4930_v50  ;;  %v5445_v50 = vld [vmem:[#allocation23_spill] sm:$0xff] }
 0x37e   : > { %3792 = vmatpush1.bf16.msra.mxu0 %v4933_v57  ;;  %v5446_v57 = vld [vmem:[#allocation24_spill] sm:$0xff] }
 0x37f   : > { %3794 = vmatprep.subr.bf16.mxu0 %v4936_v10  ;;  %v5447_v10 = vld [vmem:[#allocation25_spill] sm:$0xff] }
 0x382   : > { %3796 = vmatpush1.bf16.msra.mxu0 %v4939_v14  ;;  %v5448_v14 = vld [vmem:[#allocation26_spill] sm:$0xff] }
 0x383   : > { %3798 = vmatprep.subr.bf16.mxu0 %v4942_v26  ;;  %v5449_v26 = vld [vmem:[#allocation27_spill] sm:$0xff] }
 0x386   : > { %3800 = vmatpush1.bf16.msra.mxu0 %v4945_v31  ;;  %v5450_v31 = vld [vmem:[#allocation28_spill] sm:$0xff] }
 0x387   : > { %3802 = vmatprep.subr.bf16.mxu0 %v4948_v35  ;;  %v5451_v35 = vld [vmem:[#allocation29_spill] sm:$0xff] }
 0x38a   : > { %3804 = vmatpush1.bf16.msra.mxu0 %v4951_v11  ;;  %v5452_v11 = vld [vmem:[#allocation30_spill] sm:$0xff] }
 0x38b   : > { %3806 = vmatprep.subr.bf16.mxu0 %v4954_v63  ;;  %v5453_v63 = vld [vmem:[#allocation31_spill] sm:$0xff] }
 0x38e   : > { %3808 = vmatpush1.bf16.msra.mxu0 %v4957_v59  ;;  %v5454_v59 = vld [vmem:[#allocation32_spill] sm:$0xff] }
 0x3dc   : > { %v1747_v15 = vpop.f32.mrb[8].mxu0 }
 0x3dd   : > { %v1749_v34 = vpop.f32.mrb[9].mxu0 }
 0x3e0   : > { %v1753_v38 = vpop.f32.mrb[10].mxu0 }
 0x3e1   : > { %v1755_v47 = vpop.f32.mrb[11].mxu0 }
 0x3e4   : > { %v1842_v53 = vpop.f32.mrb[12].mxu0 }
 0x3e5   : > { %v1853_v40 = vmul.f32 %v1842_v53, %v1747_v15  ;;  %v1844_v46 = vpop.f32.mrb[13].mxu0  ;;  %v5469_v15 = vld [vmem:[#allocation47_spill] sm:$0xff] }
 0x3e6   : > { %v1854_v8 = vmul.f32 %v1844_v46, %v1749_v34  ;;  %v5470_v34 = vld [vmem:[#allocation48_spill] sm:$0xff]  ;;  %v5473_v53 = vld [vmem:[#allocation51_spill] sm:$0xff] }
 0x3e7   : > { %v5142_v60 = vadd.f32 %v4015_v56, %v1853_v40 }
 0x3e8   : > { %v1848_v6 = vpop.f32.mrb[14].mxu0  ;;  %v5136_v62 = vadd.f32 %v4014_v45, %v1854_v8 }
 0x3e9   : > { %v1855_v61 = vmul.f32 %v1848_v6, %v1753_v38  ;;  %v1850_v17 = vpop.f32.mrb[15].mxu0  ;;  %v5471_v38 = vld [vmem:[#allocation49_spill] sm:$0xff] }
 0x3ea   : > { %v1856_v24 = vmul.f32 %v1850_v17, %v1755_v47  ;;  %v5472_v47 = vld [vmem:[#allocation50_spill] sm:$0xff] }
 0x3eb   : > { %v5133_v48 = vadd.f32 %v4865_v41, %v1855_v61  ;;  %v4016_v41 = vld [vmem:[#allocation8] sm:$0xff] }
 0x3ec   : > { %v5139_v25 = vadd.f32 %v4851_v51, %v1856_v24  ;;  %v5442_v51 = vld [vmem:[#allocation20_spill] sm:$0xff] }
 0x3ed   : > { %v3675_v5 = vpack.c.bf16 %v5133_v48, %v5142_v60 }
 0x3ee   : > { %v3673_v9 = vpack.c.bf16 %v5139_v25, %v5136_v62 }
 0x3f0   : > { %3674 = vmatprep.subr.bf16.mxu1 %v3673_v9 }
 0x3f1   : > { %3676 = vmatpush1.bf16.msra.mxu1 %v3675_v5 }
 0x3f2   : > { %3678 = vmatprep.subr.bf16.mxu1 %v3673_v9 }
 0x3f4   : > { %2935 = vmatmul.mubr.msk.f32.vlgmr.msra.gmra.mrb[16].mxu1 %vm442_vm0, %v4016_v41 }
 0x3f5   : > { %3680 = vmatpush1.bf16.msra.mxu1 %v3675_v5  ;;  %2383 = vmatprep.mubr.f32.mxu1 %v5417_v39 }
 0x3f6   : > { %3682 = vmatprep.subr.bf16.mxu1 %v5442_v51 }
 0x3f8   : > { %2936 = vmatmul.mubr.msk.f32.gmra.mrb[18].mxu1 %vm442_vm0, %v4017_v0 }
 0x3f9   : > { %2454 = vmatprep.mubr.f32.mxu1 %v5417_v39 }
 0x3fc   : > { %2937 = vmatmul.mubr.msk.f32.vlgmr.msra.gmra.mrb[20].mxu1 %vm442_vm0, %v4018_v4 }
 0x3fd   : > { %2460 = vmatprep.mubr.f32.mxu1 %v5417_v39  ;;  %3684 = vmatpush1.bf16.msra.mxu1 %v5443_v18  ;;  %v5455_v39 = vld [vmem:[#allocation33_spill] sm:$0xff]  ;;  %v5474_v18 = vld [vmem:[#allocation52_spill] sm:$0xff] }
 0x3fe   : > { %3686 = vmatprep.subr.bf16.mxu1 %v5444_v12  ;;  %v5475_v12 = vld [vmem:[#allocation53_spill] sm:$0xff] }
 0x400   : > { %2938 = vmatmul.mubr.msk.f32.gmra.mrb[22].mxu1 %vm442_vm0, %v4019_v37  ;;  %v5476_v37 = vld [vmem:[#allocation54_spill] sm:$0xff] }
 0x401   : > { %3688 = vmatpush1.bf16.msra.mxu1 %v5445_v50  ;;  %v5477_v50 = vld [vmem:[#allocation55_spill] sm:$0xff] }
 0x402   : > { %3690 = vmatprep.subr.bf16.mxu1 %v5446_v57  ;;  %v5478_v57 = vld [vmem:[#allocation56_spill] sm:$0xff] }
 0x405   : > { %3692 = vmatpush1.bf16.msra.mxu1 %v5447_v10  ;;  %v5479_v10 = vld [vmem:[#allocation57_spill] sm:$0xff] }
 0x406   : > { %3694 = vmatprep.subr.bf16.mxu1 %v5448_v14  ;;  %v5481_v14 = vld [vmem:[#allocation59_spill] sm:$0xff] }
 0x409   : > { %3696 = vmatpush1.bf16.msra.mxu1 %v5449_v26  ;;  %v5483_v26 = vld [vmem:[#allocation61_spill] sm:$0xff] }
 0x40a   : > { %3698 = vmatprep.subr.bf16.mxu1 %v5450_v31  ;;  %v5484_v31 = vld [vmem:[#allocation62_spill] sm:$0xff] }
 0x40d   : > { %3700 = vmatpush1.bf16.msra.mxu1 %v5451_v35  ;;  %v5485_v35 = vld [vmem:[#allocation63_spill] sm:$0xff] }
 0x40e   : > { %3702 = vmatprep.subr.bf16.mxu1 %v5452_v11  ;;  %v5486_v11 = vld [vmem:[#allocation64_spill] sm:$0xff] }
 0x411   : > { %3704 = vmatpush1.bf16.msra.mxu1 %v5453_v63  ;;  %v5487_v63 = vld [vmem:[#allocation65_spill] sm:$0xff] }
 0x412   : > { %3706 = vmatprep.subr.bf16.mxu1 %v5454_v59  ;;  %v5488_v59 = vld [vmem:[#allocation66_spill] sm:$0xff] }
 0x415   : > { %3708 = vmatpush1.bf16.msra.mxu1 %v5455_v39  ;;  %v5489_v39 = vld [vmem:[#allocation67_spill] sm:$0xff] }
 0x416   : > { %3710 = vmatprep.subr.bf16.mxu1 %v5456_v44  ;;  %v5490_v44 = vld [vmem:[#allocation68_spill] sm:$0xff] }
 0x419   : > { %3712 = vmatpush1.bf16.msra.mxu1 %v5457_v7  ;;  %v5491_v7 = vld [vmem:[#allocation69_spill] sm:$0xff] }
 0x41a   : > { %3714 = vmatprep.subr.bf16.mxu1 %v5458_v43  ;;  %v5492_v43 = vld [vmem:[#allocation70_spill] sm:$0xff] }
 0x41d   : > { %3716 = vmatpush1.bf16.msra.mxu1 %v5459_v20  ;;  %v5493_v20 = vld [vmem:[#allocation71_spill] sm:$0xff] }
 0x41e   : > { %3718 = vmatprep.subr.bf16.mxu1 %v5460_v16  ;;  %v5494_v16 = vld [vmem:[#allocation72_spill] sm:$0xff] }
 0x421   : > { %3720 = vmatpush1.bf16.msra.mxu1 %v5461_v1  ;;  %v5495_v1 = vld [vmem:[#allocation73_spill] sm:$0xff] }
 0x422   : > { %3722 = vmatprep.subr.bf16.mxu1 %v5462_v22  ;;  %v5496_v22 = vld [vmem:[#allocation74_spill] sm:$0xff] }
 0x424   : > { %v5176_v29 = vpop.f32.mrb[16].mxu0 }
 0x425   : > { %v5178_v33 = vpop.f32.mrb[17].mxu0  ;;  %3724 = vmatpush1.bf16.msra.mxu1 %v5463_v55  ;;  %v5497_v55 = vld [vmem:[#allocation75_spill] sm:$0xff] }
 0x426   : > { %3726 = vmatprep.subr.bf16.mxu1 %v5464_v19 }
 0x428   : > { %v5182_v58 = vpop.f32.mrb[18].mxu0 }
 0x429   : > { %v5184_v13 = vpop.f32.mrb[19].mxu0  ;;  %3728 = vmatpush1.bf16.msra.mxu1 %v5465_v49 }
 0x42a   : > { %3730 = vmatprep.subr.bf16.mxu1 %v5466_v3 }
 0x42d   : > { %3732 = vmatpush1.bf16.msra.mxu1 %v5467_v32 }
 0x42e   : > { %3734 = vmatprep.subr.bf16.mxu1 %v5468_v2 }
 0x431   : > { %3736 = vmatpush1.bf16.msra.mxu1 %v5469_v15 }
 0x432   : > { %3738 = vmatprep.subr.bf16.mxu1 %v5470_v34 }
 0x435   : > { %3740 = vmatpush1.bf16.msra.mxu1 %v5471_v38 }
 0x436   : > { %3742 = vmatprep.subr.bf16.mxu1 %v5472_v47 }
 0x439   : > { %3744 = vmatpush1.bf16.msra.mxu1 %v5473_v53 }
 0x43a   : > { %3810 = vmatprep.subr.bf16.mxu1 %v4980_v21 }
 0x4c7   : > { %v2379_v40 = vpop.f32.mrb[16].mxu1 }
 0x4c8   : > { %v2381_v46 = vpop.f32.mrb[17].mxu1 }
 0x4cb   : > { %v2385_v8 = vpop.f32.mrb[18].mxu1 }
 0x4cc   : > { %v2387_v6 = vpop.f32.mrb[19].mxu1 }
 0x4cf   : > { %v2456_v61 = vpop.f32.mrb[20].mxu1 }
 0x4d0   : > { %v2467_v17 = vmax.f32 %v2379_v40, %v2456_v61  ;;  %v2458_v24 = vpop.f32.mrb[21].mxu1 }
 0x4d1   : > { %v2468_v45 = vmax.f32 %v2381_v46, %v2458_v24 }
 0x4d2   : > { %v2471_v5 = vmax.f32 %v2467_v17, %v5142_v60 }
 0x4d3   : > { %v2472_v56 = vmax.f32 %v2468_v45, %v5136_v62  ;;  %v2462_v9 = vpop.f32.mrb[22].mxu1  ;;  %v2728_v45 = vmul.f32 %v5182_v58, %v5133_v48 }
 0x4d4   : > { %v2469_v41 = vmax.f32 %v2385_v8, %v2462_v9  ;;  %v2464_v51 = vpop.f32.mrb[23].mxu1  ;;  %v2727_v8 = vmul.f32 %v5178_v33, %v5136_v62 }
 0x4d5   : > { %v2470_v0 = vmax.f32 %v2387_v6, %v2464_v51  ;;  %2539 = vmatprep.mubr.f32.mxu1 %v2472_v56  ;;  %2616 = vmatprep.mubr.f32.mxu0 %v2472_v56 }
 0x4d6   : > { %2540 = vmatmul.mubr.f32.vlgmr.msra.gmra.mrb[24].mxu1 %v2471_v5  ;;  %2617 = vmatmul.mubr.f32.vlgmr.msra.gmra.mrb[20].mxu0 %v2471_v5  ;;  %v2473_v4 = vmax.f32 %v2469_v41, %v5133_v48 }
 0x4d7   : > { %v2474_v21 = vmax.f32 %v2470_v0, %v5139_v25  ;;  %3812 = vmatpush1.bf16.msra.mxu1 %v4991_v36  ;;  %v5480_v36 = vld [vmem:[#allocation58_spill] sm:$0xff] }
 0x4d8   : > { %3814 = vmatprep.subr.bf16.mxu1 %v4993_v28  ;;  %v5482_v28 = vld [vmem:[#allocation60_spill] sm:$0xff] }
 0x4d9   : > { %2545 = vmatprep.mubr.f32.mxu1 %v2474_v21  ;;  %2622 = vmatprep.mubr.f32.mxu0 %v2474_v21 }
 0x4da   : > { %2546 = vmatmul.mubr.f32.gmra.mrb[26].mxu1 %v2473_v4  ;;  %2623 = vmatmul.mubr.f32.gmra.mrb[22].mxu0 %v2473_v4 }
 0x4db   : > { %3816 = vmatpush1.bf16.msra.mxu1 %v5474_v18 }
 0x4dc   : > { %3818 = vmatprep.subr.bf16.mxu1 %v5475_v12 }
 0x4df   : > { %3820 = vmatpush1.bf16.msra.mxu1 %v5476_v37 }
 0x4e0   : > { %3822 = vmatprep.subr.bf16.mxu1 %v5477_v50 }
 0x4e3   : > { %3824 = vmatpush1.bf16.msra.mxu1 %v5478_v57 }
 0x4e4   : > { %3826 = vmatprep.subr.bf16.mxu1 %v5479_v10 }
 0x4e7   : > { %3828 = vmatpush1.bf16.msra.mxu1 %v5480_v36 }
 0x4e8   : > { %3830 = vmatprep.subr.bf16.mxu1 %v5481_v14 }
 0x4eb   : > { %3832 = vmatpush1.bf16.msra.mxu1 %v5482_v28 }
 0x4ec   : > { %3834 = vmatprep.subr.bf16.mxu1 %v5483_v26 }
 0x4ef   : > { %3836 = vmatpush1.bf16.msra.mxu1 %v5484_v31 }
 0x4f0   : > { %3838 = vmatprep.subr.bf16.mxu1 %v5485_v35 }
 0x4f3   : > { %3840 = vmatpush1.bf16.msra.mxu1 %v5486_v11 }
 0x4f4   : > { %3842 = vmatprep.subr.bf16.mxu1 %v5487_v63 }
 0x4f7   : > { %3844 = vmatpush1.bf16.msra.mxu1 %v5488_v59 }
 0x4f8   : > { %3846 = vmatprep.subr.bf16.mxu1 %v5489_v39 }
 0x4fb   : > { %3848 = vmatpush1.bf16.msra.mxu1 %v5490_v44 }
 0x4fc   : > { %3850 = vmatprep.subr.bf16.mxu1 %v5491_v7 }
 0x4ff   : > { %3852 = vmatpush1.bf16.msra.mxu1 %v5492_v43 }
 0x500   : > { %3854 = vmatprep.subr.bf16.mxu1 %v5493_v20 }
 0x503   : > { %3856 = vmatpush1.bf16.msra.mxu1 %v5494_v16 }
 0x504   : > { %3858 = vmatprep.subr.bf16.mxu1 %v5495_v1 }
 0x507   : > { %3860 = vmatpush1.bf16.msra.mxu1 %v5496_v22 }
 0x508   : > { %3862 = vmatprep.subr.bf16.mxu1 %v5497_v55 }
 0x50b   : > { %3864 = vmatpush1.bf16.msra.mxu1 %v5072_v30 }
 0x50c   : > { %3866 = vmatprep.subr.bf16.mxu1 %v5075_v27 }
 0x50f   : > { %3868 = vmatpush1.bf16.msra.mxu1 %v5080_v54 }
 0x510   : > { %3870 = vmatprep.subr.bf16.mxu1 %v5083_v52 }
 0x513   : > { %3872 = vmatpush1.bf16.msra.mxu1 %v5089_v23  ;;  %v2726_v23 = vmul.f32 %v5176_v29, %v5142_v60 }
 0x5a9   : > { %v2541_v19 = vpop.f32.mrb[24].mxu1  ;;  %v2618_v49 = vpop.f32.mrb[20].mxu0 }
 0x5aa   : > { %v2629_v3 = vmax.f32 %v2541_v19, %v2618_v49  ;;  %v2543_v32 = vpop.f32.mrb[25].mxu1  ;;  %v2620_v2 = vpop.f32.mrb[21].mxu0 }
 0x5ab   : > { %v2630_v15 = vmax.f32 %v2543_v32, %v2620_v2 }
 0x5ac   : > { %v2633_v34 = vmax.f32 %v2471_v5, %v2629_v3 }
 0x5ad   : > { %v2634_v38 = vmax.f32 %v2472_v56, %v2630_v15  ;;  %v2547_v47 = vpop.f32.mrb[26].mxu1  ;;  %v2624_v53 = vpop.f32.mrb[22].mxu0 }
 0x5ae   : > { %v2631_v40 = vmax.f32 %v2547_v47, %v2624_v53  ;;  %v2549_v30 = vpop.f32.mrb[27].mxu1  ;;  %v2626_v46 = vpop.f32.mrb[23].mxu0  ;;  %vm2637_vm8 = vcmp.gt.f32.partialorder %v2633_v34, 0.1 }
 0x5af   : > { %vm2638_vm7 = vcmp.gt.f32.partialorder %v2634_v38, 0.1  ;;  %v2632_v54 = vmax.f32 %v2549_v30, %v2626_v46 }
 0x5b0   : > { %v2635_v27 = vmax.f32 %v2473_v4, %v2631_v40  ;;  %2943 = vmatprep.mubr.msk.f32.mxu1 %vm2638_vm7, %v4312_v42 }
 0x5b1   : > { %v2636_v52 = vmax.f32 %v2474_v21, %v2632_v54  ;;  %2944 = vmatmul.mubr.msk.f32.vlgmr.msra.gmra.mrb[28].mxu1 %vm2637_vm8, %v4312_v42 }
 0x5b2   : > { %vm2639_vm10 = vcmp.gt.f32.partialorder %v2635_v27, 0.1 }
 0x5b3   : > { %vm2640_vm9 = vcmp.gt.f32.partialorder %v2636_v52, 0.1 }
 0x5b4   : > { %2945 = vmatprep.mubr.msk.f32.mxu1 %vm2640_vm9, %v4312_v42 }
 0x5b5   : > { %2946 = vmatmul.mubr.msk.f32.gmra.mrb[30].mxu1 %vm2639_vm10, %v4312_v42  ;;  %v2729_v42 = vmul.f32 %v5184_v13, %v5139_v25 }
 0x684   : > { %v2715_v6 = vpop.f32.mrb[28].mxu1 }
 0x685   : > { %v2730_v61 = vmul.f32 %v2726_v23, %v2715_v6  ;;  %v2717_v17 = vpop.f32.mrb[29].mxu1 }
 0x686   : > { %v2731_v24 = vmul.f32 %v2727_v8, %v2717_v17 }
 0x687   : > { %2734 = vst [vmem:[%s427_s19] sm:$0xff] %v2730_v61 }
 0x688   : > { %2735 = vst [vmem:[%s427_s19 + $0x8] sm:$0xff] %v2731_v24  ;;  %v2721_v62 = vpop.f32.mrb[30].mxu1 }
 0x689   : > { %v2732_v60 = vmul.f32 %v2728_v45, %v2721_v62  ;;  %v2723_v29 = vpop.f32.mrb[31].mxu1 }
 0x68a   : > { %v2733_v33 = vmul.f32 %v2729_v42, %v2723_v29 }
 0x68b   : > { %2736 = vst [vmem:[%s427_s19 + $0x10] sm:$0xff] %v2732_v60 }
 0x68c   : > { %2737 = vst [vmem:[%s427_s19 + $0x18] sm:$0xff] %v2733_v33 }
 0x68d   : > { %4231 = shalt.err (!%p4228_p7)
}
 0x68e   : > { %s4232_s20 = scalar_lea.hbm %s5251_s11, 512  ;;  %s4236_s13 = scalar_lea.hbm %s5303_s8, 1024 }
 0x68f   : > { %p4233_p9 = scmp.ne.s32.totalorder %s5251_s11, %s4232_s20  ;;  %p4237_p0 = scmp.lt.u32.totalorder %s5251_s11, %s5303_s8 }
 0x690   : > { %p4238_p2 = scmp.lt.u32.totalorder %s4236_s13, %s4232_s20  ;;  %p4240_p5 = scmp.lt.u32.totalorder %s4232_s20, %s5251_s11 }
 0x691   : > { %p4234_p4 = pnand %p4233_p9, %p5498_p10 }
 0x692   : > { %p4239_p6 = por %p4238_p2, %p4237_p0 }
 0x693   : > { %p4235_p3 = pneg %p4234_p4 }
 0x694   : > { %p4241_p1 = por %p4240_p5, %p4239_p6 }
 0x696   : > { %p4242_p11 = pnand %p4241_p1, %p4235_p3 }
 0x698   : > { %4245 = shalt.err (!%p4242_p11)
}
 0x699   : > { %s4314_s25 = smov 256   ;;  %s4315_s12 = smov 16  }
 0x69a   : > { %3919 = dma.vmem_to_hbm [thread:$0]  (%p5498_p10), %s5246_s17, 512, %s5251_s11, %s2739_s18, %s4314_s25, %s4314_s25, %s4315_s12  }
 0x69b PF: > { %s2768_s9 = sand.u32 1, %s4284_s27   ;;  %p5499_p12 = scmp.ne.s32.totalorder %s5374_s24, 0 }
 0x69c   : > { %p5500_p13 = scmp.ge.s32.totalorder %s4296_s30, 2  ;;  %s2769_s22 = scalar_lea.sflag [#allocation4], %s2768_s9 }
 0x69e   : > { %p3945_p8 = pnand %p5500_p13, %p5499_p12 }
 0x6a0   : > { %4279 = dma.done.wait (!%p3945_p8), %s2769_s22, 512  }
 0x6a1   : > { %4281 = vsyncadd (!%p3945_p8), %s2769_s22, 4294966784  ;;  %p24_p7 = scmp.ge.s32.totalorder %s4556_s21, 4   ;;  %s5501_s27 = smov %s4288_s28 }
 0x6a2   : > { %s5502_s28 = smov %s4292_s29  ;;  %s5503_s29 = smov %s4567_s10 }
 0x6a3   : > { %s5504_s30 = smov %s4556_s21  ;;  %26 = sbr.rel (!%p24_p7) target bundleno = 8 (0x8), region = 128 }
 0x6aa   :  { %2774 = vsyncpa [#allocation3], 1 }
 0x6ab   :  { %2776 = vsyncpa [#allocation3 + $0x1], 1 }
 0x6ac   :  { %2777 = vsyncpa [#allocation6], 1 }
 0x6ad   :  { %2778 = vsyncpa [#allocation9], 1 }
 0x6ae   :  { %2779 = vsyncpa [#allocation12], 1 }
 0x6af   :  { %2780 = vsyncpa [#allocation4], 1 }
 0x6b0   :  { %2782 = vsyncpa [#allocation4 + $0x1], 1 }

</bundles_post_ra>
